<compile_context>
chip_gen: v7x
topology: tpu7x:2x2x1
jax: 0.10.0
libtpu: 0.0.40
codegen_flags: <defaults>
</compile_context>

<pallas_src>
import functools

import jax
import jax.numpy as jnp
from jax.experimental import pallas as pl
from jax.experimental.pallas import tpu as pltpu


def _gates_to_hc(gates, c, H):
    """PyTorch LSTM cell nonlinearity from pre-activation gates (B, 4H).

    One whole-vreg sigmoid and one tanh (2 EUP pushes), then slice; the used
    slices are bitwise identical to per-slice application.
    """
    sg = jax.nn.sigmoid(gates)
    th = jnp.tanh(gates)
    i = sg[:, 0 * H:1 * H]
    f = sg[:, 1 * H:2 * H]
    g = th[:, 2 * H:3 * H]
    o = sg[:, 3 * H:4 * H]
    c_new = f * c + i * g
    h_new = o * jnp.tanh(c_new)
    return h_new, c_new


def _dot_bf16(a_f32, w_bf16):
    """MXU matmul with bf16 operands and f32 accumulation."""
    return jnp.dot(a_f32.astype(jnp.bfloat16), w_bf16,
                   preferred_element_type=jnp.float32)


def seq2seq_lstm_kernel(
    x_flat_ref,                       # (T_in*B, D) bf16, time-major flattened
    x_last_ref,                       # (B, D) bf16, x[:, -1, :]
    e_wih0, e_whh0, e_b0,             # encoder layer 0
    e_wih1, e_whh1, e_b1,             # encoder layer 1
    d_wih0, d_whh0, d_b0,             # decoder layer 0 (step 0 uses d_wih0)
    d_w0f, d_b0f,                     # decoder layer 0, fc1 folded (steps >= 1)
    d_wih1, d_whh1, d_b1,             # decoder layer 1
    fc_w, fc_b,                       # fc1 (for the post-loop output matmul)
    out_ref,                          # (T_out*B, O) f32
    *, T_in, T_out, B, H,
):
    f32 = jnp.float32
    O = fc_w.shape[1]

    # ---- encoder layer 0: hoisted batched input projection (off-chain) ----
    proj = jnp.dot(x_flat_ref[...], e_wih0[...],
                   preferred_element_type=f32) + e_b0[...]      # (T_in*B, 4H)

    # ---- biases broadcast exactly once (hoisted out of the loops) ----------
    b1e = jnp.broadcast_to(e_b1[...], (B, 4 * H))
    b0d = jnp.broadcast_to(d_b0[...], (B, 4 * H))
    b0f = jnp.broadcast_to(d_b0f[...], (B, 4 * H))
    b1d = jnp.broadcast_to(d_b1[...], (B, 4 * H))
    fbb = jnp.broadcast_to(fc_b[...], (T_out * B, O))

    # ---- state carried in registers (Python locals), zero-initialized ------
    h0 = jnp.zeros((B, H), f32)
    c0 = jnp.zeros((B, H), f32)
    h1 = jnp.zeros((B, H), f32)
    c1 = jnp.zeros((B, H), f32)

    # ---------------- encoder: 2-layer LSTM over input sequence -------------
    for t in range(T_in):
        # layer 0: only h0 @ W_hh0 stays on the recurrent chain
        g0 = proj[t * B:(t + 1) * B, :] + _dot_bf16(h0, e_whh0[...])
        h0, c0 = _gates_to_hc(g0, c0, H)
        # layer 1: split dots; the h1-side dot depends only on prev-step state
        g1 = _dot_bf16(h0, e_wih1[...]) + _dot_bf16(h1, e_whh1[...]) + b1e
        h1, c1 = _gates_to_hc(g1, c1, H)

    # ---------------- decoder: autoregressive, fc1 folded into feedback -----
    relus = []
    for t in range(T_out):
        if t == 0:
            # first decoder input is x[:, -1, :] (un-folded input weight)
            g0 = (jnp.dot(x_last_ref[...], d_wih0[...],
                          preferred_element_type=f32)
                  + _dot_bf16(h0, d_whh0[...]) + b0d)
        else:
            # feedback path with fc1 folded: relu(h1_prev) @ (fc_w @ d_wih0)
            g0 = (_dot_bf16(relus[-1], d_w0f[...])
                  + _dot_bf16(h0, d_whh0[...]) + b0f)
        h0, c0 = _gates_to_hc(g0, c0, H)
        g1 = _dot_bf16(h0, d_wih1[...]) + _dot_bf16(h1, d_whh1[...]) + b1d
        h1, c1 = _gates_to_hc(g1, c1, H)
        relus.append(jnp.maximum(h1, 0.0))

    # ---- y outputs produced AFTER the loop: one batched matmul, one store --
    r_all = jnp.concatenate(relus, axis=0)                      # (T_out*B, H)
    out_ref[...] = _dot_bf16(r_all, fc_w[...]) + fbb


def lstm_seq2seq_forward(x, params, *, output_seq_len, hidden_size):
    """x: (B, T_in, D) float32 -> (B, output_seq_len, O) float32."""
    B, T_in, D = x.shape
    O = params["fc_w"].shape[1]
    assert O == D, "feedback loop requires output_size == input_size"
    H = hidden_size
    T_out = output_seq_len
    bf16 = jnp.bfloat16

    # time-major, flattened to 2-D in the wrapper (no tile-crossing reshape
    # inside the kernel); MXU operands cast to bf16 once here.
    x_tm = jnp.transpose(x, (1, 0, 2))                          # (T_in, B, D)
    x_flat = x_tm.reshape(T_in * B, D).astype(bf16)
    x_last = x[:, -1, :].astype(bf16)

    # Fold fc1 into the decoder layer-0 feedback path (steps t >= 1):
    #   dec_in @ W_ih = (relu(h1)@fc_w + fc_b) @ W_ih
    #                 = relu(h1) @ (fc_w@W_ih) + fc_b @ W_ih
    d_w0_fold = params["fc_w"] @ params["d_wih0"]               # (H, 4H) f32
    d_b0_fold = params["d_b0"] + params["fc_b"] @ params["d_wih0"]   # (1, 4H)

    args = (
        x_flat, x_last,
        params["e_wih0"].astype(bf16), params["e_whh0"].astype(bf16),
        params["e_b0"],
        params["e_wih1"].astype(bf16), params["e_whh1"].astype(bf16),
        params["e_b1"],
        params["d_wih0"].astype(bf16), params["d_whh0"].astype(bf16),
        params["d_b0"],
        d_w0_fold.astype(bf16), d_b0_fold,
        params["d_wih1"].astype(bf16), params["d_whh1"].astype(bf16),
        params["d_b1"],
        params["fc_w"].astype(bf16), params["fc_b"],
    )

    vmem = pl.BlockSpec(memory_space=pltpu.MemorySpace.VMEM)
    kernel = functools.partial(seq2seq_lstm_kernel,
                               T_in=T_in, T_out=T_out, B=B, H=H)

    out_flat = pl.pallas_call(
        kernel,
        out_shape=jax.ShapeDtypeStruct((T_out * B, O), jnp.float32),
        in_specs=[vmem] * len(args),
        out_specs=vmem,
    )(*args)
    # (T_out*B, O) -> (B, T_out, O) in XLA (outside the kernel)
    return jnp.transpose(out_flat.reshape(T_out, B, O), (1, 0, 2))


def init_params(key, input_size, hidden_size, output_size):
    """Deterministic PyTorch-style U(-1/sqrt(H), 1/sqrt(H)) init."""
    D, H, O = input_size, hidden_size, output_size
    bound = 1.0 / float(H) ** 0.5
    keys = iter(jax.random.split(key, 32))

    def u(shape):
        return jax.random.uniform(next(keys), shape, jnp.float32, -bound, bound)

    def lstm_layer(in_dim):
        # stored pre-transposed: (in_dim, 4H) / (H, 4H); bias = b_ih + b_hh
        return u((in_dim, 4 * H)), u((H, 4 * H)), u((1, 4 * H)) + u((1, 4 * H))

    p = {}
    p["e_wih0"], p["e_whh0"], p["e_b0"] = lstm_layer(D)   # encoder layer 0
    p["e_wih1"], p["e_whh1"], p["e_b1"] = lstm_layer(H)   # encoder layer 1
    p["d_wih0"], p["d_whh0"], p["d_b0"] = lstm_layer(D)   # decoder layer 0
    p["d_wih1"], p["d_whh1"], p["d_b1"] = lstm_layer(H)   # decoder layer 1
    p["fc_w"] = u((H, O))                                 # fc1 (transposed)
    p["fc_b"] = u((1, O))
    return p


def reference_forward(x, p, *, output_seq_len, hidden_size):
    """Pure-JAX f32 reference mirroring the PyTorch forward pass."""
    B, T_in, D = x.shape
    H = hidden_size

    def cell(xt, h, c, wih, whh, b):
        g = xt @ wih + h @ whh + b
        i = jax.nn.sigmoid(g[:, :H])
        f = jax.nn.sigmoid(g[:, H:2 * H])
        gg = jnp.tanh(g[:, 2 * H:3 * H])
        o = jax.nn.sigmoid(g[:, 3 * H:])
        c = f * c + i * gg
        return o * jnp.tanh(c), c

    h0 = c0 = h1 = c1 = jnp.zeros((B, H), jnp.float32)
    for t in range(T_in):
        h0, c0 = cell(x[:, t, :], h0, c0, p["e_wih0"], p["e_whh0"], p["e_b0"])
        h0_, c0_ = h0, c0
        h1, c1 = cell(h0_, h1, c1, p["e_wih1"], p["e_whh1"], p["e_b1"])

    dec_in = x[:, -1, :]
    outs = []
    for _ in range(output_seq_len):
        h0, c0 = cell(dec_in, h0, c0, p["d_wih0"], p["d_whh0"], p["d_b0"])
        h1, c1 = cell(h0, h1, c1, p["d_wih1"], p["d_whh1"], p["d_b1"])
        y = jnp.maximum(h1, 0.0) @ p["fc_w"] + p["fc_b"]
        outs.append(y)
        dec_in = y
    return jnp.stack(outs, axis=1)


if __name__ == "__main__":
    # module config (output_size == input_size so decoder feedback is valid)
    B = 2
    input_seq_len = 8
    output_seq_len = 4
    number_layer = 2
    input_size = 4
    output_size = 4
    hidden_size = 32
    # embed_size / kernel_size only parameterize conv1, unused in forward().

    key = jax.random.PRNGKey(0)
    kx, kp = jax.random.split(key)
    x = jax.random.normal(kx, (B, input_seq_len, input_size), jnp.float32)
    params = init_params(kp, input_size, hidden_size, output_size)

    out = lstm_seq2seq_forward(x, params,
                               output_seq_len=output_seq_len,
                               hidden_size=hidden_size)
    out = jax.block_until_ready(out)

    ref = reference_forward(x, params,
                            output_seq_len=output_seq_len,
                            hidden_size=hidden_size)
    assert out.shape == (B, output_seq_len, output_size)
    # tolerance covers bf16 MXU operands (f32 accumulation/state) over the
    # 12-step recurrence plus the fc1-fold reassociation; typical error ~1e-3.
    assert jnp.allclose(out, ref, atol=2e-2, rtol=2e-2), "mismatch vs JAX reference"

    print("KERNEL_OK")
</pallas_src>

<mosaic_0001>
module attributes {stable_mosaic.version = 11 : i64} {
  func.func @seq2seq_lstm_kernel(%arg0: memref<16x4xbf16, #tpu.memory_space<vmem>>, %arg1: memref<2x4xbf16, #tpu.memory_space<vmem>>, %arg2: memref<4x128xbf16, #tpu.memory_space<vmem>>, %arg3: memref<32x128xbf16, #tpu.memory_space<vmem>>, %arg4: memref<1x128xf32, #tpu.memory_space<vmem>>, %arg5: memref<32x128xbf16, #tpu.memory_space<vmem>>, %arg6: memref<32x128xbf16, #tpu.memory_space<vmem>>, %arg7: memref<1x128xf32, #tpu.memory_space<vmem>>, %arg8: memref<4x128xbf16, #tpu.memory_space<vmem>>, %arg9: memref<32x128xbf16, #tpu.memory_space<vmem>>, %arg10: memref<1x128xf32, #tpu.memory_space<vmem>>, %arg11: memref<32x128xbf16, #tpu.memory_space<vmem>>, %arg12: memref<1x128xf32, #tpu.memory_space<vmem>>, %arg13: memref<32x128xbf16, #tpu.memory_space<vmem>>, %arg14: memref<32x128xbf16, #tpu.memory_space<vmem>>, %arg15: memref<1x128xf32, #tpu.memory_space<vmem>>, %arg16: memref<32x4xbf16, #tpu.memory_space<vmem>>, %arg17: memref<1x4xf32, #tpu.memory_space<vmem>>, %arg18: memref<8x4xf32, #tpu.memory_space<vmem>>) attributes {dimension_semantics = [], scalar_prefetch = 0 : i64, scratch_operands = 0 : i64, tpu.core_type = #tpu.core_type<tc>} {
    %c0 = arith.constant 0 : index
    %c0_0 = arith.constant 0 : index
    %0 = vector.load %arg0[%c0, %c0_0] : memref<16x4xbf16, #tpu.memory_space<vmem>>, vector<16x4xbf16>
    %c0_1 = arith.constant 0 : index
    %c0_2 = arith.constant 0 : index
    %1 = vector.load %arg2[%c0_1, %c0_2] : memref<4x128xbf16, #tpu.memory_space<vmem>>, vector<4x128xbf16>
    %cst = arith.constant dense<0.000000e+00> : vector<16x128xf32>
    %2 = tpu.matmul %0, %1, %cst {dimension_numbers = #tpu.dot_dimension_numbers<[1], [0], [0], [1], [0, 0, 1, 1], [], []>} : vector<16x4xbf16>, vector<4x128xbf16>, vector<16x128xf32> -> vector<16x128xf32>
    %c0_3 = arith.constant 0 : index
    %c0_4 = arith.constant 0 : index
    %3 = vector.load %arg4[%c0_3, %c0_4] : memref<1x128xf32, #tpu.memory_space<vmem>>, vector<1x128xf32>
    %4 = vector.broadcast %3 : vector<1x128xf32> to vector<16x128xf32>
    %5 = arith.addf %2, %4 : vector<16x128xf32>
    %c0_5 = arith.constant 0 : index
    %c0_6 = arith.constant 0 : index
    %6 = vector.load %arg7[%c0_5, %c0_6] : memref<1x128xf32, #tpu.memory_space<vmem>>, vector<1x128xf32>
    %7 = vector.shape_cast %6 : vector<1x128xf32> to vector<1x128xf32>
    %8 = vector.broadcast %7 : vector<1x128xf32> to vector<2x128xf32>
    %c0_7 = arith.constant 0 : index
    %c0_8 = arith.constant 0 : index
    %9 = vector.load %arg10[%c0_7, %c0_8] : memref<1x128xf32, #tpu.memory_space<vmem>>, vector<1x128xf32>
    %10 = vector.shape_cast %9 : vector<1x128xf32> to vector<1x128xf32>
    %11 = vector.broadcast %10 : vector<1x128xf32> to vector<2x128xf32>
    %c0_9 = arith.constant 0 : index
    %c0_10 = arith.constant 0 : index
    %12 = vector.load %arg12[%c0_9, %c0_10] : memref<1x128xf32, #tpu.memory_space<vmem>>, vector<1x128xf32>
    %13 = vector.shape_cast %12 : vector<1x128xf32> to vector<1x128xf32>
    %14 = vector.broadcast %13 : vector<1x128xf32> to vector<2x128xf32>
    %c0_11 = arith.constant 0 : index
    %c0_12 = arith.constant 0 : index
    %15 = vector.load %arg15[%c0_11, %c0_12] : memref<1x128xf32, #tpu.memory_space<vmem>>, vector<1x128xf32>
    %16 = vector.shape_cast %15 : vector<1x128xf32> to vector<1x128xf32>
    %17 = vector.broadcast %16 : vector<1x128xf32> to vector<2x128xf32>
    %c0_13 = arith.constant 0 : index
    %c0_14 = arith.constant 0 : index
    %18 = vector.load %arg17[%c0_13, %c0_14] : memref<1x4xf32, #tpu.memory_space<vmem>>, vector<1x4xf32>
    %19 = vector.shape_cast %18 : vector<1x4xf32> to vector<1x4xf32>
    %20 = vector.broadcast %19 : vector<1x4xf32> to vector<8x4xf32>
    %cst_15 = arith.constant 0.000000e+00 : f32
    %21 = vector.broadcast %cst_15 : f32 to vector<2x32xf32>
    %cst_16 = arith.constant 0.000000e+00 : f32
    %22 = vector.broadcast %cst_16 : f32 to vector<2x32xf32>
    %cst_17 = arith.constant 0.000000e+00 : f32
    %23 = vector.broadcast %cst_17 : f32 to vector<2x32xf32>
    %cst_18 = arith.constant 0.000000e+00 : f32
    %24 = vector.broadcast %cst_18 : f32 to vector<2x32xf32>
    %25 = vector.extract_strided_slice %5 {offsets = [0, 0], sizes = [2, 128], strides = [1, 1]} : vector<16x128xf32> to vector<2x128xf32>
    %c0_19 = arith.constant 0 : index
    %c0_20 = arith.constant 0 : index
    %26 = vector.load %arg3[%c0_19, %c0_20] : memref<32x128xbf16, #tpu.memory_space<vmem>>, vector<32x128xbf16>
    %27 = arith.truncf %21 : vector<2x32xf32> to vector<2x32xbf16>
    %cst_21 = arith.constant dense<0.000000e+00> : vector<2x128xf32>
    %28 = tpu.matmul %27, %26, %cst_21 {dimension_numbers = #tpu.dot_dimension_numbers<[1], [0], [0], [1], [0, 0, 1, 1], [], []>} : vector<2x32xbf16>, vector<32x128xbf16>, vector<2x128xf32> -> vector<2x128xf32>
    %29 = arith.addf %25, %28 : vector<2x128xf32>
    %30 = arith.negf %29 : vector<2x128xf32>
    %31 = math.exp %30 : vector<2x128xf32>
    %cst_22 = arith.constant 1.000000e+00 : f32
    %32 = vector.broadcast %cst_22 : f32 to vector<2x128xf32>
    %33 = arith.addf %32, %31 : vector<2x128xf32>
    %34 = arith.divf %32, %33 : vector<2x128xf32>
    %35 = math.tanh %29 : vector<2x128xf32>
    %36 = vector.extract_strided_slice %34 {offsets = [0, 0], sizes = [2, 32], strides = [1, 1]} : vector<2x128xf32> to vector<2x32xf32>
    %37 = vector.extract_strided_slice %34 {offsets = [0, 32], sizes = [2, 32], strides = [1, 1]} : vector<2x128xf32> to vector<2x32xf32>
    %38 = vector.extract_strided_slice %35 {offsets = [0, 64], sizes = [2, 32], strides = [1, 1]} : vector<2x128xf32> to vector<2x32xf32>
    %39 = vector.extract_strided_slice %34 {offsets = [0, 96], sizes = [2, 32], strides = [1, 1]} : vector<2x128xf32> to vector<2x32xf32>
    %40 = arith.mulf %37, %22 : vector<2x32xf32>
    %41 = arith.mulf %36, %38 : vector<2x32xf32>
    %42 = arith.addf %40, %41 : vector<2x32xf32>
    %43 = math.tanh %42 : vector<2x32xf32>
    %44 = arith.mulf %39, %43 : vector<2x32xf32>
    %c0_23 = arith.constant 0 : index
    %c0_24 = arith.constant 0 : index
    %45 = vector.load %arg5[%c0_23, %c0_24] : memref<32x128xbf16, #tpu.memory_space<vmem>>, vector<32x128xbf16>
    %46 = arith.truncf %44 : vector<2x32xf32> to vector<2x32xbf16>
    %cst_25 = arith.constant dense<0.000000e+00> : vector<2x128xf32>
    %47 = tpu.matmul %46, %45, %cst_25 {dimension_numbers = #tpu.dot_dimension_numbers<[1], [0], [0], [1], [0, 0, 1, 1], [], []>} : vector<2x32xbf16>, vector<32x128xbf16>, vector<2x128xf32> -> vector<2x128xf32>
    %c0_26 = arith.constant 0 : index
    %c0_27 = arith.constant 0 : index
    %48 = vector.load %arg6[%c0_26, %c0_27] : memref<32x128xbf16, #tpu.memory_space<vmem>>, vector<32x128xbf16>
    %49 = arith.truncf %23 : vector<2x32xf32> to vector<2x32xbf16>
    %cst_28 = arith.constant dense<0.000000e+00> : vector<2x128xf32>
    %50 = tpu.matmul %49, %48, %cst_28 {dimension_numbers = #tpu.dot_dimension_numbers<[1], [0], [0], [1], [0, 0, 1, 1], [], []>} : vector<2x32xbf16>, vector<32x128xbf16>, vector<2x128xf32> -> vector<2x128xf32>
    %51 = arith.addf %47, %50 : vector<2x128xf32>
    %52 = arith.addf %51, %8 : vector<2x128xf32>
    %53 = arith.negf %52 : vector<2x128xf32>
    %54 = math.exp %53 : vector<2x128xf32>
    %cst_29 = arith.constant 1.000000e+00 : f32
    %55 = vector.broadcast %cst_29 : f32 to vector<2x128xf32>
    %56 = arith.addf %55, %54 : vector<2x128xf32>
    %57 = arith.divf %55, %56 : vector<2x128xf32>
    %58 = math.tanh %52 : vector<2x128xf32>
    %59 = vector.extract_strided_slice %57 {offsets = [0, 0], sizes = [2, 32], strides = [1, 1]} : vector<2x128xf32> to vector<2x32xf32>
    %60 = vector.extract_strided_slice %57 {offsets = [0, 32], sizes = [2, 32], strides = [1, 1]} : vector<2x128xf32> to vector<2x32xf32>
    %61 = vector.extract_strided_slice %58 {offsets = [0, 64], sizes = [2, 32], strides = [1, 1]} : vector<2x128xf32> to vector<2x32xf32>
    %62 = vector.extract_strided_slice %57 {offsets = [0, 96], sizes = [2, 32], strides = [1, 1]} : vector<2x128xf32> to vector<2x32xf32>
    %63 = arith.mulf %60, %24 : vector<2x32xf32>
    %64 = arith.mulf %59, %61 : vector<2x32xf32>
    %65 = arith.addf %63, %64 : vector<2x32xf32>
    %66 = math.tanh %65 : vector<2x32xf32>
    %67 = arith.mulf %62, %66 : vector<2x32xf32>
    %68 = vector.extract_strided_slice %5 {offsets = [2, 0], sizes = [2, 128], strides = [1, 1]} : vector<16x128xf32> to vector<2x128xf32>
    %c0_30 = arith.constant 0 : index
    %c0_31 = arith.constant 0 : index
    %69 = vector.load %arg3[%c0_30, %c0_31] : memref<32x128xbf16, #tpu.memory_space<vmem>>, vector<32x128xbf16>
    %70 = arith.truncf %44 : vector<2x32xf32> to vector<2x32xbf16>
    %cst_32 = arith.constant dense<0.000000e+00> : vector<2x128xf32>
    %71 = tpu.matmul %70, %69, %cst_32 {dimension_numbers = #tpu.dot_dimension_numbers<[1], [0], [0], [1], [0, 0, 1, 1], [], []>} : vector<2x32xbf16>, vector<32x128xbf16>, vector<2x128xf32> -> vector<2x128xf32>
    %72 = arith.addf %68, %71 : vector<2x128xf32>
    %73 = arith.negf %72 : vector<2x128xf32>
    %74 = math.exp %73 : vector<2x128xf32>
    %cst_33 = arith.constant 1.000000e+00 : f32
    %75 = vector.broadcast %cst_33 : f32 to vector<2x128xf32>
    %76 = arith.addf %75, %74 : vector<2x128xf32>
    %77 = arith.divf %75, %76 : vector<2x128xf32>
    %78 = math.tanh %72 : vector<2x128xf32>
    %79 = vector.extract_strided_slice %77 {offsets = [0, 0], sizes = [2, 32], strides = [1, 1]} : vector<2x128xf32> to vector<2x32xf32>
    %80 = vector.extract_strided_slice %77 {offsets = [0, 32], sizes = [2, 32], strides = [1, 1]} : vector<2x128xf32> to vector<2x32xf32>
    %81 = vector.extract_strided_slice %78 {offsets = [0, 64], sizes = [2, 32], strides = [1, 1]} : vector<2x128xf32> to vector<2x32xf32>
    %82 = vector.extract_strided_slice %77 {offsets = [0, 96], sizes = [2, 32], strides = [1, 1]} : vector<2x128xf32> to vector<2x32xf32>
    %83 = arith.mulf %80, %42 : vector<2x32xf32>
    %84 = arith.mulf %79, %81 : vector<2x32xf32>
    %85 = arith.addf %83, %84 : vector<2x32xf32>
    %86 = math.tanh %85 : vector<2x32xf32>
    %87 = arith.mulf %82, %86 : vector<2x32xf32>
    %c0_34 = arith.constant 0 : index
    %c0_35 = arith.constant 0 : index
    %88 = vector.load %arg5[%c0_34, %c0_35] : memref<32x128xbf16, #tpu.memory_space<vmem>>, vector<32x128xbf16>
    %89 = arith.truncf %87 : vector<2x32xf32> to vector<2x32xbf16>
    %cst_36 = arith.constant dense<0.000000e+00> : vector<2x128xf32>
    %90 = tpu.matmul %89, %88, %cst_36 {dimension_numbers = #tpu.dot_dimension_numbers<[1], [0], [0], [1], [0, 0, 1, 1], [], []>} : vector<2x32xbf16>, vector<32x128xbf16>, vector<2x128xf32> -> vector<2x128xf32>
    %c0_37 = arith.constant 0 : index
    %c0_38 = arith.constant 0 : index
    %91 = vector.load %arg6[%c0_37, %c0_38] : memref<32x128xbf16, #tpu.memory_space<vmem>>, vector<32x128xbf16>
    %92 = arith.truncf %67 : vector<2x32xf32> to vector<2x32xbf16>
    %cst_39 = arith.constant dense<0.000000e+00> : vector<2x128xf32>
    %93 = tpu.matmul %92, %91, %cst_39 {dimension_numbers = #tpu.dot_dimension_numbers<[1], [0], [0], [1], [0, 0, 1, 1], [], []>} : vector<2x32xbf16>, vector<32x128xbf16>, vector<2x128xf32> -> vector<2x128xf32>
    %94 = arith.addf %90, %93 : vector<2x128xf32>
    %95 = arith.addf %94, %8 : vector<2x128xf32>
    %96 = arith.negf %95 : vector<2x128xf32>
    %97 = math.exp %96 : vector<2x128xf32>
    %cst_40 = arith.constant 1.000000e+00 : f32
    %98 = vector.broadcast %cst_40 : f32 to vector<2x128xf32>
    %99 = arith.addf %98, %97 : vector<2x128xf32>
    %100 = arith.divf %98, %99 : vector<2x128xf32>
    %101 = math.tanh %95 : vector<2x128xf32>
    %102 = vector.extract_strided_slice %100 {offsets = [0, 0], sizes = [2, 32], strides = [1, 1]} : vector<2x128xf32> to vector<2x32xf32>
    %103 = vector.extract_strided_slice %100 {offsets = [0, 32], sizes = [2, 32], strides = [1, 1]} : vector<2x128xf32> to vector<2x32xf32>
    %104 = vector.extract_strided_slice %101 {offsets = [0, 64], sizes = [2, 32], strides = [1, 1]} : vector<2x128xf32> to vector<2x32xf32>
    %105 = vector.extract_strided_slice %100 {offsets = [0, 96], sizes = [2, 32], strides = [1, 1]} : vector<2x128xf32> to vector<2x32xf32>
    %106 = arith.mulf %103, %65 : vector<2x32xf32>
    %107 = arith.mulf %102, %104 : vector<2x32xf32>
    %108 = arith.addf %106, %107 : vector<2x32xf32>
    %109 = math.tanh %108 : vector<2x32xf32>
    %110 = arith.mulf %105, %109 : vector<2x32xf32>
    %111 = vector.extract_strided_slice %5 {offsets = [4, 0], sizes = [2, 128], strides = [1, 1]} : vector<16x128xf32> to vector<2x128xf32>
    %c0_41 = arith.constant 0 : index
    %c0_42 = arith.constant 0 : index
    %112 = vector.load %arg3[%c0_41, %c0_42] : memref<32x128xbf16, #tpu.memory_space<vmem>>, vector<32x128xbf16>
    %113 = arith.truncf %87 : vector<2x32xf32> to vector<2x32xbf16>
    %cst_43 = arith.constant dense<0.000000e+00> : vector<2x128xf32>
    %114 = tpu.matmul %113, %112, %cst_43 {dimension_numbers = #tpu.dot_dimension_numbers<[1], [0], [0], [1], [0, 0, 1, 1], [], []>} : vector<2x32xbf16>, vector<32x128xbf16>, vector<2x128xf32> -> vector<2x128xf32>
    %115 = arith.addf %111, %114 : vector<2x128xf32>
    %116 = arith.negf %115 : vector<2x128xf32>
    %117 = math.exp %116 : vector<2x128xf32>
    %cst_44 = arith.constant 1.000000e+00 : f32
    %118 = vector.broadcast %cst_44 : f32 to vector<2x128xf32>
    %119 = arith.addf %118, %117 : vector<2x128xf32>
    %120 = arith.divf %118, %119 : vector<2x128xf32>
    %121 = math.tanh %115 : vector<2x128xf32>
    %122 = vector.extract_strided_slice %120 {offsets = [0, 0], sizes = [2, 32], strides = [1, 1]} : vector<2x128xf32> to vector<2x32xf32>
    %123 = vector.extract_strided_slice %120 {offsets = [0, 32], sizes = [2, 32], strides = [1, 1]} : vector<2x128xf32> to vector<2x32xf32>
    %124 = vector.extract_strided_slice %121 {offsets = [0, 64], sizes = [2, 32], strides = [1, 1]} : vector<2x128xf32> to vector<2x32xf32>
    %125 = vector.extract_strided_slice %120 {offsets = [0, 96], sizes = [2, 32], strides = [1, 1]} : vector<2x128xf32> to vector<2x32xf32>
    %126 = arith.mulf %123, %85 : vector<2x32xf32>
    %127 = arith.mulf %122, %124 : vector<2x32xf32>
    %128 = arith.addf %126, %127 : vector<2x32xf32>
    %129 = math.tanh %128 : vector<2x32xf32>
    %130 = arith.mulf %125, %129 : vector<2x32xf32>
    %c0_45 = arith.constant 0 : index
    %c0_46 = arith.constant 0 : index
    %131 = vector.load %arg5[%c0_45, %c0_46] : memref<32x128xbf16, #tpu.memory_space<vmem>>, vector<32x128xbf16>
    %132 = arith.truncf %130 : vector<2x32xf32> to vector<2x32xbf16>
    %cst_47 = arith.constant dense<0.000000e+00> : vector<2x128xf32>
    %133 = tpu.matmul %132, %131, %cst_47 {dimension_numbers = #tpu.dot_dimension_numbers<[1], [0], [0], [1], [0, 0, 1, 1], [], []>} : vector<2x32xbf16>, vector<32x128xbf16>, vector<2x128xf32> -> vector<2x128xf32>
    %c0_48 = arith.constant 0 : index
    %c0_49 = arith.constant 0 : index
    %134 = vector.load %arg6[%c0_48, %c0_49] : memref<32x128xbf16, #tpu.memory_space<vmem>>, vector<32x128xbf16>
    %135 = arith.truncf %110 : vector<2x32xf32> to vector<2x32xbf16>
    %cst_50 = arith.constant dense<0.000000e+00> : vector<2x128xf32>
    %136 = tpu.matmul %135, %134, %cst_50 {dimension_numbers = #tpu.dot_dimension_numbers<[1], [0], [0], [1], [0, 0, 1, 1], [], []>} : vector<2x32xbf16>, vector<32x128xbf16>, vector<2x128xf32> -> vector<2x128xf32>
    %137 = arith.addf %133, %136 : vector<2x128xf32>
    %138 = arith.addf %137, %8 : vector<2x128xf32>
    %139 = arith.negf %138 : vector<2x128xf32>
    %140 = math.exp %139 : vector<2x128xf32>
    %cst_51 = arith.constant 1.000000e+00 : f32
    %141 = vector.broadcast %cst_51 : f32 to vector<2x128xf32>
    %142 = arith.addf %141, %140 : vector<2x128xf32>
    %143 = arith.divf %141, %142 : vector<2x128xf32>
    %144 = math.tanh %138 : vector<2x128xf32>
    %145 = vector.extract_strided_slice %143 {offsets = [0, 0], sizes = [2, 32], strides = [1, 1]} : vector<2x128xf32> to vector<2x32xf32>
    %146 = vector.extract_strided_slice %143 {offsets = [0, 32], sizes = [2, 32], strides = [1, 1]} : vector<2x128xf32> to vector<2x32xf32>
    %147 = vector.extract_strided_slice %144 {offsets = [0, 64], sizes = [2, 32], strides = [1, 1]} : vector<2x128xf32> to vector<2x32xf32>
    %148 = vector.extract_strided_slice %143 {offsets = [0, 96], sizes = [2, 32], strides = [1, 1]} : vector<2x128xf32> to vector<2x32xf32>
    %149 = arith.mulf %146, %108 : vector<2x32xf32>
    %150 = arith.mulf %145, %147 : vector<2x32xf32>
    %151 = arith.addf %149, %150 : vector<2x32xf32>
    %152 = math.tanh %151 : vector<2x32xf32>
    %153 = arith.mulf %148, %152 : vector<2x32xf32>
    %154 = vector.extract_strided_slice %5 {offsets = [6, 0], sizes = [2, 128], strides = [1, 1]} : vector<16x128xf32> to vector<2x128xf32>
    %c0_52 = arith.constant 0 : index
    %c0_53 = arith.constant 0 : index
    %155 = vector.load %arg3[%c0_52, %c0_53] : memref<32x128xbf16, #tpu.memory_space<vmem>>, vector<32x128xbf16>
    %156 = arith.truncf %130 : vector<2x32xf32> to vector<2x32xbf16>
    %cst_54 = arith.constant dense<0.000000e+00> : vector<2x128xf32>
    %157 = tpu.matmul %156, %155, %cst_54 {dimension_numbers = #tpu.dot_dimension_numbers<[1], [0], [0], [1], [0, 0, 1, 1], [], []>} : vector<2x32xbf16>, vector<32x128xbf16>, vector<2x128xf32> -> vector<2x128xf32>
    %158 = arith.addf %154, %157 : vector<2x128xf32>
    %159 = arith.negf %158 : vector<2x128xf32>
    %160 = math.exp %159 : vector<2x128xf32>
    %cst_55 = arith.constant 1.000000e+00 : f32
    %161 = vector.broadcast %cst_55 : f32 to vector<2x128xf32>
    %162 = arith.addf %161, %160 : vector<2x128xf32>
    %163 = arith.divf %161, %162 : vector<2x128xf32>
    %164 = math.tanh %158 : vector<2x128xf32>
    %165 = vector.extract_strided_slice %163 {offsets = [0, 0], sizes = [2, 32], strides = [1, 1]} : vector<2x128xf32> to vector<2x32xf32>
    %166 = vector.extract_strided_slice %163 {offsets = [0, 32], sizes = [2, 32], strides = [1, 1]} : vector<2x128xf32> to vector<2x32xf32>
    %167 = vector.extract_strided_slice %164 {offsets = [0, 64], sizes = [2, 32], strides = [1, 1]} : vector<2x128xf32> to vector<2x32xf32>
    %168 = vector.extract_strided_slice %163 {offsets = [0, 96], sizes = [2, 32], strides = [1, 1]} : vector<2x128xf32> to vector<2x32xf32>
    %169 = arith.mulf %166, %128 : vector<2x32xf32>
    %170 = arith.mulf %165, %167 : vector<2x32xf32>
    %171 = arith.addf %169, %170 : vector<2x32xf32>
    %172 = math.tanh %171 : vector<2x32xf32>
    %173 = arith.mulf %168, %172 : vector<2x32xf32>
    %c0_56 = arith.constant 0 : index
    %c0_57 = arith.constant 0 : index
    %174 = vector.load %arg5[%c0_56, %c0_57] : memref<32x128xbf16, #tpu.memory_space<vmem>>, vector<32x128xbf16>
    %175 = arith.truncf %173 : vector<2x32xf32> to vector<2x32xbf16>
    %cst_58 = arith.constant dense<0.000000e+00> : vector<2x128xf32>
    %176 = tpu.matmul %175, %174, %cst_58 {dimension_numbers = #tpu.dot_dimension_numbers<[1], [0], [0], [1], [0, 0, 1, 1], [], []>} : vector<2x32xbf16>, vector<32x128xbf16>, vector<2x128xf32> -> vector<2x128xf32>
    %c0_59 = arith.constant 0 : index
    %c0_60 = arith.constant 0 : index
    %177 = vector.load %arg6[%c0_59, %c0_60] : memref<32x128xbf16, #tpu.memory_space<vmem>>, vector<32x128xbf16>
    %178 = arith.truncf %153 : vector<2x32xf32> to vector<2x32xbf16>
    %cst_61 = arith.constant dense<0.000000e+00> : vector<2x128xf32>
    %179 = tpu.matmul %178, %177, %cst_61 {dimension_numbers = #tpu.dot_dimension_numbers<[1], [0], [0], [1], [0, 0, 1, 1], [], []>} : vector<2x32xbf16>, vector<32x128xbf16>, vector<2x128xf32> -> vector<2x128xf32>
    %180 = arith.addf %176, %179 : vector<2x128xf32>
    %181 = arith.addf %180, %8 : vector<2x128xf32>
    %182 = arith.negf %181 : vector<2x128xf32>
    %183 = math.exp %182 : vector<2x128xf32>
    %cst_62 = arith.constant 1.000000e+00 : f32
    %184 = vector.broadcast %cst_62 : f32 to vector<2x128xf32>
    %185 = arith.addf %184, %183 : vector<2x128xf32>
    %186 = arith.divf %184, %185 : vector<2x128xf32>
    %187 = math.tanh %181 : vector<2x128xf32>
    %188 = vector.extract_strided_slice %186 {offsets = [0, 0], sizes = [2, 32], strides = [1, 1]} : vector<2x128xf32> to vector<2x32xf32>
    %189 = vector.extract_strided_slice %186 {offsets = [0, 32], sizes = [2, 32], strides = [1, 1]} : vector<2x128xf32> to vector<2x32xf32>
    %190 = vector.extract_strided_slice %187 {offsets = [0, 64], sizes = [2, 32], strides = [1, 1]} : vector<2x128xf32> to vector<2x32xf32>
    %191 = vector.extract_strided_slice %186 {offsets = [0, 96], sizes = [2, 32], strides = [1, 1]} : vector<2x128xf32> to vector<2x32xf32>
    %192 = arith.mulf %189, %151 : vector<2x32xf32>
    %193 = arith.mulf %188, %190 : vector<2x32xf32>
    %194 = arith.addf %192, %193 : vector<2x32xf32>
    %195 = math.tanh %194 : vector<2x32xf32>
    %196 = arith.mulf %191, %195 : vector<2x32xf32>
    %197 = vector.extract_strided_slice %5 {offsets = [8, 0], sizes = [2, 128], strides = [1, 1]} : vector<16x128xf32> to vector<2x128xf32>
    %c0_63 = arith.constant 0 : index
    %c0_64 = arith.constant 0 : index
    %198 = vector.load %arg3[%c0_63, %c0_64] : memref<32x128xbf16, #tpu.memory_space<vmem>>, vector<32x128xbf16>
    %199 = arith.truncf %173 : vector<2x32xf32> to vector<2x32xbf16>
    %cst_65 = arith.constant dense<0.000000e+00> : vector<2x128xf32>
    %200 = tpu.matmul %199, %198, %cst_65 {dimension_numbers = #tpu.dot_dimension_numbers<[1], [0], [0], [1], [0, 0, 1, 1], [], []>} : vector<2x32xbf16>, vector<32x128xbf16>, vector<2x128xf32> -> vector<2x128xf32>
    %201 = arith.addf %197, %200 : vector<2x128xf32>
    %202 = arith.negf %201 : vector<2x128xf32>
    %203 = math.exp %202 : vector<2x128xf32>
    %cst_66 = arith.constant 1.000000e+00 : f32
    %204 = vector.broadcast %cst_66 : f32 to vector<2x128xf32>
    %205 = arith.addf %204, %203 : vector<2x128xf32>
    %206 = arith.divf %204, %205 : vector<2x128xf32>
    %207 = math.tanh %201 : vector<2x128xf32>
    %208 = vector.extract_strided_slice %206 {offsets = [0, 0], sizes = [2, 32], strides = [1, 1]} : vector<2x128xf32> to vector<2x32xf32>
    %209 = vector.extract_strided_slice %206 {offsets = [0, 32], sizes = [2, 32], strides = [1, 1]} : vector<2x128xf32> to vector<2x32xf32>
    %210 = vector.extract_strided_slice %207 {offsets = [0, 64], sizes = [2, 32], strides = [1, 1]} : vector<2x128xf32> to vector<2x32xf32>
    %211 = vector.extract_strided_slice %206 {offsets = [0, 96], sizes = [2, 32], strides = [1, 1]} : vector<2x128xf32> to vector<2x32xf32>
    %212 = arith.mulf %209, %171 : vector<2x32xf32>
    %213 = arith.mulf %208, %210 : vector<2x32xf32>
    %214 = arith.addf %212, %213 : vector<2x32xf32>
    %215 = math.tanh %214 : vector<2x32xf32>
    %216 = arith.mulf %211, %215 : vector<2x32xf32>
    %c0_67 = arith.constant 0 : index
    %c0_68 = arith.constant 0 : index
    %217 = vector.load %arg5[%c0_67, %c0_68] : memref<32x128xbf16, #tpu.memory_space<vmem>>, vector<32x128xbf16>
    %218 = arith.truncf %216 : vector<2x32xf32> to vector<2x32xbf16>
    %cst_69 = arith.constant dense<0.000000e+00> : vector<2x128xf32>
    %219 = tpu.matmul %218, %217, %cst_69 {dimension_numbers = #tpu.dot_dimension_numbers<[1], [0], [0], [1], [0, 0, 1, 1], [], []>} : vector<2x32xbf16>, vector<32x128xbf16>, vector<2x128xf32> -> vector<2x128xf32>
    %c0_70 = arith.constant 0 : index
    %c0_71 = arith.constant 0 : index
    %220 = vector.load %arg6[%c0_70, %c0_71] : memref<32x128xbf16, #tpu.memory_space<vmem>>, vector<32x128xbf16>
    %221 = arith.truncf %196 : vector<2x32xf32> to vector<2x32xbf16>
    %cst_72 = arith.constant dense<0.000000e+00> : vector<2x128xf32>
    %222 = tpu.matmul %221, %220, %cst_72 {dimension_numbers = #tpu.dot_dimension_numbers<[1], [0], [0], [1], [0, 0, 1, 1], [], []>} : vector<2x32xbf16>, vector<32x128xbf16>, vector<2x128xf32> -> vector<2x128xf32>
    %223 = arith.addf %219, %222 : vector<2x128xf32>
    %224 = arith.addf %223, %8 : vector<2x128xf32>
    %225 = arith.negf %224 : vector<2x128xf32>
    %226 = math.exp %225 : vector<2x128xf32>
    %cst_73 = arith.constant 1.000000e+00 : f32
    %227 = vector.broadcast %cst_73 : f32 to vector<2x128xf32>
    %228 = arith.addf %227, %226 : vector<2x128xf32>
    %229 = arith.divf %227, %228 : vector<2x128xf32>
    %230 = math.tanh %224 : vector<2x128xf32>
    %231 = vector.extract_strided_slice %229 {offsets = [0, 0], sizes = [2, 32], strides = [1, 1]} : vector<2x128xf32> to vector<2x32xf32>
    %232 = vector.extract_strided_slice %229 {offsets = [0, 32], sizes = [2, 32], strides = [1, 1]} : vector<2x128xf32> to vector<2x32xf32>
    %233 = vector.extract_strided_slice %230 {offsets = [0, 64], sizes = [2, 32], strides = [1, 1]} : vector<2x128xf32> to vector<2x32xf32>
    %234 = vector.extract_strided_slice %229 {offsets = [0, 96], sizes = [2, 32], strides = [1, 1]} : vector<2x128xf32> to vector<2x32xf32>
    %235 = arith.mulf %232, %194 : vector<2x32xf32>
    %236 = arith.mulf %231, %233 : vector<2x32xf32>
    %237 = arith.addf %235, %236 : vector<2x32xf32>
    %238 = math.tanh %237 : vector<2x32xf32>
    %239 = arith.mulf %234, %238 : vector<2x32xf32>
    %240 = vector.extract_strided_slice %5 {offsets = [10, 0], sizes = [2, 128], strides = [1, 1]} : vector<16x128xf32> to vector<2x128xf32>
    %c0_74 = arith.constant 0 : index
    %c0_75 = arith.constant 0 : index
    %241 = vector.load %arg3[%c0_74, %c0_75] : memref<32x128xbf16, #tpu.memory_space<vmem>>, vector<32x128xbf16>
    %242 = arith.truncf %216 : vector<2x32xf32> to vector<2x32xbf16>
    %cst_76 = arith.constant dense<0.000000e+00> : vector<2x128xf32>
    %243 = tpu.matmul %242, %241, %cst_76 {dimension_numbers = #tpu.dot_dimension_numbers<[1], [0], [0], [1], [0, 0, 1, 1], [], []>} : vector<2x32xbf16>, vector<32x128xbf16>, vector<2x128xf32> -> vector<2x128xf32>
    %244 = arith.addf %240, %243 : vector<2x128xf32>
    %245 = arith.negf %244 : vector<2x128xf32>
    %246 = math.exp %245 : vector<2x128xf32>
    %cst_77 = arith.constant 1.000000e+00 : f32
    %247 = vector.broadcast %cst_77 : f32 to vector<2x128xf32>
    %248 = arith.addf %247, %246 : vector<2x128xf32>
    %249 = arith.divf %247, %248 : vector<2x128xf32>
    %250 = math.tanh %244 : vector<2x128xf32>
    %251 = vector.extract_strided_slice %249 {offsets = [0, 0], sizes = [2, 32], strides = [1, 1]} : vector<2x128xf32> to vector<2x32xf32>
    %252 = vector.extract_strided_slice %249 {offsets = [0, 32], sizes = [2, 32], strides = [1, 1]} : vector<2x128xf32> to vector<2x32xf32>
    %253 = vector.extract_strided_slice %250 {offsets = [0, 64], sizes = [2, 32], strides = [1, 1]} : vector<2x128xf32> to vector<2x32xf32>
    %254 = vector.extract_strided_slice %249 {offsets = [0, 96], sizes = [2, 32], strides = [1, 1]} : vector<2x128xf32> to vector<2x32xf32>
    %255 = arith.mulf %252, %214 : vector<2x32xf32>
    %256 = arith.mulf %251, %253 : vector<2x32xf32>
    %257 = arith.addf %255, %256 : vector<2x32xf32>
    %258 = math.tanh %257 : vector<2x32xf32>
    %259 = arith.mulf %254, %258 : vector<2x32xf32>
    %c0_78 = arith.constant 0 : index
    %c0_79 = arith.constant 0 : index
    %260 = vector.load %arg5[%c0_78, %c0_79] : memref<32x128xbf16, #tpu.memory_space<vmem>>, vector<32x128xbf16>
    %261 = arith.truncf %259 : vector<2x32xf32> to vector<2x32xbf16>
    %cst_80 = arith.constant dense<0.000000e+00> : vector<2x128xf32>
    %262 = tpu.matmul %261, %260, %cst_80 {dimension_numbers = #tpu.dot_dimension_numbers<[1], [0], [0], [1], [0, 0, 1, 1], [], []>} : vector<2x32xbf16>, vector<32x128xbf16>, vector<2x128xf32> -> vector<2x128xf32>
    %c0_81 = arith.constant 0 : index
    %c0_82 = arith.constant 0 : index
    %263 = vector.load %arg6[%c0_81, %c0_82] : memref<32x128xbf16, #tpu.memory_space<vmem>>, vector<32x128xbf16>
    %264 = arith.truncf %239 : vector<2x32xf32> to vector<2x32xbf16>
    %cst_83 = arith.constant dense<0.000000e+00> : vector<2x128xf32>
    %265 = tpu.matmul %264, %263, %cst_83 {dimension_numbers = #tpu.dot_dimension_numbers<[1], [0], [0], [1], [0, 0, 1, 1], [], []>} : vector<2x32xbf16>, vector<32x128xbf16>, vector<2x128xf32> -> vector<2x128xf32>
    %266 = arith.addf %262, %265 : vector<2x128xf32>
    %267 = arith.addf %266, %8 : vector<2x128xf32>
    %268 = arith.negf %267 : vector<2x128xf32>
    %269 = math.exp %268 : vector<2x128xf32>
    %cst_84 = arith.constant 1.000000e+00 : f32
    %270 = vector.broadcast %cst_84 : f32 to vector<2x128xf32>
    %271 = arith.addf %270, %269 : vector<2x128xf32>
    %272 = arith.divf %270, %271 : vector<2x128xf32>
    %273 = math.tanh %267 : vector<2x128xf32>
    %274 = vector.extract_strided_slice %272 {offsets = [0, 0], sizes = [2, 32], strides = [1, 1]} : vector<2x128xf32> to vector<2x32xf32>
    %275 = vector.extract_strided_slice %272 {offsets = [0, 32], sizes = [2, 32], strides = [1, 1]} : vector<2x128xf32> to vector<2x32xf32>
    %276 = vector.extract_strided_slice %273 {offsets = [0, 64], sizes = [2, 32], strides = [1, 1]} : vector<2x128xf32> to vector<2x32xf32>
    %277 = vector.extract_strided_slice %272 {offsets = [0, 96], sizes = [2, 32], strides = [1, 1]} : vector<2x128xf32> to vector<2x32xf32>
    %278 = arith.mulf %275, %237 : vector<2x32xf32>
    %279 = arith.mulf %274, %276 : vector<2x32xf32>
    %280 = arith.addf %278, %279 : vector<2x32xf32>
    %281 = math.tanh %280 : vector<2x32xf32>
    %282 = arith.mulf %277, %281 : vector<2x32xf32>
    %283 = vector.extract_strided_slice %5 {offsets = [12, 0], sizes = [2, 128], strides = [1, 1]} : vector<16x128xf32> to vector<2x128xf32>
    %c0_85 = arith.constant 0 : index
    %c0_86 = arith.constant 0 : index
    %284 = vector.load %arg3[%c0_85, %c0_86] : memref<32x128xbf16, #tpu.memory_space<vmem>>, vector<32x128xbf16>
    %285 = arith.truncf %259 : vector<2x32xf32> to vector<2x32xbf16>
    %cst_87 = arith.constant dense<0.000000e+00> : vector<2x128xf32>
    %286 = tpu.matmul %285, %284, %cst_87 {dimension_numbers = #tpu.dot_dimension_numbers<[1], [0], [0], [1], [0, 0, 1, 1], [], []>} : vector<2x32xbf16>, vector<32x128xbf16>, vector<2x128xf32> -> vector<2x128xf32>
    %287 = arith.addf %283, %286 : vector<2x128xf32>
    %288 = arith.negf %287 : vector<2x128xf32>
    %289 = math.exp %288 : vector<2x128xf32>
    %cst_88 = arith.constant 1.000000e+00 : f32
    %290 = vector.broadcast %cst_88 : f32 to vector<2x128xf32>
    %291 = arith.addf %290, %289 : vector<2x128xf32>
    %292 = arith.divf %290, %291 : vector<2x128xf32>
    %293 = math.tanh %287 : vector<2x128xf32>
    %294 = vector.extract_strided_slice %292 {offsets = [0, 0], sizes = [2, 32], strides = [1, 1]} : vector<2x128xf32> to vector<2x32xf32>
    %295 = vector.extract_strided_slice %292 {offsets = [0, 32], sizes = [2, 32], strides = [1, 1]} : vector<2x128xf32> to vector<2x32xf32>
    %296 = vector.extract_strided_slice %293 {offsets = [0, 64], sizes = [2, 32], strides = [1, 1]} : vector<2x128xf32> to vector<2x32xf32>
    %297 = vector.extract_strided_slice %292 {offsets = [0, 96], sizes = [2, 32], strides = [1, 1]} : vector<2x128xf32> to vector<2x32xf32>
    %298 = arith.mulf %295, %257 : vector<2x32xf32>
    %299 = arith.mulf %294, %296 : vector<2x32xf32>
    %300 = arith.addf %298, %299 : vector<2x32xf32>
    %301 = math.tanh %300 : vector<2x32xf32>
    %302 = arith.mulf %297, %301 : vector<2x32xf32>
    %c0_89 = arith.constant 0 : index
    %c0_90 = arith.constant 0 : index
    %303 = vector.load %arg5[%c0_89, %c0_90] : memref<32x128xbf16, #tpu.memory_space<vmem>>, vector<32x128xbf16>
    %304 = arith.truncf %302 : vector<2x32xf32> to vector<2x32xbf16>
    %cst_91 = arith.constant dense<0.000000e+00> : vector<2x128xf32>
    %305 = tpu.matmul %304, %303, %cst_91 {dimension_numbers = #tpu.dot_dimension_numbers<[1], [0], [0], [1], [0, 0, 1, 1], [], []>} : vector<2x32xbf16>, vector<32x128xbf16>, vector<2x128xf32> -> vector<2x128xf32>
    %c0_92 = arith.constant 0 : index
    %c0_93 = arith.constant 0 : index
    %306 = vector.load %arg6[%c0_92, %c0_93] : memref<32x128xbf16, #tpu.memory_space<vmem>>, vector<32x128xbf16>
    %307 = arith.truncf %282 : vector<2x32xf32> to vector<2x32xbf16>
    %cst_94 = arith.constant dense<0.000000e+00> : vector<2x128xf32>
    %308 = tpu.matmul %307, %306, %cst_94 {dimension_numbers = #tpu.dot_dimension_numbers<[1], [0], [0], [1], [0, 0, 1, 1], [], []>} : vector<2x32xbf16>, vector<32x128xbf16>, vector<2x128xf32> -> vector<2x128xf32>
    %309 = arith.addf %305, %308 : vector<2x128xf32>
    %310 = arith.addf %309, %8 : vector<2x128xf32>
    %311 = arith.negf %310 : vector<2x128xf32>
    %312 = math.exp %311 : vector<2x128xf32>
    %cst_95 = arith.constant 1.000000e+00 : f32
    %313 = vector.broadcast %cst_95 : f32 to vector<2x128xf32>
    %314 = arith.addf %313, %312 : vector<2x128xf32>
    %315 = arith.divf %313, %314 : vector<2x128xf32>
    %316 = math.tanh %310 : vector<2x128xf32>
    %317 = vector.extract_strided_slice %315 {offsets = [0, 0], sizes = [2, 32], strides = [1, 1]} : vector<2x128xf32> to vector<2x32xf32>
    %318 = vector.extract_strided_slice %315 {offsets = [0, 32], sizes = [2, 32], strides = [1, 1]} : vector<2x128xf32> to vector<2x32xf32>
    %319 = vector.extract_strided_slice %316 {offsets = [0, 64], sizes = [2, 32], strides = [1, 1]} : vector<2x128xf32> to vector<2x32xf32>
    %320 = vector.extract_strided_slice %315 {offsets = [0, 96], sizes = [2, 32], strides = [1, 1]} : vector<2x128xf32> to vector<2x32xf32>
    %321 = arith.mulf %318, %280 : vector<2x32xf32>
    %322 = arith.mulf %317, %319 : vector<2x32xf32>
    %323 = arith.addf %321, %322 : vector<2x32xf32>
    %324 = math.tanh %323 : vector<2x32xf32>
    %325 = arith.mulf %320, %324 : vector<2x32xf32>
    %326 = vector.extract_strided_slice %5 {offsets = [14, 0], sizes = [2, 128], strides = [1, 1]} : vector<16x128xf32> to vector<2x128xf32>
    %c0_96 = arith.constant 0 : index
    %c0_97 = arith.constant 0 : index
    %327 = vector.load %arg3[%c0_96, %c0_97] : memref<32x128xbf16, #tpu.memory_space<vmem>>, vector<32x128xbf16>
    %328 = arith.truncf %302 : vector<2x32xf32> to vector<2x32xbf16>
    %cst_98 = arith.constant dense<0.000000e+00> : vector<2x128xf32>
    %329 = tpu.matmul %328, %327, %cst_98 {dimension_numbers = #tpu.dot_dimension_numbers<[1], [0], [0], [1], [0, 0, 1, 1], [], []>} : vector<2x32xbf16>, vector<32x128xbf16>, vector<2x128xf32> -> vector<2x128xf32>
    %330 = arith.addf %326, %329 : vector<2x128xf32>
    %331 = arith.negf %330 : vector<2x128xf32>
    %332 = math.exp %331 : vector<2x128xf32>
    %cst_99 = arith.constant 1.000000e+00 : f32
    %333 = vector.broadcast %cst_99 : f32 to vector<2x128xf32>
    %334 = arith.addf %333, %332 : vector<2x128xf32>
    %335 = arith.divf %333, %334 : vector<2x128xf32>
    %336 = math.tanh %330 : vector<2x128xf32>
    %337 = vector.extract_strided_slice %335 {offsets = [0, 0], sizes = [2, 32], strides = [1, 1]} : vector<2x128xf32> to vector<2x32xf32>
    %338 = vector.extract_strided_slice %335 {offsets = [0, 32], sizes = [2, 32], strides = [1, 1]} : vector<2x128xf32> to vector<2x32xf32>
    %339 = vector.extract_strided_slice %336 {offsets = [0, 64], sizes = [2, 32], strides = [1, 1]} : vector<2x128xf32> to vector<2x32xf32>
    %340 = vector.extract_strided_slice %335 {offsets = [0, 96], sizes = [2, 32], strides = [1, 1]} : vector<2x128xf32> to vector<2x32xf32>
    %341 = arith.mulf %338, %300 : vector<2x32xf32>
    %342 = arith.mulf %337, %339 : vector<2x32xf32>
    %343 = arith.addf %341, %342 : vector<2x32xf32>
    %344 = math.tanh %343 : vector<2x32xf32>
    %345 = arith.mulf %340, %344 : vector<2x32xf32>
    %c0_100 = arith.constant 0 : index
    %c0_101 = arith.constant 0 : index
    %346 = vector.load %arg5[%c0_100, %c0_101] : memref<32x128xbf16, #tpu.memory_space<vmem>>, vector<32x128xbf16>
    %347 = arith.truncf %345 : vector<2x32xf32> to vector<2x32xbf16>
    %cst_102 = arith.constant dense<0.000000e+00> : vector<2x128xf32>
    %348 = tpu.matmul %347, %346, %cst_102 {dimension_numbers = #tpu.dot_dimension_numbers<[1], [0], [0], [1], [0, 0, 1, 1], [], []>} : vector<2x32xbf16>, vector<32x128xbf16>, vector<2x128xf32> -> vector<2x128xf32>
    %c0_103 = arith.constant 0 : index
    %c0_104 = arith.constant 0 : index
    %349 = vector.load %arg6[%c0_103, %c0_104] : memref<32x128xbf16, #tpu.memory_space<vmem>>, vector<32x128xbf16>
    %350 = arith.truncf %325 : vector<2x32xf32> to vector<2x32xbf16>
    %cst_105 = arith.constant dense<0.000000e+00> : vector<2x128xf32>
    %351 = tpu.matmul %350, %349, %cst_105 {dimension_numbers = #tpu.dot_dimension_numbers<[1], [0], [0], [1], [0, 0, 1, 1], [], []>} : vector<2x32xbf16>, vector<32x128xbf16>, vector<2x128xf32> -> vector<2x128xf32>
    %352 = arith.addf %348, %351 : vector<2x128xf32>
    %353 = arith.addf %352, %8 : vector<2x128xf32>
    %354 = arith.negf %353 : vector<2x128xf32>
    %355 = math.exp %354 : vector<2x128xf32>
    %cst_106 = arith.constant 1.000000e+00 : f32
    %356 = vector.broadcast %cst_106 : f32 to vector<2x128xf32>
    %357 = arith.addf %356, %355 : vector<2x128xf32>
    %358 = arith.divf %356, %357 : vector<2x128xf32>
    %359 = math.tanh %353 : vector<2x128xf32>
    %360 = vector.extract_strided_slice %358 {offsets = [0, 0], sizes = [2, 32], strides = [1, 1]} : vector<2x128xf32> to vector<2x32xf32>
    %361 = vector.extract_strided_slice %358 {offsets = [0, 32], sizes = [2, 32], strides = [1, 1]} : vector<2x128xf32> to vector<2x32xf32>
    %362 = vector.extract_strided_slice %359 {offsets = [0, 64], sizes = [2, 32], strides = [1, 1]} : vector<2x128xf32> to vector<2x32xf32>
    %363 = vector.extract_strided_slice %358 {offsets = [0, 96], sizes = [2, 32], strides = [1, 1]} : vector<2x128xf32> to vector<2x32xf32>
    %364 = arith.mulf %361, %323 : vector<2x32xf32>
    %365 = arith.mulf %360, %362 : vector<2x32xf32>
    %366 = arith.addf %364, %365 : vector<2x32xf32>
    %367 = math.tanh %366 : vector<2x32xf32>
    %368 = arith.mulf %363, %367 : vector<2x32xf32>
    %c0_107 = arith.constant 0 : index
    %c0_108 = arith.constant 0 : index
    %369 = vector.load %arg1[%c0_107, %c0_108] : memref<2x4xbf16, #tpu.memory_space<vmem>>, vector<2x4xbf16>
    %c0_109 = arith.constant 0 : index
    %c0_110 = arith.constant 0 : index
    %370 = vector.load %arg8[%c0_109, %c0_110] : memref<4x128xbf16, #tpu.memory_space<vmem>>, vector<4x128xbf16>
    %cst_111 = arith.constant dense<0.000000e+00> : vector<2x128xf32>
    %371 = tpu.matmul %369, %370, %cst_111 {dimension_numbers = #tpu.dot_dimension_numbers<[1], [0], [0], [1], [0, 0, 1, 1], [], []>} : vector<2x4xbf16>, vector<4x128xbf16>, vector<2x128xf32> -> vector<2x128xf32>
    %c0_112 = arith.constant 0 : index
    %c0_113 = arith.constant 0 : index
    %372 = vector.load %arg9[%c0_112, %c0_113] : memref<32x128xbf16, #tpu.memory_space<vmem>>, vector<32x128xbf16>
    %373 = arith.truncf %345 : vector<2x32xf32> to vector<2x32xbf16>
    %cst_114 = arith.constant dense<0.000000e+00> : vector<2x128xf32>
    %374 = tpu.matmul %373, %372, %cst_114 {dimension_numbers = #tpu.dot_dimension_numbers<[1], [0], [0], [1], [0, 0, 1, 1], [], []>} : vector<2x32xbf16>, vector<32x128xbf16>, vector<2x128xf32> -> vector<2x128xf32>
    %375 = arith.addf %371, %374 : vector<2x128xf32>
    %376 = arith.addf %375, %11 : vector<2x128xf32>
    %377 = arith.negf %376 : vector<2x128xf32>
    %378 = math.exp %377 : vector<2x128xf32>
    %cst_115 = arith.constant 1.000000e+00 : f32
    %379 = vector.broadcast %cst_115 : f32 to vector<2x128xf32>
    %380 = arith.addf %379, %378 : vector<2x128xf32>
    %381 = arith.divf %379, %380 : vector<2x128xf32>
    %382 = math.tanh %376 : vector<2x128xf32>
    %383 = vector.extract_strided_slice %381 {offsets = [0, 0], sizes = [2, 32], strides = [1, 1]} : vector<2x128xf32> to vector<2x32xf32>
    %384 = vector.extract_strided_slice %381 {offsets = [0, 32], sizes = [2, 32], strides = [1, 1]} : vector<2x128xf32> to vector<2x32xf32>
    %385 = vector.extract_strided_slice %382 {offsets = [0, 64], sizes = [2, 32], strides = [1, 1]} : vector<2x128xf32> to vector<2x32xf32>
    %386 = vector.extract_strided_slice %381 {offsets = [0, 96], sizes = [2, 32], strides = [1, 1]} : vector<2x128xf32> to vector<2x32xf32>
    %387 = arith.mulf %384, %343 : vector<2x32xf32>
    %388 = arith.mulf %383, %385 : vector<2x32xf32>
    %389 = arith.addf %387, %388 : vector<2x32xf32>
    %390 = math.tanh %389 : vector<2x32xf32>
    %391 = arith.mulf %386, %390 : vector<2x32xf32>
    %c0_116 = arith.constant 0 : index
    %c0_117 = arith.constant 0 : index
    %392 = vector.load %arg13[%c0_116, %c0_117] : memref<32x128xbf16, #tpu.memory_space<vmem>>, vector<32x128xbf16>
    %393 = arith.truncf %391 : vector<2x32xf32> to vector<2x32xbf16>
    %cst_118 = arith.constant dense<0.000000e+00> : vector<2x128xf32>
    %394 = tpu.matmul %393, %392, %cst_118 {dimension_numbers = #tpu.dot_dimension_numbers<[1], [0], [0], [1], [0, 0, 1, 1], [], []>} : vector<2x32xbf16>, vector<32x128xbf16>, vector<2x128xf32> -> vector<2x128xf32>
    %c0_119 = arith.constant 0 : index
    %c0_120 = arith.constant 0 : index
    %395 = vector.load %arg14[%c0_119, %c0_120] : memref<32x128xbf16, #tpu.memory_space<vmem>>, vector<32x128xbf16>
    %396 = arith.truncf %368 : vector<2x32xf32> to vector<2x32xbf16>
    %cst_121 = arith.constant dense<0.000000e+00> : vector<2x128xf32>
    %397 = tpu.matmul %396, %395, %cst_121 {dimension_numbers = #tpu.dot_dimension_numbers<[1], [0], [0], [1], [0, 0, 1, 1], [], []>} : vector<2x32xbf16>, vector<32x128xbf16>, vector<2x128xf32> -> vector<2x128xf32>
    %398 = arith.addf %394, %397 : vector<2x128xf32>
    %399 = arith.addf %398, %17 : vector<2x128xf32>
    %400 = arith.negf %399 : vector<2x128xf32>
    %401 = math.exp %400 : vector<2x128xf32>
    %cst_122 = arith.constant 1.000000e+00 : f32
    %402 = vector.broadcast %cst_122 : f32 to vector<2x128xf32>
    %403 = arith.addf %402, %401 : vector<2x128xf32>
    %404 = arith.divf %402, %403 : vector<2x128xf32>
    %405 = math.tanh %399 : vector<2x128xf32>
    %406 = vector.extract_strided_slice %404 {offsets = [0, 0], sizes = [2, 32], strides = [1, 1]} : vector<2x128xf32> to vector<2x32xf32>
    %407 = vector.extract_strided_slice %404 {offsets = [0, 32], sizes = [2, 32], strides = [1, 1]} : vector<2x128xf32> to vector<2x32xf32>
    %408 = vector.extract_strided_slice %405 {offsets = [0, 64], sizes = [2, 32], strides = [1, 1]} : vector<2x128xf32> to vector<2x32xf32>
    %409 = vector.extract_strided_slice %404 {offsets = [0, 96], sizes = [2, 32], strides = [1, 1]} : vector<2x128xf32> to vector<2x32xf32>
    %410 = arith.mulf %407, %366 : vector<2x32xf32>
    %411 = arith.mulf %406, %408 : vector<2x32xf32>
    %412 = arith.addf %410, %411 : vector<2x32xf32>
    %413 = math.tanh %412 : vector<2x32xf32>
    %414 = arith.mulf %409, %413 : vector<2x32xf32>
    %cst_123 = arith.constant 0.000000e+00 : f32
    %415 = vector.broadcast %cst_123 : f32 to vector<2x32xf32>
    %416 = arith.maximumf %414, %415 : vector<2x32xf32>
    %c0_124 = arith.constant 0 : index
    %c0_125 = arith.constant 0 : index
    %417 = vector.load %arg11[%c0_124, %c0_125] : memref<32x128xbf16, #tpu.memory_space<vmem>>, vector<32x128xbf16>
    %418 = arith.truncf %416 : vector<2x32xf32> to vector<2x32xbf16>
    %cst_126 = arith.constant dense<0.000000e+00> : vector<2x128xf32>
    %419 = tpu.matmul %418, %417, %cst_126 {dimension_numbers = #tpu.dot_dimension_numbers<[1], [0], [0], [1], [0, 0, 1, 1], [], []>} : vector<2x32xbf16>, vector<32x128xbf16>, vector<2x128xf32> -> vector<2x128xf32>
    %c0_127 = arith.constant 0 : index
    %c0_128 = arith.constant 0 : index
    %420 = vector.load %arg9[%c0_127, %c0_128] : memref<32x128xbf16, #tpu.memory_space<vmem>>, vector<32x128xbf16>
    %421 = arith.truncf %391 : vector<2x32xf32> to vector<2x32xbf16>
    %cst_129 = arith.constant dense<0.000000e+00> : vector<2x128xf32>
    %422 = tpu.matmul %421, %420, %cst_129 {dimension_numbers = #tpu.dot_dimension_numbers<[1], [0], [0], [1], [0, 0, 1, 1], [], []>} : vector<2x32xbf16>, vector<32x128xbf16>, vector<2x128xf32> -> vector<2x128xf32>
    %423 = arith.addf %419, %422 : vector<2x128xf32>
    %424 = arith.addf %423, %14 : vector<2x128xf32>
    %425 = arith.negf %424 : vector<2x128xf32>
    %426 = math.exp %425 : vector<2x128xf32>
    %cst_130 = arith.constant 1.000000e+00 : f32
    %427 = vector.broadcast %cst_130 : f32 to vector<2x128xf32>
    %428 = arith.addf %427, %426 : vector<2x128xf32>
    %429 = arith.divf %427, %428 : vector<2x128xf32>
    %430 = math.tanh %424 : vector<2x128xf32>
    %431 = vector.extract_strided_slice %429 {offsets = [0, 0], sizes = [2, 32], strides = [1, 1]} : vector<2x128xf32> to vector<2x32xf32>
    %432 = vector.extract_strided_slice %429 {offsets = [0, 32], sizes = [2, 32], strides = [1, 1]} : vector<2x128xf32> to vector<2x32xf32>
    %433 = vector.extract_strided_slice %430 {offsets = [0, 64], sizes = [2, 32], strides = [1, 1]} : vector<2x128xf32> to vector<2x32xf32>
    %434 = vector.extract_strided_slice %429 {offsets = [0, 96], sizes = [2, 32], strides = [1, 1]} : vector<2x128xf32> to vector<2x32xf32>
    %435 = arith.mulf %432, %389 : vector<2x32xf32>
    %436 = arith.mulf %431, %433 : vector<2x32xf32>
    %437 = arith.addf %435, %436 : vector<2x32xf32>
    %438 = math.tanh %437 : vector<2x32xf32>
    %439 = arith.mulf %434, %438 : vector<2x32xf32>
    %c0_131 = arith.constant 0 : index
    %c0_132 = arith.constant 0 : index
    %440 = vector.load %arg13[%c0_131, %c0_132] : memref<32x128xbf16, #tpu.memory_space<vmem>>, vector<32x128xbf16>
    %441 = arith.truncf %439 : vector<2x32xf32> to vector<2x32xbf16>
    %cst_133 = arith.constant dense<0.000000e+00> : vector<2x128xf32>
    %442 = tpu.matmul %441, %440, %cst_133 {dimension_numbers = #tpu.dot_dimension_numbers<[1], [0], [0], [1], [0, 0, 1, 1], [], []>} : vector<2x32xbf16>, vector<32x128xbf16>, vector<2x128xf32> -> vector<2x128xf32>
    %c0_134 = arith.constant 0 : index
    %c0_135 = arith.constant 0 : index
    %443 = vector.load %arg14[%c0_134, %c0_135] : memref<32x128xbf16, #tpu.memory_space<vmem>>, vector<32x128xbf16>
    %444 = arith.truncf %414 : vector<2x32xf32> to vector<2x32xbf16>
    %cst_136 = arith.constant dense<0.000000e+00> : vector<2x128xf32>
    %445 = tpu.matmul %444, %443, %cst_136 {dimension_numbers = #tpu.dot_dimension_numbers<[1], [0], [0], [1], [0, 0, 1, 1], [], []>} : vector<2x32xbf16>, vector<32x128xbf16>, vector<2x128xf32> -> vector<2x128xf32>
    %446 = arith.addf %442, %445 : vector<2x128xf32>
    %447 = arith.addf %446, %17 : vector<2x128xf32>
    %448 = arith.negf %447 : vector<2x128xf32>
    %449 = math.exp %448 : vector<2x128xf32>
    %cst_137 = arith.constant 1.000000e+00 : f32
    %450 = vector.broadcast %cst_137 : f32 to vector<2x128xf32>
    %451 = arith.addf %450, %449 : vector<2x128xf32>
    %452 = arith.divf %450, %451 : vector<2x128xf32>
    %453 = math.tanh %447 : vector<2x128xf32>
    %454 = vector.extract_strided_slice %452 {offsets = [0, 0], sizes = [2, 32], strides = [1, 1]} : vector<2x128xf32> to vector<2x32xf32>
    %455 = vector.extract_strided_slice %452 {offsets = [0, 32], sizes = [2, 32], strides = [1, 1]} : vector<2x128xf32> to vector<2x32xf32>
    %456 = vector.extract_strided_slice %453 {offsets = [0, 64], sizes = [2, 32], strides = [1, 1]} : vector<2x128xf32> to vector<2x32xf32>
    %457 = vector.extract_strided_slice %452 {offsets = [0, 96], sizes = [2, 32], strides = [1, 1]} : vector<2x128xf32> to vector<2x32xf32>
    %458 = arith.mulf %455, %412 : vector<2x32xf32>
    %459 = arith.mulf %454, %456 : vector<2x32xf32>
    %460 = arith.addf %458, %459 : vector<2x32xf32>
    %461 = math.tanh %460 : vector<2x32xf32>
    %462 = arith.mulf %457, %461 : vector<2x32xf32>
    %cst_138 = arith.constant 0.000000e+00 : f32
    %463 = vector.broadcast %cst_138 : f32 to vector<2x32xf32>
    %464 = arith.maximumf %462, %463 : vector<2x32xf32>
    %c0_139 = arith.constant 0 : index
    %c0_140 = arith.constant 0 : index
    %465 = vector.load %arg11[%c0_139, %c0_140] : memref<32x128xbf16, #tpu.memory_space<vmem>>, vector<32x128xbf16>
    %466 = arith.truncf %464 : vector<2x32xf32> to vector<2x32xbf16>
    %cst_141 = arith.constant dense<0.000000e+00> : vector<2x128xf32>
    %467 = tpu.matmul %466, %465, %cst_141 {dimension_numbers = #tpu.dot_dimension_numbers<[1], [0], [0], [1], [0, 0, 1, 1], [], []>} : vector<2x32xbf16>, vector<32x128xbf16>, vector<2x128xf32> -> vector<2x128xf32>
    %c0_142 = arith.constant 0 : index
    %c0_143 = arith.constant 0 : index
    %468 = vector.load %arg9[%c0_142, %c0_143] : memref<32x128xbf16, #tpu.memory_space<vmem>>, vector<32x128xbf16>
    %469 = arith.truncf %439 : vector<2x32xf32> to vector<2x32xbf16>
    %cst_144 = arith.constant dense<0.000000e+00> : vector<2x128xf32>
    %470 = tpu.matmul %469, %468, %cst_144 {dimension_numbers = #tpu.dot_dimension_numbers<[1], [0], [0], [1], [0, 0, 1, 1], [], []>} : vector<2x32xbf16>, vector<32x128xbf16>, vector<2x128xf32> -> vector<2x128xf32>
    %471 = arith.addf %467, %470 : vector<2x128xf32>
    %472 = arith.addf %471, %14 : vector<2x128xf32>
    %473 = arith.negf %472 : vector<2x128xf32>
    %474 = math.exp %473 : vector<2x128xf32>
    %cst_145 = arith.constant 1.000000e+00 : f32
    %475 = vector.broadcast %cst_145 : f32 to vector<2x128xf32>
    %476 = arith.addf %475, %474 : vector<2x128xf32>
    %477 = arith.divf %475, %476 : vector<2x128xf32>
    %478 = math.tanh %472 : vector<2x128xf32>
    %479 = vector.extract_strided_slice %477 {offsets = [0, 0], sizes = [2, 32], strides = [1, 1]} : vector<2x128xf32> to vector<2x32xf32>
    %480 = vector.extract_strided_slice %477 {offsets = [0, 32], sizes = [2, 32], strides = [1, 1]} : vector<2x128xf32> to vector<2x32xf32>
    %481 = vector.extract_strided_slice %478 {offsets = [0, 64], sizes = [2, 32], strides = [1, 1]} : vector<2x128xf32> to vector<2x32xf32>
    %482 = vector.extract_strided_slice %477 {offsets = [0, 96], sizes = [2, 32], strides = [1, 1]} : vector<2x128xf32> to vector<2x32xf32>
    %483 = arith.mulf %480, %437 : vector<2x32xf32>
    %484 = arith.mulf %479, %481 : vector<2x32xf32>
    %485 = arith.addf %483, %484 : vector<2x32xf32>
    %486 = math.tanh %485 : vector<2x32xf32>
    %487 = arith.mulf %482, %486 : vector<2x32xf32>
    %c0_146 = arith.constant 0 : index
    %c0_147 = arith.constant 0 : index
    %488 = vector.load %arg13[%c0_146, %c0_147] : memref<32x128xbf16, #tpu.memory_space<vmem>>, vector<32x128xbf16>
    %489 = arith.truncf %487 : vector<2x32xf32> to vector<2x32xbf16>
    %cst_148 = arith.constant dense<0.000000e+00> : vector<2x128xf32>
    %490 = tpu.matmul %489, %488, %cst_148 {dimension_numbers = #tpu.dot_dimension_numbers<[1], [0], [0], [1], [0, 0, 1, 1], [], []>} : vector<2x32xbf16>, vector<32x128xbf16>, vector<2x128xf32> -> vector<2x128xf32>
    %c0_149 = arith.constant 0 : index
    %c0_150 = arith.constant 0 : index
    %491 = vector.load %arg14[%c0_149, %c0_150] : memref<32x128xbf16, #tpu.memory_space<vmem>>, vector<32x128xbf16>
    %492 = arith.truncf %462 : vector<2x32xf32> to vector<2x32xbf16>
    %cst_151 = arith.constant dense<0.000000e+00> : vector<2x128xf32>
    %493 = tpu.matmul %492, %491, %cst_151 {dimension_numbers = #tpu.dot_dimension_numbers<[1], [0], [0], [1], [0, 0, 1, 1], [], []>} : vector<2x32xbf16>, vector<32x128xbf16>, vector<2x128xf32> -> vector<2x128xf32>
    %494 = arith.addf %490, %493 : vector<2x128xf32>
    %495 = arith.addf %494, %17 : vector<2x128xf32>
    %496 = arith.negf %495 : vector<2x128xf32>
    %497 = math.exp %496 : vector<2x128xf32>
    %cst_152 = arith.constant 1.000000e+00 : f32
    %498 = vector.broadcast %cst_152 : f32 to vector<2x128xf32>
    %499 = arith.addf %498, %497 : vector<2x128xf32>
    %500 = arith.divf %498, %499 : vector<2x128xf32>
    %501 = math.tanh %495 : vector<2x128xf32>
    %502 = vector.extract_strided_slice %500 {offsets = [0, 0], sizes = [2, 32], strides = [1, 1]} : vector<2x128xf32> to vector<2x32xf32>
    %503 = vector.extract_strided_slice %500 {offsets = [0, 32], sizes = [2, 32], strides = [1, 1]} : vector<2x128xf32> to vector<2x32xf32>
    %504 = vector.extract_strided_slice %501 {offsets = [0, 64], sizes = [2, 32], strides = [1, 1]} : vector<2x128xf32> to vector<2x32xf32>
    %505 = vector.extract_strided_slice %500 {offsets = [0, 96], sizes = [2, 32], strides = [1, 1]} : vector<2x128xf32> to vector<2x32xf32>
    %506 = arith.mulf %503, %460 : vector<2x32xf32>
    %507 = arith.mulf %502, %504 : vector<2x32xf32>
    %508 = arith.addf %506, %507 : vector<2x32xf32>
    %509 = math.tanh %508 : vector<2x32xf32>
    %510 = arith.mulf %505, %509 : vector<2x32xf32>
    %cst_153 = arith.constant 0.000000e+00 : f32
    %511 = vector.broadcast %cst_153 : f32 to vector<2x32xf32>
    %512 = arith.maximumf %510, %511 : vector<2x32xf32>
    %c0_154 = arith.constant 0 : index
    %c0_155 = arith.constant 0 : index
    %513 = vector.load %arg11[%c0_154, %c0_155] : memref<32x128xbf16, #tpu.memory_space<vmem>>, vector<32x128xbf16>
    %514 = arith.truncf %512 : vector<2x32xf32> to vector<2x32xbf16>
    %cst_156 = arith.constant dense<0.000000e+00> : vector<2x128xf32>
    %515 = tpu.matmul %514, %513, %cst_156 {dimension_numbers = #tpu.dot_dimension_numbers<[1], [0], [0], [1], [0, 0, 1, 1], [], []>} : vector<2x32xbf16>, vector<32x128xbf16>, vector<2x128xf32> -> vector<2x128xf32>
    %c0_157 = arith.constant 0 : index
    %c0_158 = arith.constant 0 : index
    %516 = vector.load %arg9[%c0_157, %c0_158] : memref<32x128xbf16, #tpu.memory_space<vmem>>, vector<32x128xbf16>
    %517 = arith.truncf %487 : vector<2x32xf32> to vector<2x32xbf16>
    %cst_159 = arith.constant dense<0.000000e+00> : vector<2x128xf32>
    %518 = tpu.matmul %517, %516, %cst_159 {dimension_numbers = #tpu.dot_dimension_numbers<[1], [0], [0], [1], [0, 0, 1, 1], [], []>} : vector<2x32xbf16>, vector<32x128xbf16>, vector<2x128xf32> -> vector<2x128xf32>
    %519 = arith.addf %515, %518 : vector<2x128xf32>
    %520 = arith.addf %519, %14 : vector<2x128xf32>
    %521 = arith.negf %520 : vector<2x128xf32>
    %522 = math.exp %521 : vector<2x128xf32>
    %cst_160 = arith.constant 1.000000e+00 : f32
    %523 = vector.broadcast %cst_160 : f32 to vector<2x128xf32>
    %524 = arith.addf %523, %522 : vector<2x128xf32>
    %525 = arith.divf %523, %524 : vector<2x128xf32>
    %526 = math.tanh %520 : vector<2x128xf32>
    %527 = vector.extract_strided_slice %525 {offsets = [0, 0], sizes = [2, 32], strides = [1, 1]} : vector<2x128xf32> to vector<2x32xf32>
    %528 = vector.extract_strided_slice %525 {offsets = [0, 32], sizes = [2, 32], strides = [1, 1]} : vector<2x128xf32> to vector<2x32xf32>
    %529 = vector.extract_strided_slice %526 {offsets = [0, 64], sizes = [2, 32], strides = [1, 1]} : vector<2x128xf32> to vector<2x32xf32>
    %530 = vector.extract_strided_slice %525 {offsets = [0, 96], sizes = [2, 32], strides = [1, 1]} : vector<2x128xf32> to vector<2x32xf32>
    %531 = arith.mulf %528, %485 : vector<2x32xf32>
    %532 = arith.mulf %527, %529 : vector<2x32xf32>
    %533 = arith.addf %531, %532 : vector<2x32xf32>
    %534 = math.tanh %533 : vector<2x32xf32>
    %535 = arith.mulf %530, %534 : vector<2x32xf32>
    %c0_161 = arith.constant 0 : index
    %c0_162 = arith.constant 0 : index
    %536 = vector.load %arg13[%c0_161, %c0_162] : memref<32x128xbf16, #tpu.memory_space<vmem>>, vector<32x128xbf16>
    %537 = arith.truncf %535 : vector<2x32xf32> to vector<2x32xbf16>
    %cst_163 = arith.constant dense<0.000000e+00> : vector<2x128xf32>
    %538 = tpu.matmul %537, %536, %cst_163 {dimension_numbers = #tpu.dot_dimension_numbers<[1], [0], [0], [1], [0, 0, 1, 1], [], []>} : vector<2x32xbf16>, vector<32x128xbf16>, vector<2x128xf32> -> vector<2x128xf32>
    %c0_164 = arith.constant 0 : index
    %c0_165 = arith.constant 0 : index
    %539 = vector.load %arg14[%c0_164, %c0_165] : memref<32x128xbf16, #tpu.memory_space<vmem>>, vector<32x128xbf16>
    %540 = arith.truncf %510 : vector<2x32xf32> to vector<2x32xbf16>
    %cst_166 = arith.constant dense<0.000000e+00> : vector<2x128xf32>
    %541 = tpu.matmul %540, %539, %cst_166 {dimension_numbers = #tpu.dot_dimension_numbers<[1], [0], [0], [1], [0, 0, 1, 1], [], []>} : vector<2x32xbf16>, vector<32x128xbf16>, vector<2x128xf32> -> vector<2x128xf32>
    %542 = arith.addf %538, %541 : vector<2x128xf32>
    %543 = arith.addf %542, %17 : vector<2x128xf32>
    %544 = arith.negf %543 : vector<2x128xf32>
    %545 = math.exp %544 : vector<2x128xf32>
    %cst_167 = arith.constant 1.000000e+00 : f32
    %546 = vector.broadcast %cst_167 : f32 to vector<2x128xf32>
    %547 = arith.addf %546, %545 : vector<2x128xf32>
    %548 = arith.divf %546, %547 : vector<2x128xf32>
    %549 = math.tanh %543 : vector<2x128xf32>
    %550 = vector.extract_strided_slice %548 {offsets = [0, 0], sizes = [2, 32], strides = [1, 1]} : vector<2x128xf32> to vector<2x32xf32>
    %551 = vector.extract_strided_slice %548 {offsets = [0, 32], sizes = [2, 32], strides = [1, 1]} : vector<2x128xf32> to vector<2x32xf32>
    %552 = vector.extract_strided_slice %549 {offsets = [0, 64], sizes = [2, 32], strides = [1, 1]} : vector<2x128xf32> to vector<2x32xf32>
    %553 = vector.extract_strided_slice %548 {offsets = [0, 96], sizes = [2, 32], strides = [1, 1]} : vector<2x128xf32> to vector<2x32xf32>
    %554 = arith.mulf %551, %508 : vector<2x32xf32>
    %555 = arith.mulf %550, %552 : vector<2x32xf32>
    %556 = arith.addf %554, %555 : vector<2x32xf32>
    %557 = math.tanh %556 : vector<2x32xf32>
    %558 = arith.mulf %553, %557 : vector<2x32xf32>
    %cst_168 = arith.constant 0.000000e+00 : f32
    %559 = vector.broadcast %cst_168 : f32 to vector<2x32xf32>
    %560 = arith.maximumf %558, %559 : vector<2x32xf32>
    %561 = tpu.concatenate %416, %464, %512, %560 in 0 : vector<2x32xf32>, vector<2x32xf32>, vector<2x32xf32>, vector<2x32xf32> -> vector<8x32xf32>
    %c0_169 = arith.constant 0 : index
    %c0_170 = arith.constant 0 : index
    %562 = vector.load %arg16[%c0_169, %c0_170] : memref<32x4xbf16, #tpu.memory_space<vmem>>, vector<32x4xbf16>
    %563 = arith.truncf %561 : vector<8x32xf32> to vector<8x32xbf16>
    %cst_171 = arith.constant dense<0.000000e+00> : vector<8x4xf32>
    %564 = tpu.matmul %563, %562, %cst_171 {dimension_numbers = #tpu.dot_dimension_numbers<[1], [0], [0], [1], [0, 0, 1, 1], [], []>} : vector<8x32xbf16>, vector<32x4xbf16>, vector<8x4xf32> -> vector<8x4xf32>
    %565 = arith.addf %564, %20 : vector<8x4xf32>
    %c0_172 = arith.constant 0 : index
    %c0_173 = arith.constant 0 : index
    %566 = vector.load %arg18[%c0_172, %c0_173] : memref<8x4xf32, #tpu.memory_space<vmem>>, vector<8x4xf32>
    tpu.vector_store %arg18[%c0_172, %c0_173], %565 {strides = array<i32>} : memref<8x4xf32, #tpu.memory_space<vmem>>, vector<8x4xf32>,
    return
  }
}

</mosaic_0001>

<bundles_post_ra>
// kernel: tpu_custom_call.1
= control target key start
LH: loop header
LB: loop body
LE: loop exit
PB: predicated region body
PF: predicated region fallthrough
CT: control target
= control target key end

     0   :  { %s4696_s0 = inlined_call_operand.vmem [shape: bf16[16,4], index: 0, kind: input, shape index: {}]   ;;  %s4697_s1 = inlined_call_operand.vmem [shape: bf16[2,4], index: 1, kind: input, shape index: {}]   ;;  %s4698_s2 = inlined_call_operand.hbm [shape: bf16[4,128], index: 2, kind: input, shape index: {}]   ;;  %s4699_s3 = inlined_call_operand.vmem [shape: bf16[32,128], index: 3, kind: input, shape index: {}]   ;;  %s4700_s4 = inlined_call_operand.hbm [shape: f32[1,128], index: 4, kind: input, shape index: {}]   ;;  %s4701_s5 = inlined_call_operand.vmem [shape: bf16[32,128], index: 5, kind: input, shape index: {}]   ;;  %s4702_s6 = inlined_call_operand.vmem [shape: bf16[32,128], index: 6, kind: input, shape index: {}]   ;;  %s4703_s7 = inlined_call_operand.hbm [shape: f32[1,128], index: 7, kind: input, shape index: {}]   ;;  %s4704_s8 = inlined_call_operand.hbm [shape: bf16[4,128], index: 8, kind: input, shape index: {}]   ;;  %s4705_s9 = inlined_call_operand.hbm [shape: bf16[32,128], index: 9, kind: input, shape index: {}]   ;;  %s4706_s10 = inlined_call_operand.hbm [shape: f32[1,128], index: 10, kind: input, shape index: {}]   ;;  %s4707_s11 = inlined_call_operand.vmem [shape: bf16[32,128], index: 11, kind: input, shape index: {}]   ;;  %s4708_s12 = inlined_call_operand.hbm [shape: f32[1,128], index: 12, kind: input, shape index: {}]   ;;  %s4709_s13 = inlined_call_operand.hbm [shape: bf16[32,128], index: 13, kind: input, shape index: {}]   ;;  %s4710_s14 = inlined_call_operand.vmem [shape: bf16[32,128], index: 14, kind: input, shape index: {}]   ;;  %s4711_s15 = inlined_call_operand.vmem [shape: f32[1,128], index: 15, kind: input, shape index: {}]   ;;  %s4712_s16 = inlined_call_operand.vmem [shape: bf16[32,4], index: 16, kind: input, shape index: {}]   ;;  %s4713_s17 = inlined_call_operand.vmem [shape: f32[1,4], index: 17, kind: input, shape index: {}]   ;;  %s4714_s18 = inlined_call_operand.vmem [shape: f32[8,4], index: 18, kind: output, shape index: {}]  }
   0x1   :  { %4716 = sst [smem:[#allocation20_spill]] %s4696_s0 }
   0x2   :  { %4717 = sst [smem:[#allocation21_spill]] %s4697_s1 }
   0x3   :  { %4718 = sst [smem:[#allocation22_spill]] %s4698_s2 }
   0x4   :  { %23 = vsyncpa [#allocation3], 0 }
   0x5   :  { %24 = vsyncpa [#allocation5], 0 }
   0x6   :  { %25 = vsyncpa [#allocation8], 0 }
   0x7   :  { %26 = vsyncpa [#allocation11], 0 }
   0x8   :  { %27 = vsyncpa [#allocation14], 0  ;;  %s3860_s27 = smov [#allocation4]   ;;  %s3861_s29 = smov [#allocation7]  }
   0x9   :  { %s50_s28 = sshll.u32 %s3860_s27, 4  ;;  %s74_s30 = sshll.u32 %s3861_s29, 4  ;;  %s51_s28 = int_to_ptr.vmem [resolvable:$true] %s50_s28  ;;  %s75_s30 = int_to_ptr.vmem [resolvable:$true] %s74_s30 }
   0xa   :  { %s3674_s1 = scalar_lea.hbm %s4700_s4, 16 }
   0xb   :  { %p3675_p0 = scmp.ne.s32.totalorder %s4700_s4, %s3674_s1  ;;  %p3678_p1 = scmp.lt.u32.totalorder %s3674_s1, %s4700_s4 }
   0xd   :  { %p3680_p2 = pnand %p3678_p1, %p3675_p0 }
   0xf   :  { %3683 = shalt.err (!%p3680_p2)
}
  0x10   :  { %s3684_s23 = scalar_lea.vmem %s51_s28, 16  ;;  %s3688_s24 = scalar_lea.vmem %s51_s28, 32 }
  0x11   :  { %p3685_p3 = scmp.ne.s32.totalorder %s51_s28, %s3684_s23  ;;  %p3689_p4 = scmp.lt.s32.totalorder %s51_s28, %s51_s28 }
  0x12   :  { %p3690_p5 = scmp.lt.s32.totalorder %s3688_s24, %s3684_s23 }
  0x14   :  { %p3691_p6 = por %p3690_p5, %p3689_p4 }
  0x16   :  { %p3692_p7 = pnand %p3691_p6, %p3685_p3 }
  0x18   :  { %3695 = shalt.err (!%p3692_p7)
}
  0x19   :  { %53 = dma.hbm_to_vmem [thread:$0]  %s4700_s4, 16, %s51_s28, [#allocation5]  }
  0x1a   :  { %s3696_s0 = scalar_lea.hbm %s4704_s8, 32 }
  0x1b   :  { %p3697_p8 = scmp.ne.s32.totalorder %s4704_s8, %s3696_s0  ;;  %p3700_p9 = scmp.lt.u32.totalorder %s3696_s0, %s4704_s8 }
  0x1d   :  { %p3702_p10 = pnand %p3700_p9, %p3697_p8 }
  0x1f   :  { %3705 = shalt.err (!%p3702_p10)
}
  0x20   :  { %s3706_s22 = scalar_lea.vmem %s75_s30, 32  ;;  %p3711_p12 = scmp.lt.s32.totalorder %s75_s30, %s75_s30 }
  0x21   :  { %p3707_p11 = scmp.ne.s32.totalorder %s75_s30, %s3706_s22  ;;  %p3712_p13 = scmp.lt.s32.totalorder %s3706_s22, %s3706_s22 }
  0x23   :  { %p3713_p0 = por %p3712_p13, %p3711_p12 }
  0x25   :  { %p3714_p1 = pnand %p3713_p0, %p3707_p11 }
  0x27   :  { %3717 = shalt.err (!%p3714_p1)
}
  0x28   :  { %77 = dma.hbm_to_vmem [thread:$0]  %s4704_s8, 32, %s75_s30, [#allocation8]  }
  0x29   :  { %s3862_s2 = smov [#allocation10]   ;;  %s3863_s24 = smov [#allocation2]  }
  0x2a   :  { %s96_s23 = sshll.u32 %s3862_s2, 4  ;;  %s38_s25 = sshll.u32 %s3863_s24, 4  ;;  %s97_s23 = int_to_ptr.vmem [resolvable:$true] %s96_s23  ;;  %s39_s25 = int_to_ptr.vmem [resolvable:$true] %s38_s25 }
  0x2b   :  { %s3718_s29 = scalar_lea.hbm %s4706_s10, 16 }
  0x2c   :  { %p3719_p2 = scmp.ne.s32.totalorder %s4706_s10, %s3718_s29  ;;  %p3722_p3 = scmp.lt.u32.totalorder %s3718_s29, %s4706_s10 }
  0x2e   :  { %p3724_p4 = pnand %p3722_p3, %p3719_p2 }
  0x30   :  { %3727 = shalt.err (!%p3724_p4)
}
  0x31   :  { %s3728_s8 = scalar_lea.vmem %s97_s23, 16  ;;  %s3732_s30 = scalar_lea.vmem %s97_s23, 32 }
  0x32   :  { %p3729_p5 = scmp.ne.s32.totalorder %s97_s23, %s3728_s8  ;;  %p3733_p6 = scmp.lt.s32.totalorder %s97_s23, %s97_s23 }
  0x33   :  { %p3734_p7 = scmp.lt.s32.totalorder %s3732_s30, %s3728_s8 }
  0x35   :  { %p3735_p8 = por %p3734_p7, %p3733_p6 }
  0x37   :  { %p3736_p9 = pnand %p3735_p8, %p3729_p5 }
  0x39   :  { %3739 = shalt.err (!%p3736_p9)
}
  0x3a   :  { %99 = dma.hbm_to_vmem [thread:$0]  %s4706_s10, 16, %s97_s23, [#allocation11]  }
  0x3b   :  { %s4719_s2 = sld [smem:[#allocation22_spill]] }
  0x41   :  { %s3740_s24 = scalar_lea.hbm %s4719_s2, 32 }
  0x42   :  { %p3741_p10 = scmp.ne.s32.totalorder %s4719_s2, %s3740_s24  ;;  %p3744_p11 = scmp.lt.u32.totalorder %s3740_s24, %s4719_s2 }
  0x44   :  { %p3746_p12 = pnand %p3744_p11, %p3741_p10 }
  0x46   :  { %3749 = shalt.err (!%p3746_p12)
}
  0x47   :  { %s3750_s19 = scalar_lea.vmem %s39_s25, 32  ;;  %p3755_p0 = scmp.lt.s32.totalorder %s39_s25, %s39_s25 }
  0x48   :  { %p3751_p13 = scmp.ne.s32.totalorder %s39_s25, %s3750_s19  ;;  %p3756_p1 = scmp.lt.s32.totalorder %s3750_s19, %s3750_s19 }
  0x4a   :  { %p3757_p2 = por %p3756_p1, %p3755_p0 }
  0x4c   :  { %p3758_p3 = pnand %p3757_p2, %p3751_p13 }
  0x4e   :  { %3761 = shalt.err (!%p3758_p3)
}
  0x4f   :  { %41 = dma.hbm_to_vmem [thread:$0]  %s4719_s2, 32, %s39_s25, [#allocation3]  }
  0x50   :  { %s3864_s1 = smov [#allocation6]   ;;  %s3865_s8 = smov [#allocation9]  }
  0x51   :  { %s64_s20 = sshll.u32 %s3864_s1, 4  ;;  %s83_s30 = sshll.u32 %s3865_s8, 4  ;;  %s65_s20 = int_to_ptr.vmem [resolvable:$true] %s64_s20  ;;  %s4017_s30 = int_to_ptr.vmem [resolvable:$true] %s83_s30 }
  0x52   :  { %s3762_s4 = scalar_lea.hbm %s4703_s7, 16 }
  0x53   :  { %p3763_p4 = scmp.ne.s32.totalorder %s4703_s7, %s3762_s4  ;;  %p3766_p5 = scmp.lt.u32.totalorder %s3762_s4, %s4703_s7 }
  0x55   :  { %p3768_p6 = pnand %p3766_p5, %p3763_p4 }
  0x57   :  { %3771 = shalt.err (!%p3768_p6)
}
  0x58   :  { %s3772_s25 = scalar_lea.vmem %s65_s20, 16  ;;  %s3776_s2 = scalar_lea.vmem %s65_s20, 32 }
  0x59   :  { %p3773_p7 = scmp.ne.s32.totalorder %s65_s20, %s3772_s25  ;;  %p3777_p8 = scmp.lt.s32.totalorder %s65_s20, %s65_s20 }
  0x5a   :  { %p3778_p9 = scmp.lt.s32.totalorder %s3776_s2, %s3772_s25 }
  0x5c   :  { %p3779_p10 = por %p3778_p9, %p3777_p8 }
  0x5e   :  { %p3780_p11 = pnand %p3779_p10, %p3773_p7 }
  0x60   :  { %3783 = shalt.err (!%p3780_p11)
}
  0x61   :  { %67 = dma.hbm_to_vmem [thread:$0]  %s4703_s7, 16, %s65_s20, [#allocation5]  }
  0x62   :  { %s3784_s23 = scalar_lea.hbm %s4705_s9, 256 }
  0x63   :  { %p3785_p12 = scmp.ne.s32.totalorder %s4705_s9, %s3784_s23  ;;  %p3788_p13 = scmp.lt.u32.totalorder %s3784_s23, %s4705_s9 }
  0x65   :  { %p3790_p0 = pnand %p3788_p13, %p3785_p12 }
  0x67   :  { %3793 = shalt.err (!%p3790_p0)
}
  0x68   :  { %s3794_s4 = scalar_lea.vmem %s4017_s30, 256  ;;  %p3799_p2 = scmp.lt.s32.totalorder %s4017_s30, %s4017_s30 }
  0x69   :  { %p3795_p1 = scmp.ne.s32.totalorder %s4017_s30, %s3794_s4  ;;  %p3800_p3 = scmp.lt.s32.totalorder %s3794_s4, %s3794_s4 }
  0x6b   :  { %p3801_p4 = por %p3800_p3, %p3799_p2 }
  0x6d   :  { %p3802_p5 = pnand %p3801_p4, %p3795_p1 }
  0x6f   :  { %3805 = shalt.err (!%p3802_p5)
}
  0x70   :  { %s3866_s7 = smov 64   ;;  %s3867_s20 = smov 4  }
  0x71   :  { %89 = dma.hbm_to_vmem [thread:$0]  %s4705_s9, 256, %s4017_s30, [#allocation8], %s3866_s7, %s3866_s7, %s3867_s20  }
  0x72   :  { %s3868_s26 = smov [#allocation12]   ;;  %s3869_s25 = smov [#allocation13]  }
  0x73   :  { %s108_s27 = sshll.u32 %s3868_s26, 4  ;;  %s117_s2 = sshll.u32 %s3869_s25, 4  ;;  %s109_s27 = int_to_ptr.vmem [resolvable:$true] %s108_s27  ;;  %s4051_s2 = int_to_ptr.vmem [resolvable:$true] %s117_s2 }
  0x74   :  { %s3806_s19 = scalar_lea.hbm %s4708_s12, 16 }
  0x75   :  { %p3807_p6 = scmp.ne.s32.totalorder %s4708_s12, %s3806_s19  ;;  %p3810_p7 = scmp.lt.u32.totalorder %s3806_s19, %s4708_s12 }
  0x77   :  { %p3812_p8 = pnand %p3810_p7, %p3807_p6 }
  0x79   :  { %3815 = shalt.err (!%p3812_p8)
}
  0x7a   :  { %s3816_s9 = scalar_lea.vmem %s109_s27, 16  ;;  %s3820_s30 = scalar_lea.vmem %s109_s27, 32 }
  0x7b   :  { %p3817_p9 = scmp.ne.s32.totalorder %s109_s27, %s3816_s9  ;;  %p3821_p10 = scmp.lt.s32.totalorder %s109_s27, %s109_s27 }
  0x7c   :  { %p3822_p11 = scmp.lt.s32.totalorder %s3820_s30, %s3816_s9 }
  0x7e   :  { %p3823_p12 = por %p3822_p11, %p3821_p10 }
  0x80   :  { %p3824_p13 = pnand %p3823_p12, %p3817_p9 }
  0x82   :  { %3827 = shalt.err (!%p3824_p13)
}
  0x83   :  { %111 = dma.hbm_to_vmem [thread:$0]  %s4708_s12, 16, %s109_s27, [#allocation11]  }
  0x84   :  { %s3828_s24 = scalar_lea.hbm %s4709_s13, 256 }
  0x85   :  { %p3829_p0 = scmp.ne.s32.totalorder %s4709_s13, %s3828_s24  ;;  %p3832_p1 = scmp.lt.u32.totalorder %s3828_s24, %s4709_s13 }
  0x87   :  { %p3834_p2 = pnand %p3832_p1, %p3829_p0 }
  0x89   :  { %3837 = shalt.err (!%p3834_p2)
}
  0x8a   :  { %s3838_s19 = scalar_lea.vmem %s4051_s2, 256  ;;  %p3843_p4 = scmp.lt.s32.totalorder %s4051_s2, %s4051_s2 }
  0x8b   :  { %p3839_p3 = scmp.ne.s32.totalorder %s4051_s2, %s3838_s19  ;;  %p3844_p5 = scmp.lt.s32.totalorder %s3838_s19, %s3838_s19 }
  0x8d   :  { %p3845_p6 = por %p3844_p5, %p3843_p4 }
  0x8f   :  { %p3846_p7 = pnand %p3845_p6, %p3839_p3 }
  0x91   :  { %3849 = shalt.err (!%p3846_p7)
}
  0x92   :  { %123 = dma.hbm_to_vmem [thread:$0]  %s4709_s13, 256, %s4051_s2, [#allocation14], %s3866_s7, %s3866_s7, %s3867_s20  }
  0x93   :  { %3850 = dma.done.wait [#allocation3], 32  }
  0x94   :  { %3851 = vsyncadd [#allocation3], 4294967264 }
  0x95   :  { %3852 = dma.done.wait [#allocation5], 32  }
  0x96   :  { %3853 = vsyncadd [#allocation5], 4294967264 }
  0x97   :  { %3854 = dma.done.wait [#allocation8], 288  }
  0x98   :  { %3855 = vsyncadd [#allocation8], 4294967008 }
  0x99   :  { %3856 = dma.done.wait [#allocation11], 32  }
  0x9a   :  { %3857 = vsyncadd [#allocation11], 4294967264 }
  0x9b   :  { %3858 = dma.done.wait [#allocation14], 256  }
  0x9c   :  { %3859 = vsyncadd [#allocation14], 4294967040  ;;  %v3870_v0 = vmov 0.0   ;;  %vm3871_vm0 = vmmov 0   ;;  %vm176_vm1 = vcmask 1041408   ;;  %v4095_v3 = vld [vmem:[%s4699_s3] sm:$0xff]  }
  0x9d   :  { %3112 = vmatprep.subr.bf16.mxu0 %v3870_v0  ;;  %3118 = vmatprep.subr.bf16.mxu1 %v3870_v0  ;;  %v159_v1 = vld [vmem:[#allocation2] sm:$0x3]  ;;  %s4720_s23 = sld [smem:[#allocation20_spill]]  ;;  %vm172_vm2 = vcmask 31744   ;;  %v4104_v5 = vld [vmem:[%s4699_s3 + $0x8] sm:$0xff]   ;;  %v3872_v6 = vmov 0  }
  0x9e   :  { %3114 = vmatprep.mubr.msk.bf16.mxu0 %vm3871_vm0, %v3870_v0  ;;  %3122 = vmatprep.mubr.msk.bf16.mxu1 %vm3871_vm0, %v3870_v0  ;;  %v178_v2 = vsel %vm176_vm1, %v159_v1, 0  ;;  %v2901_v7 = vld [vmem:[#allocation4] ss:$0 sm:$0xff]  ;;  %s3873_s9 = smov 32   ;;  %v4128_v29 = vld [vmem:[%s4702_s6] sm:$0xff]   ;;  %v4139_v31 = vld [vmem:[%s4702_s6 + $0x8] sm:$0xff]  }
  0x9f   :  { %3113 = vmatpush3.bf16.msra.mxu0 %v178_v2  ;;  %3119 = vmatpush3.bf16.msra.mxu1 %v4095_v3  ;;  %v4133_v30 = vld [vmem:[%s4701_s5] sm:$0xff]   ;;  %v4145_v32 = vld [vmem:[%s4701_s5 + $0x8] sm:$0xff]   ;;  %vm272_vm3 = vcmask 261120   ;;  %v4175_v42 = vld [vmem:[#allocation6] ss:$0 sm:$0xff]  ;;  %s4721_s8 = sld [smem:[#allocation21_spill]] }
  0xa0   :  { %3126 = vmatprep.subr.bf16.mxu0 %v3870_v0  ;;  %3120 = vmatprep.subr.bf16.mxu1 %v3870_v0  ;;  %vm2824_vm4 = vcmask 1043456   ;;  %vm2826_vm5 = vcmask 1045504  }
  0xa3   :  { %v3459_v4 = vld [vmem:[%s4720_s23] sm:$0xff]   ;;  %3121 = vmatpush3.bf16.msra.mxu1 %v4104_v5 }
  0xa4   :  { %3115 = vmatmul.mubr.msk.bf16.vlgmr.msra.gmra.mrb[0].mxu0 %vm172_vm2, %v3459_v4  ;;  %3134 = vmatprep.subr.bf16.mxu1 %v3870_v0 }
  0xa5   :  { %3130 = vmatprep.mubr.msk.bf16.mxu0 %vm3871_vm0, %v3870_v0  ;;  %3127 = vmatpush3.bf16.msra.mxu0 %v4128_v29 }
  0xa6   :  { %3123 = vmatmul.mubr.bf16.vlgmr.msra.gmra.mrb[0].mxu1 %v3872_v6  ;;  %3128 = vmatprep.subr.bf16.mxu0 %v3870_v0 }
  0xa7   :  { %3138 = vmatprep.mubr.msk.bf16.mxu1 %vm3871_vm0, %v3870_v0  ;;  %3135 = vmatpush3.bf16.msra.mxu1 %v4133_v30 }
  0xa8   :  { %3136 = vmatprep.subr.bf16.mxu1 %v3870_v0 }
  0xa9   :  { %3129 = vmatpush3.bf16.msra.mxu0 %v4139_v31 }
  0xaa   :  { %3142 = vmatprep.subr.bf16.mxu0 %v3870_v0 }
  0xab   :  { %3137 = vmatpush3.bf16.msra.mxu1 %v4145_v32 }
  0xac   :  { %3150 = vmatprep.subr.bf16.mxu1 %v3870_v0  ;;  %3131 = vmatmul.mubr.bf16.vlgmr.msra.gmra.mrb[4].mxu0 %v3872_v6 }
  0xad   :  { %3143 = vmatpush3.bf16.msra.mxu0 %v4095_v3  ;;  %3146 = vmatprep.mubr.msk.bf16.mxu0 %vm3871_vm0, %v3870_v0 }
  0xae   :  { %3144 = vmatprep.subr.bf16.mxu0 %v3870_v0 }
  0xb1   :  { %3145 = vmatpush3.bf16.msra.mxu0 %v4104_v5 }
  0xb2   :  { %3158 = vmatprep.subr.bf16.mxu0 %v3870_v0 }
 0x177   :  { %v214_v8 = vpop.f32.mrb[0].mxu0 }
 0x178   :  { %v3116_v9 = vpop.f32.mrb[1].mxu0  ;;  %v4115_v10 = vadd.f32 %v2901_v7, %v214_v8 }
 0x179   :  { %v217_v11 = vpop.f32.mrb[2].mxu0  ;;  %v310_v14 = vpop.f32.mrb[0].mxu1 }
 0x17a   :  { %v4117_v12 = vadd.f32 %v2901_v7, %v217_v11  ;;  %v3117_v13 = vpop.f32.mrb[3].mxu0  ;;  %v316_v15 = vadd.f32 %v310_v14, %v4115_v10  ;;  %v3124_v16 = vpop.f32.mrb[1].mxu1 }
 0x17b   :  { %v313_v17 = vpop.f32.mrb[2].mxu1 }
 0x17c   :  { %v3125_v18 = vpop.f32.mrb[3].mxu1  ;;  %3475 = vtanh.f32 %v316_v15  ;;  %v2911_v20 = vmul.f32 -1.442695, %v316_v15 }
 0x17e   :  { %3477 = vpow2.f32 %v2911_v20 }
 0x17f   :  { %v396_v37 = vpop.f32.mrb[4].mxu0 }
 0x180   :  { %v3132_v38 = vpop.f32.mrb[5].mxu0 }
 0x181   :  { %v399_v39 = vpop.f32.mrb[6].mxu0 }
 0x182   :  { %v3133_v40 = vpop.f32.mrb[7].mxu0 }
 0x186   :  { %v3476_v19 = vpop.eup %3475 }
 0x187   :  { %326 = vrot.lane.b32.xlu0 %v3476_v19, %s3866_s7 }
 0x188   :  { %v3478_v21 = vpop.eup %3477 }
 0x189   :  { %v320_v22 = vadd.f32 1.0, %v3478_v21 }
 0x18b   :  { %3479 = vrcp.f32 %v320_v22 }
 0x195   :  { %v3480_v23 = vpop.eup %3479 }
 0x196   :  { %v324_v26 = vmul.f32 0.0, %v3480_v23 }
 0x1f9   :  { %v327_v24 = vpop.permute.xlu0 %326 }
 0x1fa   :  { %v329_v25 = vmul.f32 %v3480_v23, %v327_v24 }
 0x1fc   :  { %331 = vrot.lane.b32.xlu0 %v329_v25, %s3873_s9 }
 0x26e   :  { %v332_v27 = vpop.permute.xlu0 %331 }
 0x26f   :  { %v4122_v28 = vadd.f32 %v332_v27, %v324_v26 }
 0x271   :  { %3481 = vtanh.f32 %v4122_v28  ;;  %v537_v8 = vrot.slane %v4122_v28, 6 }
 0x27b   :  { %v3482_v33 = vpop.eup %3481 }
 0x27c   :  { %337 = vrot.lane.b32.xlu1 %v3482_v33, %s3866_s7 }
 0x2ee   :  { %v338_v34 = vpop.permute.xlu1 %337 }
 0x2ef   :  { %v340_v35 = vmul.f32 %v3480_v23, %v338_v34 }
 0x2f1   :  { %v345_v36 = vpack.c.bf16 %v340_v35, %v340_v35 }
 0x2f3   :  { %403 = vrot.lane.b32.xlu1 %v345_v36, %s3873_s9 }
 0x365   :  { %v404_v41 = vpop.permute.xlu1 %403 }
 0x366   :  { %3139 = vmatmul.mubr.msk.bf16.vlgmr.msra.gmra.mrb[4].mxu1 %vm272_vm3, %v404_v41  ;;  %3147 = vmatmul.mubr.msk.bf16.vlgmr.msra.gmra.mrb[8].mxu0 %vm272_vm3, %v404_v41 }
 0x367   :  { %3151 = vmatpush3.bf16.msra.mxu1 %v4128_v29  ;;  %3159 = vmatpush3.bf16.msra.mxu0 %v4133_v30 }
 0x368   :  { %3152 = vmatprep.subr.bf16.mxu1 %v3870_v0  ;;  %3160 = vmatprep.subr.bf16.mxu0 %v3870_v0 }
 0x369   :  { %3154 = vmatprep.mubr.msk.bf16.mxu1 %vm3871_vm0, %v3870_v0  ;;  %3162 = vmatprep.mubr.msk.bf16.mxu0 %vm3871_vm0, %v3870_v0 }
 0x36b   :  { %3153 = vmatpush3.bf16.msra.mxu1 %v4139_v31  ;;  %3161 = vmatpush3.bf16.msra.mxu0 %v4145_v32 }
 0x36c   :  { %3166 = vmatprep.subr.bf16.mxu1 %v3870_v0  ;;  %3174 = vmatprep.subr.bf16.mxu0 %v3870_v0 }
 0x439   :  { %v454_v43 = vpop.f32.mrb[4].mxu1  ;;  %v519_v44 = vpop.f32.mrb[8].mxu0 }
 0x43a   :  { %v455_v45 = vadd.f32 %v454_v43, %v396_v37  ;;  %v526_v46 = vrot.slane %v519_v44, 6  ;;  %v3140_v47 = vpop.f32.mrb[5].mxu1  ;;  %v3148_v48 = vpop.f32.mrb[9].mxu0 }
 0x43b   :  { %v457_v49 = vpop.f32.mrb[6].mxu1  ;;  %v522_v50 = vpop.f32.mrb[10].mxu0 }
 0x43c   :  { %v460_v51 = vadd.f32 %v4175_v42, %v455_v45  ;;  %v528_v52 = vadd.f32 %v526_v46, %v4115_v10  ;;  %v3141_v53 = vpop.f32.mrb[7].mxu1  ;;  %v3149_v54 = vpop.f32.mrb[11].mxu0 }
 0x43e   :  { %3483 = vtanh.f32 %v460_v51  ;;  %v2917_v57 = vmul.f32 -1.442695, %v460_v51  ;;  %v2919_v58 = vmul.f32 -1.442695, %v528_v52 }
 0x43f   :  { %3485 = vtanh.f32 %v528_v52 }
 0x440   :  { %3487 = vpow2.f32 %v2917_v57 }
 0x441   :  { %3489 = vpow2.f32 %v2919_v58 }
 0x448   :  { %v3484_v55 = vpop.eup %3483 }
 0x449   :  { %v3486_v56 = vpop.eup %3485  ;;  %470 = vrot.lane.b32.xlu0 %v3484_v55, %s3866_s7 }
 0x44a   :  { %541 = vrot.lane.b32.xlu1 %v3486_v56, %s3866_s7  ;;  %v3488_v59 = vpop.eup %3487 }
 0x44b   :  { %v3490_v60 = vpop.eup %3489  ;;  %v464_v61 = vadd.f32 1.0, %v3488_v59 }
 0x44c   :  { %v532_v62 = vadd.f32 1.0, %v3490_v60 }
 0x44d   :  { %3491 = vrcp.f32 %v464_v61 }
 0x44e   :  { %3493 = vrcp.f32 %v532_v62 }
 0x457   :  { %v3492_v63 = vpop.eup %3491 }
 0x458   :  { %v3494_v2 = vpop.eup %3493  ;;  %v468_v9 = vmul.f32 0.0, %v3492_v63 }
 0x459   :  { %v539_v13 = vmul.f32 %v3494_v2, %v537_v8 }
 0x4bb   :  { %v471_v1 = vpop.permute.xlu0 %470 }
 0x4bc   :  { %v473_v4 = vmul.f32 %v3492_v63, %v471_v1  ;;  %v542_v6 = vpop.permute.xlu1 %541 }
 0x4bd   :  { %v544_v7 = vmul.f32 %v3494_v2, %v542_v6 }
 0x4be   :  { %475 = vrot.lane.b32.xlu0 %v473_v4, %s3873_s9 }
 0x4bf   :  { %546 = vrot.lane.b32.xlu1 %v544_v7, %s3873_s9 }
 0x530   :  { %v476_v11 = vpop.permute.xlu0 %475 }
 0x531   :  { %v4184_v14 = vadd.f32 %v476_v11, %v468_v9  ;;  %v547_v15 = vpop.permute.xlu1 %546 }
 0x532   :  { %v4186_v16 = vadd.f32 %v547_v15, %v539_v13 }
 0x533   :  { %3495 = vtanh.f32 %v4184_v14 }
 0x534   :  { %3497 = vtanh.f32 %v4186_v16  ;;  %v728_v4 = vrot.slane %v4186_v16, 6 }
 0x53d   :  { %v3496_v17 = vpop.eup %3495 }
 0x53e   :  { %v3498_v18 = vpop.eup %3497  ;;  %481 = vrot.lane.b32.xlu0 %v3496_v17, %s3866_s7 }
 0x53f   :  { %552 = vrot.lane.b32.xlu1 %v3498_v18, %s3866_s7 }
 0x5b0   :  { %v482_v19 = vpop.permute.xlu0 %481 }
 0x5b1   :  { %v484_v20 = vmul.f32 %v3492_v63, %v482_v19  ;;  %v553_v21 = vpop.permute.xlu1 %552 }
 0x5b2   :  { %v555_v22 = vmul.f32 %v3494_v2, %v553_v21 }
 0x5b3   :  { %v557_v23 = vpack.c.bf16 %v484_v20, %v484_v20 }
 0x5b4   :  { %v556_v24 = vpack.c.bf16 %v555_v22, %v555_v22 }
 0x5b5   :  { %559 = vrot.lane.b32.xlu0 %v557_v23, %s3873_s9 }
 0x5b6   :  { %v605_v25 = vrot.slane %v556_v24, 1 }
 0x5b8   :  { %606 = vrot.lane.b32.xlu1 %v605_v25, %s3873_s9 }
 0x627   :  { %v560_v26 = vpop.permute.xlu0 %559 }
 0x628   :  { %3155 = vmatmul.mubr.msk.bf16.vlgmr.msra.gmra.mrb[8].mxu1 %vm272_vm3, %v560_v26 }
 0x629   :  { %3167 = vmatpush3.bf16.msra.mxu1 %v4095_v3  ;;  %3170 = vmatprep.mubr.msk.bf16.mxu1 %vm3871_vm0, %v3870_v0 }
 0x62a   :  { %v607_v27 = vpop.permute.xlu1 %606  ;;  %3168 = vmatprep.subr.bf16.mxu1 %v3870_v0 }
 0x62b   :  { %3163 = vmatmul.mubr.msk.bf16.vlgmr.msra.gmra.mrb[12].mxu0 %vm272_vm3, %v607_v27 }
 0x62c   :  { %3175 = vmatpush3.bf16.msra.mxu0 %v4128_v29  ;;  %3178 = vmatprep.mubr.msk.bf16.mxu0 %vm3871_vm0, %v3870_v0 }
 0x62d   :  { %3169 = vmatpush3.bf16.msra.mxu1 %v4104_v5  ;;  %3176 = vmatprep.subr.bf16.mxu0 %v3870_v0 }
 0x62e   :  { %3182 = vmatprep.subr.bf16.mxu1 %v3870_v0 }
 0x630   :  { %3171 = vmatmul.mubr.msk.bf16.vlgmr.msra.gmra.mrb[12].mxu1 %vm272_vm3, %v607_v27  ;;  %3177 = vmatpush3.bf16.msra.mxu0 %v4139_v31 }
 0x631   :  { %3190 = vmatprep.subr.bf16.mxu0 %v3870_v0  ;;  %3183 = vmatpush3.bf16.msra.mxu1 %v4133_v30 }
 0x632   :  { %3184 = vmatprep.subr.bf16.mxu1 %v3870_v0  ;;  %3186 = vmatprep.mubr.msk.bf16.mxu1 %vm3871_vm0, %v3870_v0 }
 0x635   :  { %3185 = vmatpush3.bf16.msra.mxu1 %v4145_v32 }
 0x636   :  { %3198 = vmatprep.subr.bf16.mxu1 %v3870_v0 }
 0x6fb   :  { %v598_v28 = vpop.f32.mrb[8].mxu1 }
 0x6fc   :  { %v3156_v33 = vpop.f32.mrb[9].mxu1 }
 0x6fd   :  { %v601_v34 = vpop.f32.mrb[10].mxu1 }
 0x6fe   :  { %v645_v35 = vpop.f32.mrb[12].mxu0  ;;  %v3157_v36 = vpop.f32.mrb[11].mxu1 }
 0x6ff   :  { %v646_v37 = vadd.f32 %v645_v35, %v598_v28  ;;  %v3164_v38 = vpop.f32.mrb[13].mxu0 }
 0x700   :  { %v648_v39 = vpop.f32.mrb[14].mxu0 }
 0x701   :  { %v651_v40 = vadd.f32 %v4175_v42, %v646_v37  ;;  %v3165_v41 = vpop.f32.mrb[15].mxu0 }
 0x703   :  { %3499 = vtanh.f32 %v651_v40  ;;  %v710_v43 = vpop.f32.mrb[12].mxu1  ;;  %v2922_v51 = vmul.f32 -1.442695, %v651_v40 }
 0x704   :  { %v717_v44 = vrot.slane %v710_v43, 4  ;;  %v3172_v45 = vpop.f32.mrb[13].mxu1 }
 0x705   :  { %v713_v46 = vpop.f32.mrb[14].mxu1 }
 0x706   :  { %v719_v47 = vadd.f32 %v717_v44, %v4115_v10  ;;  %v3173_v48 = vpop.f32.mrb[15].mxu1 }
 0x708   :  { %3501 = vtanh.f32 %v719_v47  ;;  %v2924_v52 = vmul.f32 -1.442695, %v719_v47 }
 0x709   :  { %3503 = vpow2.f32 %v2922_v51 }
 0x70a   :  { %3505 = vpow2.f32 %v2924_v52 }
 0x70d   :  { %v3500_v49 = vpop.eup %3499 }
 0x70e   :  { %661 = vrot.lane.b32.xlu0 %v3500_v49, %s3866_s7 }
 0x712   :  { %v3502_v50 = vpop.eup %3501 }
 0x713   :  { %732 = vrot.lane.b32.xlu1 %v3502_v50, %s3866_s7  ;;  %v3504_v53 = vpop.eup %3503 }
 0x714   :  { %v655_v54 = vadd.f32 1.0, %v3504_v53  ;;  %v3506_v55 = vpop.eup %3505 }
 0x715   :  { %v723_v56 = vadd.f32 1.0, %v3506_v55 }
 0x716   :  { %3507 = vrcp.f32 %v655_v54 }
 0x717   :  { %3509 = vrcp.f32 %v723_v56 }
 0x720   :  { %v3508_v57 = vpop.eup %3507 }
 0x721   :  { %v3510_v60 = vpop.eup %3509  ;;  %v659_v63 = vmul.f32 %v3508_v57, %v4184_v14 }
 0x722   :  { %v730_v6 = vmul.f32 %v3510_v60, %v728_v4 }
 0x780   :  { %v662_v58 = vpop.permute.xlu0 %661 }
 0x781   :  { %v664_v59 = vmul.f32 %v3508_v57, %v662_v58 }
 0x783   :  { %666 = vrot.lane.b32.xlu0 %v664_v59, %s3873_s9 }
 0x785   :  { %v733_v61 = vpop.permute.xlu1 %732 }
 0x786   :  { %v735_v62 = vmul.f32 %v3510_v60, %v733_v61 }
 0x788   :  { %737 = vrot.lane.b32.xlu1 %v735_v62, %s3873_s9 }
 0x7f5   :  { %v667_v1 = vpop.permute.xlu0 %666 }
 0x7f6   :  { %v4222_v2 = vadd.f32 %v667_v1, %v659_v63 }
 0x7f8   :  { %3511 = vtanh.f32 %v4222_v2 }
 0x7fa   :  { %v738_v7 = vpop.permute.xlu1 %737 }
 0x7fb   :  { %v4226_v8 = vadd.f32 %v738_v7, %v730_v6 }
 0x7fd   :  { %3513 = vtanh.f32 %v4226_v8  ;;  %v919_v56 = vrot.slane %v4226_v8, 6 }
 0x802   :  { %v3512_v9 = vpop.eup %3511 }
 0x803   :  { %672 = vrot.lane.b32.xlu0 %v3512_v9, %s3866_s7 }
 0x807   :  { %v3514_v11 = vpop.eup %3513 }
 0x808   :  { %743 = vrot.lane.b32.xlu1 %v3514_v11, %s3866_s7 }
 0x875   :  { %v673_v13 = vpop.permute.xlu0 %672 }
 0x876   :  { %v675_v14 = vmul.f32 %v3508_v57, %v673_v13 }
 0x878   :  { %v748_v15 = vpack.c.bf16 %v675_v14, %v675_v14 }
 0x87a   :  { %750 = vrot.lane.b32.xlu0 %v748_v15, %s3873_s9  ;;  %v744_v16 = vpop.permute.xlu1 %743 }
 0x87b   :  { %v746_v17 = vmul.f32 %v3510_v60, %v744_v16 }
 0x87d   :  { %v747_v18 = vpack.c.bf16 %v746_v17, %v746_v17 }
 0x87f   :  { %v796_v19 = vrot.slane %v747_v18, 2 }
 0x881   :  { %797 = vrot.lane.b32.xlu1 %v796_v19, %s3873_s9 }
 0x8ec   :  { %v751_v20 = vpop.permute.xlu0 %750 }
 0x8ed   :  { %3179 = vmatmul.mubr.msk.bf16.vlgmr.msra.gmra.mrb[16].mxu0 %vm272_vm3, %v751_v20 }
 0x8ee   :  { %3191 = vmatpush3.bf16.msra.mxu0 %v4095_v3  ;;  %3194 = vmatprep.mubr.msk.bf16.mxu0 %vm3871_vm0, %v3870_v0 }
 0x8ef   :  { %3192 = vmatprep.subr.bf16.mxu0 %v3870_v0 }
 0x8f2   :  { %3193 = vmatpush3.bf16.msra.mxu0 %v4104_v5 }
 0x8f3   :  { %v798_v21 = vpop.permute.xlu1 %797  ;;  %3206 = vmatprep.subr.bf16.mxu0 %v3870_v0 }
 0x8f4   :  { %3187 = vmatmul.mubr.msk.bf16.vlgmr.msra.gmra.mrb[16].mxu1 %vm272_vm3, %v798_v21 }
 0x8f5   :  { %3195 = vmatmul.mubr.msk.bf16.vlgmr.msra.gmra.mrb[20].mxu0 %vm272_vm3, %v798_v21  ;;  %3199 = vmatpush3.bf16.msra.mxu1 %v4128_v29 }
 0x8f6   :  { %3207 = vmatpush3.bf16.msra.mxu0 %v4133_v30  ;;  %3200 = vmatprep.subr.bf16.mxu1 %v3870_v0 }
 0x8f7   :  { %3208 = vmatprep.subr.bf16.mxu0 %v3870_v0  ;;  %3202 = vmatprep.mubr.msk.bf16.mxu1 %vm3871_vm0, %v3870_v0 }
 0x8f8   :  { %3210 = vmatprep.mubr.msk.bf16.mxu0 %vm3871_vm0, %v3870_v0 }
 0x8f9   :  { %3201 = vmatpush3.bf16.msra.mxu1 %v4139_v31 }
 0x8fa   :  { %3209 = vmatpush3.bf16.msra.mxu0 %v4145_v32  ;;  %3214 = vmatprep.subr.bf16.mxu1 %v3870_v0 }
 0x8fb   :  { %3222 = vmatprep.subr.bf16.mxu0 %v3870_v0 }
 0x9c0   :  { %v789_v22 = vpop.f32.mrb[16].mxu0 }
 0x9c1   :  { %v3180_v23 = vpop.f32.mrb[17].mxu0 }
 0x9c2   :  { %v792_v24 = vpop.f32.mrb[18].mxu0 }
 0x9c3   :  { %v3181_v25 = vpop.f32.mrb[19].mxu0 }
 0x9c7   :  { %v836_v26 = vpop.f32.mrb[16].mxu1 }
 0x9c8   :  { %v837_v27 = vadd.f32 %v836_v26, %v789_v22  ;;  %v901_v28 = vpop.f32.mrb[20].mxu0  ;;  %v3188_v33 = vpop.f32.mrb[17].mxu1 }
 0x9c9   :  { %v908_v34 = vrot.slane %v901_v28, 2  ;;  %v3196_v35 = vpop.f32.mrb[21].mxu0  ;;  %v839_v36 = vpop.f32.mrb[18].mxu1 }
 0x9ca   :  { %v842_v37 = vadd.f32 %v4175_v42, %v837_v27  ;;  %v904_v38 = vpop.f32.mrb[22].mxu0  ;;  %v3189_v39 = vpop.f32.mrb[19].mxu1 }
 0x9cb   :  { %v910_v40 = vadd.f32 %v908_v34, %v4115_v10  ;;  %v3197_v41 = vpop.f32.mrb[23].mxu0 }
 0x9cc   :  { %3515 = vtanh.f32 %v842_v37  ;;  %v2927_v45 = vmul.f32 -1.442695, %v842_v37 }
 0x9cd   :  { %3517 = vtanh.f32 %v910_v40  ;;  %v2929_v46 = vmul.f32 -1.442695, %v910_v40 }
 0x9ce   :  { %3519 = vpow2.f32 %v2927_v45 }
 0x9cf   :  { %3521 = vpow2.f32 %v2929_v46 }
 0x9d6   :  { %v3516_v43 = vpop.eup %3515 }
 0x9d7   :  { %v3518_v44 = vpop.eup %3517  ;;  %852 = vrot.lane.b32.xlu1 %v3516_v43, %s3866_s7 }
 0x9d8   :  { %923 = vrot.lane.b32.xlu0 %v3518_v44, %s3866_s7  ;;  %v3520_v47 = vpop.eup %3519 }
 0x9d9   :  { %v3522_v48 = vpop.eup %3521  ;;  %v846_v49 = vadd.f32 1.0, %v3520_v47 }
 0x9da   :  { %v914_v50 = vadd.f32 1.0, %v3522_v48 }
 0x9db   :  { %3523 = vrcp.f32 %v846_v49 }
 0x9dc   :  { %3525 = vrcp.f32 %v914_v50 }
 0x9e5   :  { %v3524_v10 = vpop.eup %3523 }
 0x9e6   :  { %v3526_v52 = vpop.eup %3525  ;;  %v850_v57 = vmul.f32 %v3524_v10, %v4222_v2 }
 0x9e7   :  { %v921_v59 = vmul.f32 %v3526_v52, %v919_v56 }
 0xa49   :  { %v853_v51 = vpop.permute.xlu1 %852 }
 0xa4a   :  { %v855_v53 = vmul.f32 %v3524_v10, %v853_v51  ;;  %v924_v54 = vpop.permute.xlu0 %923 }
 0xa4b   :  { %v926_v55 = vmul.f32 %v3526_v52, %v924_v54 }
 0xa4c   :  { %857 = vrot.lane.b32.xlu1 %v855_v53, %s3873_s9 }
 0xa4d   :  { %928 = vrot.lane.b32.xlu0 %v926_v55, %s3873_s9 }
 0xabe   :  { %v858_v58 = vpop.permute.xlu1 %857 }
 0xabf   :  { %v4262_v60 = vadd.f32 %v858_v58, %v850_v57  ;;  %v929_v61 = vpop.permute.xlu0 %928 }
 0xac0   :  { %v4264_v62 = vadd.f32 %v929_v61, %v921_v59 }
 0xac1   :  { %3527 = vtanh.f32 %v4262_v60 }
 0xac2   :  { %3529 = vtanh.f32 %v4264_v62  ;;  %v1107_v50 = vrot.slane %v4264_v62, 6 }
 0xacb   :  { %v3528_v63 = vpop.eup %3527 }
 0xacc   :  { %v3530_v1 = vpop.eup %3529  ;;  %863 = vrot.lane.b32.xlu1 %v3528_v63, %s3866_s7 }
 0xacd   :  { %934 = vrot.lane.b32.xlu0 %v3530_v1, %s3866_s7 }
 0xb3e   :  { %v864_v4 = vpop.permute.xlu1 %863 }
 0xb3f   :  { %v866_v6 = vmul.f32 %v3524_v10, %v864_v4  ;;  %v935_v2 = vpop.permute.xlu0 %934 }
 0xb40   :  { %v937_v7 = vmul.f32 %v3526_v52, %v935_v2 }
 0xb41   :  { %v939_v8 = vpack.c.bf16 %v866_v6, %v866_v6 }
 0xb42   :  { %v938_v9 = vpack.c.bf16 %v937_v7, %v937_v7 }
 0xb43   :  { %941 = vrot.lane.b32.xlu0 %v939_v8, %s3873_s9 }
 0xb44   :  { %v987_v11 = vrot.slane %v938_v9, 3 }
 0xb46   :  { %988 = vrot.lane.b32.xlu1 %v987_v11, %s3873_s9 }
 0xbb5   :  { %v942_v13 = vpop.permute.xlu0 %941 }
 0xbb6   :  { %3203 = vmatmul.mubr.msk.bf16.vlgmr.msra.gmra.mrb[20].mxu1 %vm272_vm3, %v942_v13 }
 0xbb7   :  { %3215 = vmatpush3.bf16.msra.mxu1 %v4095_v3  ;;  %3218 = vmatprep.mubr.msk.bf16.mxu1 %vm3871_vm0, %v3870_v0 }
 0xbb8   :  { %v989_v14 = vpop.permute.xlu1 %988  ;;  %3216 = vmatprep.subr.bf16.mxu1 %v3870_v0 }
 0xbb9   :  { %3211 = vmatmul.mubr.msk.bf16.vlgmr.msra.gmra.mrb[24].mxu0 %vm272_vm3, %v989_v14 }
 0xbba   :  { %3223 = vmatpush3.bf16.msra.mxu0 %v4128_v29  ;;  %3226 = vmatprep.mubr.msk.bf16.mxu0 %vm3871_vm0, %v3870_v0 }
 0xbbb   :  { %3217 = vmatpush3.bf16.msra.mxu1 %v4104_v5  ;;  %3224 = vmatprep.subr.bf16.mxu0 %v3870_v0 }
 0xbbc   :  { %3230 = vmatprep.subr.bf16.mxu1 %v3870_v0 }
 0xbbe   :  { %3219 = vmatmul.mubr.msk.bf16.vlgmr.msra.gmra.mrb[24].mxu1 %vm272_vm3, %v989_v14  ;;  %3225 = vmatpush3.bf16.msra.mxu0 %v4139_v31 }
 0xbbf   :  { %3231 = vmatpush3.bf16.msra.mxu1 %v4133_v30  ;;  %3238 = vmatprep.subr.bf16.mxu0 %v3870_v0 }
 0xbc0   :  { %3232 = vmatprep.subr.bf16.mxu1 %v3870_v0  ;;  %3234 = vmatprep.mubr.msk.bf16.mxu1 %vm3871_vm0, %v3870_v0 }
 0xbc3   :  { %3233 = vmatpush3.bf16.msra.mxu1 %v4145_v32 }
 0xbc4   :  { %3246 = vmatprep.subr.bf16.mxu1 %v3870_v0 }
 0xc89   :  { %v980_v15 = vpop.f32.mrb[20].mxu1 }
 0xc8a   :  { %v3204_v16 = vpop.f32.mrb[21].mxu1 }
 0xc8b   :  { %v983_v17 = vpop.f32.mrb[22].mxu1 }
 0xc8c   :  { %v1027_v18 = vpop.f32.mrb[24].mxu0  ;;  %v3205_v19 = vpop.f32.mrb[23].mxu1 }
 0xc8d   :  { %v1028_v20 = vadd.f32 %v1027_v18, %v980_v15  ;;  %v3212_v21 = vpop.f32.mrb[25].mxu0 }
 0xc8e   :  { %v1030_v22 = vpop.f32.mrb[26].mxu0 }
 0xc8f   :  { %v1033_v23 = vadd.f32 %v4175_v42, %v1028_v20  ;;  %v3213_v24 = vpop.f32.mrb[27].mxu0 }
 0xc91   :  { %3531 = vtanh.f32 %v1033_v23  ;;  %v1092_v25 = vpop.f32.mrb[24].mxu1  ;;  %v2932_v36 = vmul.f32 -1.442695, %v1033_v23 }
 0xc92   :  { %v1098_v26 = vadd.f32 %v1092_v25, %v4117_v12  ;;  %v3220_v27 = vpop.f32.mrb[25].mxu1 }
 0xc93   :  { %v1095_v28 = vpop.f32.mrb[26].mxu1 }
 0xc94   :  { %3533 = vtanh.f32 %v1098_v26  ;;  %v3221_v33 = vpop.f32.mrb[27].mxu1  ;;  %v2934_v37 = vmul.f32 -1.442695, %v1098_v26 }
 0xc95   :  { %3535 = vpow2.f32 %v2932_v36 }
 0xc96   :  { %3537 = vpow2.f32 %v2934_v37 }
 0xc9b   :  { %v3532_v34 = vpop.eup %3531 }
 0xc9c   :  { %1043 = vrot.lane.b32.xlu0 %v3532_v34, %s3866_s7 }
 0xc9e   :  { %v3534_v35 = vpop.eup %3533 }
 0xc9f   :  { %1111 = vrot.lane.b32.xlu1 %v3534_v35, %s3866_s7  ;;  %v3536_v38 = vpop.eup %3535 }
 0xca0   :  { %v3538_v39 = vpop.eup %3537  ;;  %v1037_v40 = vadd.f32 1.0, %v3536_v38 }
 0xca1   :  { %v1102_v41 = vadd.f32 1.0, %v3538_v39 }
 0xca2   :  { %3539 = vrcp.f32 %v1037_v40 }
 0xca3   :  { %3541 = vrcp.f32 %v1102_v41 }
 0xcac   :  { %v3540_v43 = vpop.eup %3539 }
 0xcad   :  { %v3542_v46 = vpop.eup %3541  ;;  %v1041_v49 = vmul.f32 %v3540_v43, %v4262_v60 }
 0xcae   :  { %v1109_v52 = vmul.f32 %v3542_v46, %v1107_v50 }
 0xd0e   :  { %v1044_v44 = vpop.permute.xlu0 %1043 }
 0xd0f   :  { %v1046_v45 = vmul.f32 %v3540_v43, %v1044_v44 }
 0xd11   :  { %1048 = vrot.lane.b32.xlu0 %v1046_v45, %s3873_s9  ;;  %v1112_v47 = vpop.permute.xlu1 %1111 }
 0xd12   :  { %v1114_v48 = vmul.f32 %v3542_v46, %v1112_v47 }
 0xd14   :  { %1116 = vrot.lane.b32.xlu1 %v1114_v48, %s3873_s9 }
 0xd83   :  { %v1049_v10 = vpop.permute.xlu0 %1048 }
 0xd84   :  { %v4301_v51 = vadd.f32 %v1049_v10, %v1041_v49 }
 0xd86   :  { %3543 = vtanh.f32 %v4301_v51  ;;  %v1117_v53 = vpop.permute.xlu1 %1116 }
 0xd87   :  { %v4304_v54 = vadd.f32 %v1117_v53, %v1109_v52 }
 0xd89   :  { %3545 = vtanh.f32 %v4304_v54  ;;  %v1297_v44 = vrot.slane %v4304_v54, 6 }
 0xd90   :  { %v3544_v55 = vpop.eup %3543 }
 0xd91   :  { %1054 = vrot.lane.b32.xlu0 %v3544_v55, %s3866_s7 }
 0xd93   :  { %v3546_v56 = vpop.eup %3545 }
 0xd94   :  { %1122 = vrot.lane.b32.xlu1 %v3546_v56, %s3866_s7 }
 0xe03   :  { %v1055_v57 = vpop.permute.xlu0 %1054 }
 0xe04   :  { %v1057_v58 = vmul.f32 %v3540_v43, %v1055_v57 }
 0xe06   :  { %v1127_v59 = vpack.c.bf16 %v1057_v58, %v1057_v58  ;;  %v1123_v60 = vpop.permute.xlu1 %1122 }
 0xe07   :  { %v1125_v61 = vmul.f32 %v3542_v46, %v1123_v60 }
 0xe08   :  { %1129 = vrot.lane.b32.xlu0 %v1127_v59, %s3873_s9 }
 0xe09   :  { %v1126_v62 = vpack.c.bf16 %v1125_v61, %v1125_v61 }
 0xe0b   :  { %1175 = vrot.lane.b32.xlu1 %v1126_v62, %s3873_s9 }
 0xe7a   :  { %v1130_v63 = vpop.permute.xlu0 %1129 }
 0xe7b   :  { %3227 = vmatmul.mubr.msk.bf16.vlgmr.msra.gmra.mrb[28].mxu0 %vm272_vm3, %v1130_v63 }
 0xe7c   :  { %3239 = vmatpush3.bf16.msra.mxu0 %v4095_v3  ;;  %3242 = vmatprep.mubr.msk.bf16.mxu0 %vm3871_vm0, %v3870_v0 }
 0xe7d   :  { %v1176_v1 = vpop.permute.xlu1 %1175  ;;  %3240 = vmatprep.subr.bf16.mxu0 %v3870_v0 }
 0xe7e   :  { %3235 = vmatmul.mubr.msk.bf16.vlgmr.msra.gmra.mrb[28].mxu1 %vm272_vm3, %v1176_v1 }
 0xe7f   :  { %3247 = vmatpush3.bf16.msra.mxu1 %v4128_v29  ;;  %3250 = vmatprep.mubr.msk.bf16.mxu1 %vm3871_vm0, %v3870_v0 }
 0xe80   :  { %3241 = vmatpush3.bf16.msra.mxu0 %v4104_v5  ;;  %3248 = vmatprep.subr.bf16.mxu1 %v3870_v0 }
 0xe81   :  { %3254 = vmatprep.subr.bf16.mxu0 %v3870_v0 }
 0xe83   :  { %3243 = vmatmul.mubr.msk.bf16.vlgmr.msra.gmra.mrb[32].mxu0 %vm272_vm3, %v1176_v1  ;;  %3249 = vmatpush3.bf16.msra.mxu1 %v4139_v31 }
 0xe84   :  { %3255 = vmatpush3.bf16.msra.mxu0 %v4133_v30  ;;  %3262 = vmatprep.subr.bf16.mxu1 %v3870_v0 }
 0xe85   :  { %3256 = vmatprep.subr.bf16.mxu0 %v3870_v0  ;;  %3258 = vmatprep.mubr.msk.bf16.mxu0 %vm3871_vm0, %v3870_v0 }
 0xe88   :  { %3257 = vmatpush3.bf16.msra.mxu0 %v4145_v32 }
 0xe89   :  { %3270 = vmatprep.subr.bf16.mxu0 %v3870_v0 }
 0xf4e   :  { %v1168_v4 = vpop.f32.mrb[28].mxu0 }
 0xf4f   :  { %v3228_v6 = vpop.f32.mrb[29].mxu0 }
 0xf50   :  { %v1171_v2 = vpop.f32.mrb[30].mxu0 }
 0xf51   :  { %v3229_v7 = vpop.f32.mrb[31].mxu0  ;;  %v1214_v8 = vpop.f32.mrb[28].mxu1 }
 0xf52   :  { %v1215_v9 = vadd.f32 %v1214_v8, %v1168_v4  ;;  %v3236_v11 = vpop.f32.mrb[29].mxu1 }
 0xf53   :  { %v1217_v13 = vpop.f32.mrb[30].mxu1 }
 0xf54   :  { %v1220_v14 = vadd.f32 %v4175_v42, %v1215_v9  ;;  %v3237_v15 = vpop.f32.mrb[31].mxu1 }
 0xf56   :  { %3547 = vtanh.f32 %v1220_v14  ;;  %v1279_v16 = vpop.f32.mrb[32].mxu0  ;;  %v2937_v24 = vmul.f32 -1.442695, %v1220_v14 }
 0xf57   :  { %v1286_v17 = vrot.slane %v1279_v16, 6  ;;  %v3244_v18 = vpop.f32.mrb[33].mxu0 }
 0xf58   :  { %v1282_v19 = vpop.f32.mrb[34].mxu0 }
 0xf59   :  { %v1288_v20 = vadd.f32 %v1286_v17, %v4117_v12  ;;  %v3245_v21 = vpop.f32.mrb[35].mxu0 }
 0xf5b   :  { %3549 = vtanh.f32 %v1288_v20  ;;  %v2939_v25 = vmul.f32 -1.442695, %v1288_v20 }
 0xf5c   :  { %3551 = vpow2.f32 %v2937_v24 }
 0xf5d   :  { %3553 = vpow2.f32 %v2939_v25 }
 0xf60   :  { %v3548_v22 = vpop.eup %3547 }
 0xf61   :  { %1230 = vrot.lane.b32.xlu0 %v3548_v22, %s3866_s7 }
 0xf65   :  { %v3550_v23 = vpop.eup %3549 }
 0xf66   :  { %1301 = vrot.lane.b32.xlu1 %v3550_v23, %s3866_s7  ;;  %v3552_v26 = vpop.eup %3551 }
 0xf67   :  { %v1224_v27 = vadd.f32 1.0, %v3552_v26  ;;  %v3554_v28 = vpop.eup %3553 }
 0xf68   :  { %v1292_v33 = vadd.f32 1.0, %v3554_v28 }
 0xf69   :  { %3555 = vrcp.f32 %v1224_v27 }
 0xf6a   :  { %3557 = vrcp.f32 %v1292_v33 }
 0xf73   :  { %v3556_v34 = vpop.eup %3555 }
 0xf74   :  { %v3558_v37 = vpop.eup %3557  ;;  %v1228_v40 = vmul.f32 %v3556_v34, %v4301_v51 }
 0xf75   :  { %v1299_v45 = vmul.f32 %v3558_v37, %v1297_v44 }
 0xfd3   :  { %v1231_v35 = vpop.permute.xlu0 %1230 }
 0xfd4   :  { %v1233_v36 = vmul.f32 %v3556_v34, %v1231_v35 }
 0xfd6   :  { %1235 = vrot.lane.b32.xlu0 %v1233_v36, %s3873_s9 }
 0xfd8   :  { %v1302_v38 = vpop.permute.xlu1 %1301 }
 0xfd9   :  { %v1304_v39 = vmul.f32 %v3558_v37, %v1302_v38 }
 0xfdb   :  { %1306 = vrot.lane.b32.xlu1 %v1304_v39, %s3873_s9 }
0x1048   :  { %v1236_v41 = vpop.permute.xlu0 %1235 }
0x1049   :  { %v4339_v43 = vadd.f32 %v1236_v41, %v1228_v40 }
0x104b   :  { %3559 = vtanh.f32 %v4339_v43 }
0x104d   :  { %v1307_v46 = vpop.permute.xlu1 %1306 }
0x104e   :  { %v4343_v47 = vadd.f32 %v1307_v46, %v1299_v45  ;;  %v3667_v45 = vld [vmem:[%s4699_s3] sm:$0xff]  }
0x1050   :  { %3561 = vtanh.f32 %v4343_v47  ;;  %v1488_v23 = vrot.slane %v4343_v47, 6  ;;  %v3668_v47 = vld [vmem:[%s4702_s6] sm:$0xff]  }
0x1055   :  { %v3560_v48 = vpop.eup %3559 }
0x1056   :  { %1241 = vrot.lane.b32.xlu0 %v3560_v48, %s3866_s7  ;;  %v3669_v48 = vld [vmem:[%s4699_s3 + $0x8] sm:$0xff]  }
0x105a   :  { %v3562_v49 = vpop.eup %3561 }
0x105b   :  { %1312 = vrot.lane.b32.xlu1 %v3562_v49, %s3866_s7  ;;  %v3670_v49 = vld [vmem:[%s4702_s6 + $0x8] sm:$0xff]  }
0x10c8   :  { %v1242_v50 = vpop.permute.xlu0 %1241 }
0x10c9   :  { %v1244_v10 = vmul.f32 %v3556_v34, %v1242_v50  ;;  %v3671_v50 = vld [vmem:[%s4701_s5] sm:$0xff]  }
0x10cb   :  { %v1317_v51 = vpack.c.bf16 %v1244_v10, %v1244_v10  ;;  %v3672_v10 = vld [vmem:[%s4701_s5 + $0x8] sm:$0xff]  }
0x10cd   :  { %v1313_v52 = vpop.permute.xlu1 %1312  ;;  %1319 = vrot.lane.b32.xlu0 %v1317_v51, %s3873_s9 }
0x10ce   :  { %v1315_v53 = vmul.f32 %v3558_v37, %v1313_v52 }
0x10d0   :  { %v1316_v54 = vpack.c.bf16 %v1315_v53, %v1315_v53 }
0x10d2   :  { %v1365_v55 = vrot.slane %v1316_v54, 1 }
0x10d4   :  { %1366 = vrot.lane.b32.xlu1 %v1365_v55, %s3873_s9 }
0x113f   :  { %v1320_v56 = vpop.permute.xlu0 %1319 }
0x1140   :  { %3251 = vmatmul.mubr.msk.bf16.vlgmr.msra.gmra.mrb[32].mxu1 %vm272_vm3, %v1320_v56 }
0x1141   :  { %3263 = vmatpush3.bf16.msra.mxu1 %v4095_v3  ;;  %3266 = vmatprep.mubr.msk.bf16.mxu1 %vm3871_vm0, %v3870_v0 }
0x1142   :  { %3264 = vmatprep.subr.bf16.mxu1 %v3870_v0 }
0x1145   :  { %3265 = vmatpush3.bf16.msra.mxu1 %v4104_v5 }
0x1146   :  { %v1367_v57 = vpop.permute.xlu1 %1366  ;;  %3278 = vmatprep.subr.bf16.mxu1 %v3870_v0 }
0x1147   :  { %3259 = vmatmul.mubr.msk.bf16.vlgmr.msra.gmra.mrb[36].mxu0 %vm272_vm3, %v1367_v57 }
0x1148   :  { %3267 = vmatmul.mubr.msk.bf16.vlgmr.msra.gmra.mrb[36].mxu1 %vm272_vm3, %v1367_v57  ;;  %3271 = vmatpush3.bf16.msra.mxu0 %v4128_v29 }
0x1149   :  { %3272 = vmatprep.subr.bf16.mxu0 %v3870_v0  ;;  %3279 = vmatpush3.bf16.msra.mxu1 %v4133_v30 }
0x114a   :  { %3274 = vmatprep.mubr.msk.bf16.mxu0 %vm3871_vm0, %v3870_v0  ;;  %3280 = vmatprep.subr.bf16.mxu1 %v3870_v0 }
0x114b   :  { %3282 = vmatprep.mubr.msk.bf16.mxu1 %vm3871_vm0, %v3870_v0 }
0x114c   :  { %3273 = vmatpush3.bf16.msra.mxu0 %v4139_v31 }
0x114d   :  { %3286 = vmatprep.subr.bf16.mxu0 %v3870_v0  ;;  %3281 = vmatpush3.bf16.msra.mxu1 %v4145_v32 }
0x114e   :  { %3294 = vmatprep.subr.bf16.mxu1 %v3870_v0 }
0x1213   :  { %v1358_v3 = vpop.f32.mrb[32].mxu1 }
0x1214   :  { %v3252_v5 = vpop.f32.mrb[33].mxu1 }
0x1215   :  { %v1361_v29 = vpop.f32.mrb[34].mxu1 }
0x1216   :  { %v3253_v30 = vpop.f32.mrb[35].mxu1 }
0x121a   :  { %v1405_v58 = vpop.f32.mrb[36].mxu0 }
0x121b   :  { %v1406_v59 = vadd.f32 %v1405_v58, %v1358_v3  ;;  %v3260_v60 = vpop.f32.mrb[37].mxu0  ;;  %v1470_v61 = vpop.f32.mrb[36].mxu1 }
0x121c   :  { %v1408_v62 = vpop.f32.mrb[38].mxu0  ;;  %v1477_v63 = vrot.slane %v1470_v61, 4  ;;  %v3268_v1 = vpop.f32.mrb[37].mxu1 }
0x121d   :  { %v1411_v4 = vadd.f32 %v4175_v42, %v1406_v59  ;;  %v3261_v31 = vpop.f32.mrb[39].mxu0  ;;  %v1473_v6 = vpop.f32.mrb[38].mxu1 }
0x121e   :  { %v1479_v2 = vadd.f32 %v1477_v63, %v4117_v12  ;;  %v3269_v32 = vpop.f32.mrb[39].mxu1 }
0x121f   :  { %3563 = vtanh.f32 %v1411_v4  ;;  %v2942_v9 = vmul.f32 -1.442695, %v1411_v4 }
0x1220   :  { %3565 = vtanh.f32 %v1479_v2  ;;  %v2944_v11 = vmul.f32 -1.442695, %v1479_v2 }
0x1221   :  { %3567 = vpow2.f32 %v2942_v9 }
0x1222   :  { %3569 = vpow2.f32 %v2944_v11 }
0x1229   :  { %v3564_v7 = vpop.eup %3563 }
0x122a   :  { %v3566_v8 = vpop.eup %3565  ;;  %1421 = vrot.lane.b32.xlu0 %v3564_v7, %s3866_s7 }
0x122b   :  { %1492 = vrot.lane.b32.xlu1 %v3566_v8, %s3866_s7  ;;  %v3568_v13 = vpop.eup %3567 }
0x122c   :  { %v3570_v14 = vpop.eup %3569  ;;  %v1415_v15 = vadd.f32 1.0, %v3568_v13 }
0x122d   :  { %v1483_v16 = vadd.f32 1.0, %v3570_v14 }
0x122e   :  { %3571 = vrcp.f32 %v1415_v15 }
0x122f   :  { %3573 = vrcp.f32 %v1483_v16 }
0x1238   :  { %v3572_v17 = vpop.eup %3571 }
0x1239   :  { %v3574_v19 = vpop.eup %3573  ;;  %v1419_v24 = vmul.f32 %v3572_v17, %v4339_v43 }
0x123a   :  { %v1490_v26 = vmul.f32 %v3574_v19, %v1488_v23 }
0x129c   :  { %v1422_v18 = vpop.permute.xlu0 %1421 }
0x129d   :  { %v1424_v20 = vmul.f32 %v3572_v17, %v1422_v18  ;;  %v1493_v21 = vpop.permute.xlu1 %1492 }
0x129e   :  { %v1495_v22 = vmul.f32 %v3574_v19, %v1493_v21 }
0x129f   :  { %1426 = vrot.lane.b32.xlu0 %v1424_v20, %s3873_s9 }
0x12a0   :  { %1497 = vrot.lane.b32.xlu1 %v1495_v22, %s3873_s9 }
0x1311   :  { %v1427_v25 = vpop.permute.xlu0 %1426 }
0x1312   :  { %v4379_v27 = vadd.f32 %v1427_v25, %v1419_v24  ;;  %v1498_v28 = vpop.permute.xlu1 %1497 }
0x1313   :  { %v4381_v33 = vadd.f32 %v1498_v28, %v1490_v26 }
0x1314   :  { %3575 = vtanh.f32 %v4379_v27 }
0x1315   :  { %3577 = vtanh.f32 %v4381_v33 }
0x131e   :  { %v3576_v34 = vpop.eup %3575 }
0x131f   :  { %v3578_v35 = vpop.eup %3577  ;;  %1432 = vrot.lane.b32.xlu0 %v3576_v34, %s3866_s7  ;;  %v4440_v34 = vld [vmem:[#allocation9] sm:$0xff]  }
0x1320   :  { %1503 = vrot.lane.b32.xlu1 %v3578_v35, %s3866_s7 }
0x1391   :  { %v1433_v36 = vpop.permute.xlu0 %1432 }
0x1392   :  { %v1435_v37 = vmul.f32 %v3572_v17, %v1433_v36  ;;  %v1504_v38 = vpop.permute.xlu1 %1503  ;;  %v1679_v17 = vrot.slane %v4381_v33, 6  ;;  %v4444_v36 = vld [vmem:[#allocation9 + $0x8] sm:$0xff]  }
0x1393   :  { %v1506_v39 = vmul.f32 %v3574_v19, %v1504_v38 }
0x1394   :  { %v1508_v40 = vpack.c.bf16 %v1435_v37, %v1435_v37  ;;  %v1819_v37 = vld [vmem:[#allocation7] sm:$0x3] }
0x1395   :  { %v1507_v41 = vpack.c.bf16 %v1506_v39, %v1506_v39  ;;  %v1880_v38 = vsel %vm176_vm1, %v1819_v37, 0 }
0x1396   :  { %1510 = vrot.lane.b32.xlu0 %v1508_v40, %s3873_s9  ;;  %v1818_v40 = vld [vmem:[%s4721_s8] sm:$0x1] }
0x1397   :  { %v1556_v43 = vrot.slane %v1507_v41, 2 }
0x1399   :  { %1557 = vrot.lane.b32.xlu1 %v1556_v43, %s3873_s9 }
0x1408   :  { %v1511_v44 = vpop.permute.xlu0 %1510 }
0x1409   :  { %3275 = vmatmul.mubr.msk.bf16.vlgmr.msra.gmra.mrb[40].mxu0 %vm272_vm3, %v1511_v44 }
0x140a   :  { %3287 = vmatpush3.bf16.msra.mxu0 %v3667_v45  ;;  %3290 = vmatprep.mubr.msk.bf16.mxu0 %vm3871_vm0, %v3870_v0 }
0x140b   :  { %v1558_v46 = vpop.permute.xlu1 %1557  ;;  %3288 = vmatprep.subr.bf16.mxu0 %v3870_v0 }
0x140c   :  { %3283 = vmatmul.mubr.msk.bf16.vlgmr.msra.gmra.mrb[40].mxu1 %vm272_vm3, %v1558_v46 }
0x140d   :  { %3295 = vmatpush3.bf16.msra.mxu1 %v3668_v47  ;;  %3298 = vmatprep.mubr.msk.bf16.mxu1 %vm3871_vm0, %v3870_v0 }
0x140e   :  { %3289 = vmatpush3.bf16.msra.mxu0 %v3669_v48  ;;  %3296 = vmatprep.subr.bf16.mxu1 %v3870_v0 }
0x140f   :  { %3302 = vmatprep.subr.bf16.mxu0 %v3870_v0 }
0x1411   :  { %3291 = vmatmul.mubr.msk.bf16.vlgmr.msra.gmra.mrb[44].mxu0 %vm272_vm3, %v1558_v46  ;;  %3297 = vmatpush3.bf16.msra.mxu1 %v3670_v49 }
0x1412   :  { %3303 = vmatpush3.bf16.msra.mxu0 %v3671_v50  ;;  %3310 = vmatprep.subr.bf16.mxu1 %v3870_v0 }
0x1413   :  { %3304 = vmatprep.subr.bf16.mxu0 %v3870_v0  ;;  %3306 = vmatprep.mubr.msk.bf16.mxu0 %vm3871_vm0, %v3870_v0 }
0x1416   :  { %3305 = vmatpush3.bf16.msra.mxu0 %v3672_v10 }
0x1417   :  { %3318 = vmatprep.subr.bf16.mxu0 %v3870_v0 }
0x14dc   :  { %v1549_v51 = vpop.f32.mrb[40].mxu0 }
0x14dd   :  { %v3276_v52 = vpop.f32.mrb[41].mxu0 }
0x14de   :  { %v1552_v53 = vpop.f32.mrb[42].mxu0 }
0x14df   :  { %v3277_v54 = vpop.f32.mrb[43].mxu0  ;;  %v1596_v55 = vpop.f32.mrb[40].mxu1 }
0x14e0   :  { %v1597_v56 = vadd.f32 %v1596_v55, %v1549_v51  ;;  %v3284_v57 = vpop.f32.mrb[41].mxu1  ;;  %v3673_v51 = vld [vmem:[#allocation6] ss:$0 sm:$0xff] }
0x14e1   :  { %v1599_v3 = vpop.f32.mrb[42].mxu1 }
0x14e2   :  { %v1602_v5 = vadd.f32 %v4175_v42, %v1597_v56  ;;  %v3285_v29 = vpop.f32.mrb[43].mxu1  ;;  %v2905_v56 = vld [vmem:[#allocation10] ss:$0 sm:$0xff] }
0x14e4   :  { %3579 = vtanh.f32 %v1602_v5  ;;  %v1661_v30 = vpop.f32.mrb[44].mxu0  ;;  %v2947_v4 = vmul.f32 -1.442695, %v1602_v5 }
0x14e5   :  { %v1668_v58 = vrot.slane %v1661_v30, 2  ;;  %v3292_v59 = vpop.f32.mrb[45].mxu0 }
0x14e6   :  { %v1664_v60 = vpop.f32.mrb[46].mxu0 }
0x14e7   :  { %v1670_v61 = vadd.f32 %v1668_v58, %v4117_v12  ;;  %v3293_v62 = vpop.f32.mrb[47].mxu0 }
0x14e9   :  { %3581 = vtanh.f32 %v1670_v61  ;;  %v2949_v31 = vmul.f32 -1.442695, %v1670_v61 }
0x14ea   :  { %3583 = vpow2.f32 %v2947_v4 }
0x14eb   :  { %3585 = vpow2.f32 %v2949_v31 }
0x14ee   :  { %v3580_v63 = vpop.eup %3579 }
0x14ef   :  { %1612 = vrot.lane.b32.xlu1 %v3580_v63, %s3866_s7 }
0x14f3   :  { %v3582_v1 = vpop.eup %3581 }
0x14f4   :  { %1683 = vrot.lane.b32.xlu0 %v3582_v1, %s3866_s7  ;;  %v3584_v42 = vpop.eup %3583 }
0x14f5   :  { %v1606_v6 = vadd.f32 1.0, %v3584_v42  ;;  %v3586_v2 = vpop.eup %3585 }
0x14f6   :  { %v1674_v32 = vadd.f32 1.0, %v3586_v2 }
0x14f7   :  { %3587 = vrcp.f32 %v1606_v6 }
0x14f8   :  { %3589 = vrcp.f32 %v1674_v32 }
0x1501   :  { %v3588_v7 = vpop.eup %3587 }
0x1502   :  { %v3590_v9 = vpop.eup %3589  ;;  %v1610_v14 = vmul.f32 %v3588_v7, %v4379_v27 }
0x1503   :  { %v1681_v18 = vmul.f32 %v3590_v9, %v1679_v17 }
0x1561   :  { %v1613_v12 = vpop.permute.xlu1 %1612 }
0x1562   :  { %v1615_v8 = vmul.f32 %v3588_v7, %v1613_v12 }
0x1564   :  { %1617 = vrot.lane.b32.xlu1 %v1615_v8, %s3873_s9 }
0x1566   :  { %v1684_v11 = vpop.permute.xlu0 %1683 }
0x1567   :  { %v1686_v13 = vmul.f32 %v3590_v9, %v1684_v11 }
0x1569   :  { %1688 = vrot.lane.b32.xlu0 %v1686_v13, %s3873_s9 }
0x15d6   :  { %v1618_v15 = vpop.permute.xlu1 %1617 }
0x15d7   :  { %v4429_v16 = vadd.f32 %v1618_v15, %v1610_v14 }
0x15d9   :  { %3591 = vtanh.f32 %v4429_v16 }
0x15db   :  { %v1689_v19 = vpop.permute.xlu0 %1688 }
0x15dc   :  { %v4433_v20 = vadd.f32 %v1689_v19, %v1681_v18  ;;  %v4480_v19 = vld [vmem:[%s4710_s14] sm:$0xff]  }
0x15de   :  { %3593 = vtanh.f32 %v4433_v20  ;;  %v1931_v13 = vrot.slane %v4433_v20, 6 }
0x15e3   :  { %v3592_v21 = vpop.eup %3591 }
0x15e4   :  { %1623 = vrot.lane.b32.xlu1 %v3592_v21, %s3866_s7  ;;  %v4493_v21 = vld [vmem:[#allocation13] sm:$0xff]  }
0x15e8   :  { %v3594_v22 = vpop.eup %3593 }
0x15e9   :  { %1694 = vrot.lane.b32.xlu0 %v3594_v22, %s3866_s7  ;;  %v4496_v22 = vld [vmem:[#allocation13 + $0x8] sm:$0xff]  }
0x1656   :  { %v1624_v23 = vpop.permute.xlu1 %1623 }
0x1657   :  { %v1626_v24 = vmul.f32 %v3588_v7, %v1624_v23 }
0x1659   :  { %v1699_v25 = vpack.c.bf16 %v1626_v24, %v1626_v24 }
0x165b   :  { %v1695_v26 = vpop.permute.xlu0 %1694  ;;  %1701 = vrot.lane.b32.xlu0 %v1699_v25, %s3873_s9 }
0x165c   :  { %v1697_v27 = vmul.f32 %v3590_v9, %v1695_v26 }
0x165e   :  { %v1698_v28 = vpack.c.bf16 %v1697_v27, %v1697_v27 }
0x1660   :  { %v1747_v33 = vrot.slane %v1698_v28, 3 }
0x1662   :  { %1748 = vrot.lane.b32.xlu1 %v1747_v33, %s3873_s9 }
0x16cd   :  { %v1702_v35 = vpop.permute.xlu0 %1701 }
0x16ce   :  { %3299 = vmatmul.mubr.msk.bf16.vlgmr.msra.gmra.mrb[44].mxu1 %vm272_vm3, %v1702_v35 }
0x16cf   :  { %3311 = vmatpush3.bf16.msra.mxu1 %v4440_v34  ;;  %3314 = vmatprep.mubr.msk.bf16.mxu1 %vm3871_vm0, %v3870_v0 }
0x16d0   :  { %3312 = vmatprep.subr.bf16.mxu1 %v3870_v0 }
0x16d3   :  { %3313 = vmatpush3.bf16.msra.mxu1 %v4444_v36 }
0x16d4   :  { %v1749_v39 = vpop.permute.xlu1 %1748  ;;  %3324 = vmatprep.subr.bf16.mxu1 %v3870_v0 }
0x16d5   :  { %3307 = vmatmul.mubr.msk.bf16.vlgmr.msra.gmra.mrb[48].mxu0 %vm272_vm3, %v1749_v39 }
0x16d6   :  { %3319 = vmatpush3.bf16.msra.mxu0 %v1880_v38  ;;  %3315 = vmatmul.mubr.msk.bf16.vlgmr.msra.gmra.mrb[48].mxu1 %vm272_vm3, %v1749_v39 }
0x16d7   :  { %3320 = vmatprep.mubr.msk.bf16.mxu0 %vm3871_vm0, %v3870_v0  ;;  %3328 = vmatprep.mubr.msk.bf16.mxu1 %vm3871_vm0, %v3870_v0 }
0x16d8   :  { %3332 = vmatprep.subr.bf16.mxu0 %v3870_v0  ;;  %3325 = vmatpush3.bf16.msra.mxu1 %v4480_v19 }
0x16d9   :  { %3326 = vmatprep.subr.bf16.mxu1 %v3870_v0 }
0x16dd   :  { %3321 = vmatmul.mubr.msk.bf16.vlgmr.msra.gmra.mrb[52].mxu0 %vm172_vm2, %v1818_v40 }
0x16de   :  { %3336 = vmatprep.mubr.msk.bf16.mxu0 %vm3871_vm0, %v3870_v0  ;;  %3333 = vmatpush3.bf16.msra.mxu0 %v4493_v21 }
0x16df   :  { %3334 = vmatprep.subr.bf16.mxu0 %v3870_v0 }
0x16e2   :  { %3335 = vmatpush3.bf16.msra.mxu0 %v4496_v22 }
0x16e3   :  { %3348 = vmatprep.subr.bf16.mxu0 %v3870_v0 }
0x17a1   :  { %v1740_v41 = vpop.f32.mrb[44].mxu1 }
0x17a2   :  { %v3300_v43 = vpop.f32.mrb[45].mxu1 }
0x17a3   :  { %v1743_v44 = vpop.f32.mrb[46].mxu1 }
0x17a4   :  { %v3301_v45 = vpop.f32.mrb[47].mxu1 }
0x17a8   :  { %v1787_v46 = vpop.f32.mrb[48].mxu0 }
0x17a9   :  { %v1788_v47 = vadd.f32 %v1787_v46, %v1740_v41  ;;  %v3308_v48 = vpop.f32.mrb[49].mxu0  ;;  %v1870_v49 = vpop.f32.mrb[48].mxu1  ;;  %v4523_v41 = vld [vmem:[%s4711_s15] ss:$0 sm:$0xff] }
0x17aa   :  { %v1790_v50 = vpop.f32.mrb[50].mxu0  ;;  %v3316_v10 = vpop.f32.mrb[49].mxu1 }
0x17ab   :  { %v1793_v52 = vadd.f32 %v3673_v51, %v1788_v47  ;;  %v3309_v53 = vpop.f32.mrb[51].mxu0  ;;  %v1873_v54 = vpop.f32.mrb[50].mxu1 }
0x17ac   :  { %v3317_v55 = vpop.f32.mrb[51].mxu1 }
0x17ad   :  { %3595 = vtanh.f32 %v1793_v52  ;;  %v2952_v61 = vmul.f32 -1.442695, %v1793_v52 }
0x17b0   :  { %v1916_v57 = vpop.f32.mrb[52].mxu0 }
0x17b1   :  { %v1917_v3 = vadd.f32 %v1916_v57, %v1870_v49  ;;  %v3322_v5 = vpop.f32.mrb[53].mxu0 }
0x17b2   :  { %v1919_v29 = vpop.f32.mrb[54].mxu0 }
0x17b3   :  { %v1922_v30 = vadd.f32 %v2905_v56, %v1917_v3  ;;  %v3323_v58 = vpop.f32.mrb[55].mxu0 }
0x17b4   :  { %v4535_v58 = vld [vmem:[%s4707_s11] sm:$0xff]  }
0x17b5   :  { %3597 = vtanh.f32 %v1922_v30  ;;  %v2957_v62 = vmul.f32 -1.442695, %v1922_v30 }
0x17b6   :  { %3599 = vpow2.f32 %v2952_v61 }
0x17b7   :  { %v3596_v59 = vpop.eup %3595  ;;  %3601 = vpow2.f32 %v2957_v62 }
0x17b8   :  { %1803 = vrot.lane.b32.xlu0 %v3596_v59, %s3866_s7  ;;  %v4541_v59 = vld [vmem:[%s4707_s11 + $0x8] sm:$0xff]  }
0x17bf   :  { %v3598_v60 = vpop.eup %3597 }
0x17c0   :  { %1935 = vrot.lane.b32.xlu1 %v3598_v60, %s3866_s7  ;;  %v3600_v63 = vpop.eup %3599 }
0x17c1   :  { %v1797_v1 = vadd.f32 1.0, %v3600_v63  ;;  %v3602_v4 = vpop.eup %3601 }
0x17c2   :  { %v1926_v31 = vadd.f32 1.0, %v3602_v4 }
0x17c3   :  { %3603 = vrcp.f32 %v1797_v1 }
0x17c4   :  { %3605 = vrcp.f32 %v1926_v31  ;;  %v4559_v31 = vld [vmem:[#allocation12] ss:$0 sm:$0xff] }
0x17cd   :  { %v3604_v42 = vpop.eup %3603 }
0x17ce   :  { %v3606_v32 = vpop.eup %3605  ;;  %v1801_v8 = vmul.f32 %v3604_v42, %v4429_v16  ;;  %v4487_v16 = vld [vmem:[%s4710_s14 + $0x8] sm:$0xff]  }
0x17cf   :  { %v1933_v14 = vmul.f32 %v3606_v32, %v1931_v13  ;;  %3327 = vmatpush3.bf16.msra.mxu1 %v4487_v16 }
0x17d0   :  { %3340 = vmatprep.subr.bf16.mxu1 %v3870_v0 }
0x182a   :  { %v1804_v6 = vpop.permute.xlu0 %1803 }
0x182b   :  { %v1806_v2 = vmul.f32 %v3604_v42, %v1804_v6 }
0x182d   :  { %1808 = vrot.lane.b32.xlu0 %v1806_v2, %s3873_s9 }
0x1832   :  { %v1936_v7 = vpop.permute.xlu1 %1935 }
0x1833   :  { %v1938_v12 = vmul.f32 %v3606_v32, %v1936_v7 }
0x1835   :  { %1940 = vrot.lane.b32.xlu1 %v1938_v12, %s3873_s9 }
0x189f   :  { %v1809_v9 = vpop.permute.xlu0 %1808 }
0x18a0   :  { %v4470_v11 = vadd.f32 %v1809_v9, %v1801_v8 }
0x18a2   :  { %3607 = vtanh.f32 %v4470_v11 }
0x18a7   :  { %v1941_v15 = vpop.permute.xlu1 %1940 }
0x18a8   :  { %v4474_v17 = vadd.f32 %v1941_v15, %v1933_v14 }
0x18aa   :  { %3609 = vtanh.f32 %v4474_v17 }
0x18ac   :  { %v3608_v18 = vpop.eup %3607 }
0x18ad   :  { %1814 = vrot.lane.b32.xlu0 %v3608_v18, %s3866_s7 }
0x18b4   :  { %v3610_v20 = vpop.eup %3609 }
0x18b5   :  { %1946 = vrot.lane.b32.xlu1 %v3610_v20, %s3866_s7 }
0x191f   :  { %v1815_v23 = vpop.permute.xlu0 %1814 }
0x1920   :  { %v1817_v24 = vmul.f32 %v3604_v42, %v1815_v23 }
0x1922   :  { %v1959_v25 = vpack.c.bf16 %v1817_v24, %v1817_v24 }
0x1924   :  { %1961 = vrot.lane.b32.xlu0 %v1959_v25, %s3873_s9 }
0x1927   :  { %v1947_v26 = vpop.permute.xlu1 %1946 }
0x1928   :  { %v1949_v27 = vmul.f32 %v3606_v32, %v1947_v26 }
0x192a   :  { %v1954_v28 = vpack.c.bf16 %v1949_v27, %v1949_v27 }
0x192c   :  { %2019 = vrot.lane.b32.xlu1 %v1954_v28, %s3873_s9 }
0x1996   :  { %v1962_v33 = vpop.permute.xlu0 %1961 }
0x1997   :  { %3329 = vmatmul.mubr.msk.bf16.vlgmr.msra.gmra.mrb[52].mxu1 %vm272_vm3, %v1962_v33 }
0x1998   :  { %3341 = vmatpush3.bf16.msra.mxu1 %v4440_v34  ;;  %3344 = vmatprep.mubr.msk.bf16.mxu1 %vm3871_vm0, %v3870_v0 }
0x1999   :  { %3342 = vmatprep.subr.bf16.mxu1 %v3870_v0 }
0x199c   :  { %3343 = vmatpush3.bf16.msra.mxu1 %v4444_v36 }
0x199d   :  { %3356 = vmatprep.subr.bf16.mxu1 %v3870_v0 }
0x199e   :  { %v2020_v35 = vpop.permute.xlu1 %2019 }
0x199f   :  { %3337 = vmatmul.mubr.msk.bf16.vlgmr.msra.gmra.mrb[56].mxu0 %vm272_vm3, %v2020_v35  ;;  %3345 = vmatmul.mubr.msk.bf16.vlgmr.msra.gmra.mrb[56].mxu1 %vm272_vm3, %v2020_v35 }
0x19a0   :  { %3352 = vmatprep.mubr.msk.bf16.mxu0 %vm3871_vm0, %v3870_v0  ;;  %3357 = vmatpush3.bf16.msra.mxu1 %v4480_v19 }
0x19a1   :  { %3358 = vmatprep.subr.bf16.mxu1 %v3870_v0  ;;  %3360 = vmatprep.mubr.msk.bf16.mxu1 %vm3871_vm0, %v3870_v0 }
0x19a2   :  { %3349 = vmatpush3.bf16.msra.mxu0 %v4535_v58 }
0x19a3   :  { %3350 = vmatprep.subr.bf16.mxu0 %v3870_v0 }
0x19a4   :  { %3359 = vmatpush3.bf16.msra.mxu1 %v4487_v16 }
0x19a5   :  { %3372 = vmatprep.subr.bf16.mxu1 %v3870_v0 }
0x19a6   :  { %3351 = vmatpush3.bf16.msra.mxu0 %v4541_v59 }
0x19a7   :  { %3364 = vmatprep.subr.bf16.mxu0 %v3870_v0 }
0x1a6a   :  { %v2012_v37 = vpop.f32.mrb[52].mxu1 }
0x1a6b   :  { %v3330_v38 = vpop.f32.mrb[53].mxu1 }
0x1a6c   :  { %v2015_v39 = vpop.f32.mrb[54].mxu1 }
0x1a6d   :  { %v3331_v40 = vpop.f32.mrb[55].mxu1 }
0x1a72   :  { %v2070_v43 = vpop.f32.mrb[56].mxu0  ;;  %v2141_v44 = vpop.f32.mrb[56].mxu1 }
0x1a73   :  { %v2071_v45 = vadd.f32 %v2070_v43, %v2012_v37  ;;  %v3338_v46 = vpop.f32.mrb[57].mxu0  ;;  %v3346_v47 = vpop.f32.mrb[57].mxu1 }
0x1a74   :  { %v2073_v48 = vpop.f32.mrb[58].mxu0  ;;  %v2144_v49 = vpop.f32.mrb[58].mxu1 }
0x1a75   :  { %v2076_v50 = vadd.f32 %v4523_v41, %v2071_v45  ;;  %v3339_v10 = vpop.f32.mrb[59].mxu0  ;;  %v3347_v51 = vpop.f32.mrb[59].mxu1 }
0x1a77   :  { %3611 = vtanh.f32 %v2076_v50  ;;  %v2964_v53 = vmul.f32 -1.442695, %v2076_v50 }
0x1a79   :  { %3613 = vpow2.f32 %v2964_v53 }
0x1a81   :  { %v3612_v52 = vpop.eup %3611 }
0x1a82   :  { %2086 = vrot.lane.b32.xlu0 %v3612_v52, %s3866_s7 }
0x1a83   :  { %v3614_v54 = vpop.eup %3613 }
0x1a84   :  { %v2080_v55 = vadd.f32 1.0, %v3614_v54 }
0x1a86   :  { %3615 = vrcp.f32 %v2080_v55 }
0x1a90   :  { %v3616_v56 = vpop.eup %3615 }
0x1a91   :  { %v2084_v5 = vmul.f32 %v3616_v56, %v4470_v11 }
0x1af4   :  { %v2087_v57 = vpop.permute.xlu0 %2086 }
0x1af5   :  { %v2089_v3 = vmul.f32 %v3616_v56, %v2087_v57 }
0x1af7   :  { %2091 = vrot.lane.b32.xlu1 %v2089_v3, %s3873_s9 }
0x1b69   :  { %v2092_v29 = vpop.permute.xlu1 %2091 }
0x1b6a   :  { %v4529_v30 = vadd.f32 %v2092_v29, %v2084_v5 }
0x1b6c   :  { %3617 = vtanh.f32 %v4529_v30 }
0x1b76   :  { %v3618_v60 = vpop.eup %3617 }
0x1b77   :  { %2097 = vrot.lane.b32.xlu0 %v3618_v60, %s3866_s7 }
0x1be9   :  { %v2098_v61 = vpop.permute.xlu0 %2097 }
0x1bea   :  { %v2100_v62 = vmul.f32 %v3616_v56, %v2098_v61 }
0x1bec   :  { %v4547_v63 = vmax.f32 %v2100_v62, 0.0  ;;  %v2231_v20 = vpack.c.bf16 %v2100_v62, %v2100_v62 }
0x1bee   :  { %v2106_v1 = vpack.c.bf16 %v4547_v63, %v4547_v63 }
0x1bf0   :  { %2148 = vrot.lane.b32.xlu1 %v2106_v1, %s3873_s9 }
0x1c62   :  { %v2149_v4 = vpop.permute.xlu1 %2148 }
0x1c63   :  { %3353 = vmatmul.mubr.msk.bf16.vlgmr.msra.gmra.mrb[60].mxu0 %vm272_vm3, %v2149_v4 }
0x1c64   :  { %3365 = vmatpush3.bf16.msra.mxu0 %v4493_v21  ;;  %3368 = vmatprep.mubr.msk.bf16.mxu0 %vm3871_vm0, %v3870_v0 }
0x1c65   :  { %3366 = vmatprep.subr.bf16.mxu0 %v3870_v0 }
0x1c68   :  { %3367 = vmatpush3.bf16.msra.mxu0 %v4496_v22 }
0x1c69   :  { %3380 = vmatprep.subr.bf16.mxu0 %v3870_v0 }
0x1d36   :  { %v2199_v42 = vpop.f32.mrb[60].mxu0 }
0x1d37   :  { %v2200_v6 = vadd.f32 %v2199_v42, %v2141_v44  ;;  %v3354_v2 = vpop.f32.mrb[61].mxu0 }
0x1d38   :  { %v2202_v32 = vpop.f32.mrb[62].mxu0 }
0x1d39   :  { %v2205_v7 = vadd.f32 %v4559_v31, %v2200_v6  ;;  %v3355_v12 = vpop.f32.mrb[63].mxu0 }
0x1d3b   :  { %3619 = vtanh.f32 %v2205_v7  ;;  %v2969_v9 = vmul.f32 -1.442695, %v2205_v7 }
0x1d3d   :  { %3621 = vpow2.f32 %v2969_v9 }
0x1d45   :  { %v3620_v8 = vpop.eup %3619 }
0x1d46   :  { %2215 = vrot.lane.b32.xlu0 %v3620_v8, %s3866_s7 }
0x1d47   :  { %v3622_v11 = vpop.eup %3621 }
0x1d48   :  { %v2209_v13 = vadd.f32 1.0, %v3622_v11 }
0x1d4a   :  { %3623 = vrcp.f32 %v2209_v13 }
0x1d54   :  { %v3624_v14 = vpop.eup %3623 }
0x1d55   :  { %v2213_v23 = vmul.f32 %v3624_v14, %v4474_v17 }
0x1db8   :  { %v2216_v15 = vpop.permute.xlu0 %2215 }
0x1db9   :  { %v2218_v18 = vmul.f32 %v3624_v14, %v2216_v15 }
0x1dbb   :  { %2220 = vrot.lane.b32.xlu1 %v2218_v18, %s3873_s9 }
0x1dbf   :  { %2233 = vrot.lane.b32.xlu1 %v2231_v20, %s3873_s9 }
0x1e2d   :  { %v2221_v24 = vpop.permute.xlu1 %2220 }
0x1e2e   :  { %v4566_v25 = vadd.f32 %v2221_v24, %v2213_v23 }
0x1e30   :  { %3625 = vtanh.f32 %v4566_v25 }
0x1e31   :  { %v2234_v26 = vpop.permute.xlu1 %2233 }
0x1e32   :  { %3361 = vmatmul.mubr.msk.bf16.vlgmr.msra.gmra.mrb[60].mxu1 %vm272_vm3, %v2234_v26 }
0x1e33   :  { %3373 = vmatpush3.bf16.msra.mxu1 %v4440_v34  ;;  %3376 = vmatprep.mubr.msk.bf16.mxu1 %vm3871_vm0, %v3870_v0 }
0x1e34   :  { %3374 = vmatprep.subr.bf16.mxu1 %v3870_v0 }
0x1e37   :  { %3375 = vmatpush3.bf16.msra.mxu1 %v4444_v36 }
0x1e38   :  { %3388 = vmatprep.subr.bf16.mxu1 %v3870_v0 }
0x1e3a   :  { %v3626_v17 = vpop.eup %3625 }
0x1e3b   :  { %2226 = vrot.lane.b32.xlu0 %v3626_v17, %s3866_s7 }
0x1ead   :  { %v2227_v27 = vpop.permute.xlu0 %2226 }
0x1eae   :  { %v2229_v28 = vmul.f32 %v3624_v14, %v2227_v27 }
0x1eb0   :  { %v2230_v33 = vpack.c.bf16 %v2229_v28, %v2229_v28 }
0x1eb2   :  { %2279 = vrot.lane.b32.xlu0 %v2230_v33, %s3873_s9 }
0x1f05   :  { %v2272_v35 = vpop.f32.mrb[60].mxu1 }
0x1f06   :  { %v3362_v37 = vpop.f32.mrb[61].mxu1 }
0x1f07   :  { %v2275_v38 = vpop.f32.mrb[62].mxu1 }
0x1f08   :  { %v3363_v39 = vpop.f32.mrb[63].mxu1 }
0x1f24   :  { %v2280_v40 = vpop.permute.xlu0 %2279 }
0x1f25   :  { %3369 = vmatmul.mubr.msk.bf16.vlgmr.msra.gmra.mrb[64].mxu0 %vm272_vm3, %v2280_v40  ;;  %3377 = vmatmul.mubr.msk.bf16.vlgmr.msra.gmra.mrb[64].mxu1 %vm272_vm3, %v2280_v40 }
0x1f26   :  { %3381 = vmatpush3.bf16.msra.mxu0 %v4535_v58  ;;  %3384 = vmatprep.mubr.msk.bf16.mxu0 %vm3871_vm0, %v3870_v0 }
0x1f27   :  { %3382 = vmatprep.subr.bf16.mxu0 %v3870_v0  ;;  %3389 = vmatpush3.bf16.msra.mxu1 %v4480_v19 }
0x1f28   :  { %3390 = vmatprep.subr.bf16.mxu1 %v3870_v0  ;;  %3392 = vmatprep.mubr.msk.bf16.mxu1 %vm3871_vm0, %v3870_v0 }
0x1f2a   :  { %3383 = vmatpush3.bf16.msra.mxu0 %v4541_v59 }
0x1f2b   :  { %3391 = vmatpush3.bf16.msra.mxu1 %v4487_v16  ;;  %3396 = vmatprep.subr.bf16.mxu0 %v3870_v0 }
0x1f2c   :  { %3404 = vmatprep.subr.bf16.mxu1 %v3870_v0 }
0x1ff8   :  { %v2318_v43 = vpop.f32.mrb[64].mxu0  ;;  %v2385_v44 = vpop.f32.mrb[64].mxu1 }
0x1ff9   :  { %v2319_v45 = vadd.f32 %v2318_v43, %v2272_v35  ;;  %v3370_v46 = vpop.f32.mrb[65].mxu0  ;;  %v3378_v47 = vpop.f32.mrb[65].mxu1 }
0x1ffa   :  { %v2321_v48 = vpop.f32.mrb[66].mxu0  ;;  %v2388_v49 = vpop.f32.mrb[66].mxu1 }
0x1ffb   :  { %v2324_v50 = vadd.f32 %v4523_v41, %v2319_v45  ;;  %v3371_v10 = vpop.f32.mrb[67].mxu0  ;;  %v3379_v51 = vpop.f32.mrb[67].mxu1 }
0x1ffd   :  { %3627 = vtanh.f32 %v2324_v50  ;;  %v2972_v53 = vmul.f32 -1.442695, %v2324_v50 }
0x1fff   :  { %3629 = vpow2.f32 %v2972_v53 }
0x2007   :  { %v3628_v52 = vpop.eup %3627 }
0x2008   :  { %2334 = vrot.lane.b32.xlu1 %v3628_v52, %s3866_s7 }
0x2009   :  { %v3630_v54 = vpop.eup %3629 }
0x200a   :  { %v2328_v55 = vadd.f32 1.0, %v3630_v54 }
0x200c   :  { %3631 = vrcp.f32 %v2328_v55 }
0x2016   :  { %v3632_v56 = vpop.eup %3631 }
0x2017   :  { %v2332_v5 = vmul.f32 %v3632_v56, %v4529_v30 }
0x207a   :  { %v2335_v57 = vpop.permute.xlu1 %2334 }
0x207b   :  { %v2337_v3 = vmul.f32 %v3632_v56, %v2335_v57 }
0x207d   :  { %2339 = vrot.lane.b32.xlu0 %v2337_v3, %s3873_s9 }
0x20ef   :  { %v2340_v29 = vpop.permute.xlu0 %2339 }
0x20f0   :  { %v4596_v60 = vadd.f32 %v2340_v29, %v2332_v5 }
0x20f2   :  { %3633 = vtanh.f32 %v4596_v60 }
0x20fc   :  { %v3634_v61 = vpop.eup %3633 }
0x20fd   :  { %2345 = vrot.lane.b32.xlu1 %v3634_v61, %s3866_s7 }
0x216f   :  { %v2346_v62 = vpop.permute.xlu1 %2345 }
0x2170   :  { %v2348_v1 = vmul.f32 %v3632_v56, %v2346_v62 }
0x2172   :  { %v4600_v4 = vmax.f32 %v2348_v1, 0.0  ;;  %v2463_v23 = vpack.c.bf16 %v2348_v1, %v2348_v1 }
0x2174   :  { %v2350_v42 = vpack.c.bf16 %v4600_v4, %v4600_v4  ;;  %v2815_v29 = vrot.slane %v4600_v4, 6 }
0x2176   :  { %2392 = vrot.lane.b32.xlu0 %v2350_v42, %s3873_s9  ;;  %v2823_v42 = vsel %vm176_vm1, %v4547_v63, %v2815_v29 }
0x21e8   :  { %v2393_v6 = vpop.permute.xlu0 %2392 }
0x21e9   :  { %3385 = vmatmul.mubr.msk.bf16.vlgmr.msra.gmra.mrb[68].mxu0 %vm272_vm3, %v2393_v6 }
0x21ea   :  { %3397 = vmatpush3.bf16.msra.mxu0 %v4493_v21  ;;  %3400 = vmatprep.mubr.msk.bf16.mxu0 %vm3871_vm0, %v3870_v0 }
0x21eb   :  { %3398 = vmatprep.subr.bf16.mxu0 %v3870_v0 }
0x21ee   :  { %3399 = vmatpush3.bf16.msra.mxu0 %v4496_v22 }
0x21ef   :  { %3412 = vmatprep.subr.bf16.mxu0 %v3870_v0 }
0x22bc   :  { %v2431_v30 = vpop.f32.mrb[68].mxu0 }
0x22bd   :  { %v2432_v2 = vadd.f32 %v2431_v30, %v2385_v44  ;;  %v3386_v32 = vpop.f32.mrb[69].mxu0 }
0x22be   :  { %v2434_v7 = vpop.f32.mrb[70].mxu0 }
0x22bf   :  { %v2437_v12 = vadd.f32 %v4559_v31, %v2432_v2  ;;  %v3387_v8 = vpop.f32.mrb[71].mxu0 }
0x22c1   :  { %3635 = vtanh.f32 %v2437_v12  ;;  %v2975_v11 = vmul.f32 -1.442695, %v2437_v12 }
0x22c3   :  { %3637 = vpow2.f32 %v2975_v11 }
0x22cb   :  { %v3636_v9 = vpop.eup %3635 }
0x22cc   :  { %2447 = vrot.lane.b32.xlu1 %v3636_v9, %s3866_s7 }
0x22cd   :  { %v3638_v13 = vpop.eup %3637 }
0x22ce   :  { %v2441_v14 = vadd.f32 1.0, %v3638_v13 }
0x22d0   :  { %3639 = vrcp.f32 %v2441_v14 }
0x22da   :  { %v3640_v15 = vpop.eup %3639 }
0x22db   :  { %v2445_v24 = vmul.f32 %v3640_v15, %v4566_v25 }
0x233e   :  { %v2448_v18 = vpop.permute.xlu1 %2447 }
0x233f   :  { %v2450_v20 = vmul.f32 %v3640_v15, %v2448_v18 }
0x2341   :  { %2452 = vrot.lane.b32.xlu0 %v2450_v20, %s3873_s9 }
0x2345   :  { %2465 = vrot.lane.b32.xlu0 %v2463_v23, %s3873_s9 }
0x23b3   :  { %v2453_v26 = vpop.permute.xlu0 %2452 }
0x23b4   :  { %v4617_v17 = vadd.f32 %v2453_v26, %v2445_v24 }
0x23b6   :  { %3641 = vtanh.f32 %v4617_v17 }
0x23b7   :  { %v2466_v27 = vpop.permute.xlu0 %2465 }
0x23b8   :  { %3393 = vmatmul.mubr.msk.bf16.vlgmr.msra.gmra.mrb[68].mxu1 %vm272_vm3, %v2466_v27 }
0x23b9   :  { %3405 = vmatpush3.bf16.msra.mxu1 %v4440_v34  ;;  %3408 = vmatprep.mubr.msk.bf16.mxu1 %vm3871_vm0, %v3870_v0 }
0x23ba   :  { %3406 = vmatprep.subr.bf16.mxu1 %v3870_v0 }
0x23bd   :  { %3407 = vmatpush3.bf16.msra.mxu1 %v4444_v36 }
0x23be   :  { %3420 = vmatprep.subr.bf16.mxu1 %v3870_v0 }
0x23c0   :  { %v3642_v25 = vpop.eup %3641 }
0x23c1   :  { %2458 = vrot.lane.b32.xlu1 %v3642_v25, %s3866_s7 }
0x2433   :  { %v2459_v28 = vpop.permute.xlu1 %2458 }
0x2434   :  { %v2461_v33 = vmul.f32 %v3640_v15, %v2459_v28 }
0x2436   :  { %v2462_v35 = vpack.c.bf16 %v2461_v33, %v2461_v33 }
0x2438   :  { %2511 = vrot.lane.b32.xlu1 %v2462_v35, %s3873_s9 }
0x248b   :  { %v2504_v37 = vpop.f32.mrb[68].mxu1 }
0x248c   :  { %v3394_v38 = vpop.f32.mrb[69].mxu1 }
0x248d   :  { %v2507_v34 = vpop.f32.mrb[70].mxu1 }
0x248e   :  { %v3395_v39 = vpop.f32.mrb[71].mxu1 }
0x24aa   :  { %v2512_v40 = vpop.permute.xlu1 %2511 }
0x24ab   :  { %3401 = vmatmul.mubr.msk.bf16.vlgmr.msra.gmra.mrb[72].mxu0 %vm272_vm3, %v2512_v40  ;;  %3409 = vmatmul.mubr.msk.bf16.vlgmr.msra.gmra.mrb[72].mxu1 %vm272_vm3, %v2512_v40 }
0x24ac   :  { %3413 = vmatpush3.bf16.msra.mxu0 %v4535_v58  ;;  %3416 = vmatprep.mubr.msk.bf16.mxu0 %vm3871_vm0, %v3870_v0 }
0x24ad   :  { %3414 = vmatprep.subr.bf16.mxu0 %v3870_v0  ;;  %3421 = vmatpush3.bf16.msra.mxu1 %v4480_v19 }
0x24ae   :  { %3422 = vmatprep.subr.bf16.mxu1 %v3870_v0  ;;  %3424 = vmatprep.mubr.msk.bf16.mxu1 %vm3871_vm0, %v3870_v0 }
0x24b0   :  { %3415 = vmatpush3.bf16.msra.mxu0 %v4541_v59 }
0x24b1   :  { %3423 = vmatpush3.bf16.msra.mxu1 %v4487_v16  ;;  %3428 = vmatprep.subr.bf16.mxu0 %v3870_v0 }
0x24b2   :  { %3436 = vmatprep.subr.bf16.mxu1 %v3870_v0 }
0x257e   :  { %v2550_v36 = vpop.f32.mrb[72].mxu0  ;;  %v2617_v58 = vpop.f32.mrb[72].mxu1 }
0x257f   :  { %v2551_v43 = vadd.f32 %v2550_v36, %v2504_v37  ;;  %v3402_v44 = vpop.f32.mrb[73].mxu0  ;;  %v3410_v45 = vpop.f32.mrb[73].mxu1 }
0x2580   :  { %v2553_v46 = vpop.f32.mrb[74].mxu0  ;;  %v2620_v19 = vpop.f32.mrb[74].mxu1 }
0x2581   :  { %v2556_v47 = vadd.f32 %v4523_v41, %v2551_v43  ;;  %v3403_v48 = vpop.f32.mrb[75].mxu0  ;;  %v3411_v49 = vpop.f32.mrb[75].mxu1 }
0x2583   :  { %3643 = vtanh.f32 %v2556_v47  ;;  %v2978_v16 = vmul.f32 -1.442695, %v2556_v47 }
0x2585   :  { %3645 = vpow2.f32 %v2978_v16  ;;  %v3474_v16 = vld [vmem:[%s4712_s16 + $0x8] sm:$0xff]  }
0x258d   :  { %v3644_v50 = vpop.eup %3643 }
0x258e   :  { %2566 = vrot.lane.b32.xlu0 %v3644_v50, %s3866_s7 }
0x258f   :  { %v3646_v59 = vpop.eup %3645 }
0x2590   :  { %v2560_v10 = vadd.f32 1.0, %v3646_v59 }
0x2592   :  { %3647 = vrcp.f32 %v2560_v10 }
0x259c   :  { %v3648_v51 = vpop.eup %3647 }
0x259d   :  { %v2564_v54 = vmul.f32 %v3648_v51, %v4596_v60 }
0x2600   :  { %v2567_v52 = vpop.permute.xlu0 %2566 }
0x2601   :  { %v2569_v53 = vmul.f32 %v3648_v51, %v2567_v52 }
0x2603   :  { %2571 = vrot.lane.b32.xlu1 %v2569_v53, %s3873_s9 }
0x2675   :  { %v2572_v55 = vpop.permute.xlu1 %2571 }
0x2676   :  { %v4647_v56 = vadd.f32 %v2572_v55, %v2564_v54 }
0x2678   :  { %3649 = vtanh.f32 %v4647_v56 }
0x2682   :  { %v3650_v57 = vpop.eup %3649 }
0x2683   :  { %2577 = vrot.lane.b32.xlu0 %v3650_v57, %s3866_s7 }
0x26f5   :  { %v2578_v3 = vpop.permute.xlu0 %2577 }
0x26f6   :  { %v2580_v5 = vmul.f32 %v3648_v51, %v2578_v3 }
0x26f8   :  { %v2581_v61 = vmax.f32 %v2580_v5, 0.0 }
0x26fa   :  { %v2818_v62 = vrot.slane %v2581_v61, 4  ;;  %v2582_v1 = vpack.c.bf16 %v2581_v61, %v2581_v61 }
0x26fc   :  { %2624 = vrot.lane.b32.xlu1 %v2582_v1, %s3873_s9  ;;  %v4655_v60 = vsel %vm2824_vm4, %v2823_v42, %v2818_v62 }
0x276e   :  { %v2625_v6 = vpop.permute.xlu1 %2624 }
0x276f   :  { %3417 = vmatmul.mubr.msk.bf16.vlgmr.msra.gmra.mrb[76].mxu0 %vm272_vm3, %v2625_v6 }
0x2770   :  { %3429 = vmatpush3.bf16.msra.mxu0 %v4493_v21  ;;  %3432 = vmatprep.mubr.msk.bf16.mxu0 %vm3871_vm0, %v3870_v0 }
0x2771   :  { %3430 = vmatprep.subr.bf16.mxu0 %v3870_v0 }
0x2774   :  { %3431 = vmatpush3.bf16.msra.mxu0 %v4496_v22  ;;  %v2695_v22 = vpack.c.bf16 %v2580_v5, %v2580_v5 }
0x2842   :  { %v2663_v4 = vpop.f32.mrb[76].mxu0 }
0x2843   :  { %v2664_v30 = vadd.f32 %v2663_v4, %v2617_v58  ;;  %v3418_v2 = vpop.f32.mrb[77].mxu0 }
0x2844   :  { %v2666_v63 = vpop.f32.mrb[78].mxu0 }
0x2845   :  { %v2669_v32 = vadd.f32 %v4559_v31, %v2664_v30  ;;  %v3419_v7 = vpop.f32.mrb[79].mxu0 }
0x2847   :  { %3651 = vtanh.f32 %v2669_v32  ;;  %v2981_v8 = vmul.f32 -1.442695, %v2669_v32 }
0x2849   :  { %3653 = vpow2.f32 %v2981_v8 }
0x2851   :  { %v3652_v12 = vpop.eup %3651 }
0x2852   :  { %2679 = vrot.lane.b32.xlu0 %v3652_v12, %s3866_s7 }
0x2853   :  { %v3654_v21 = vpop.eup %3653 }
0x2854   :  { %v2673_v9 = vadd.f32 1.0, %v3654_v21 }
0x2856   :  { %3655 = vrcp.f32 %v2673_v9 }
0x2860   :  { %v3656_v11 = vpop.eup %3655 }
0x2861   :  { %v2677_v31 = vmul.f32 %v3656_v11, %v4617_v17 }
0x28c4   :  { %v2680_v13 = vpop.permute.xlu0 %2679 }
0x28c5   :  { %v2682_v14 = vmul.f32 %v3656_v11, %v2680_v13 }
0x28c7   :  { %2684 = vrot.lane.b32.xlu1 %v2682_v14, %s3873_s9 }
0x28cb   :  { %2697 = vrot.lane.b32.xlu1 %v2695_v22, %s3873_s9 }
0x2939   :  { %v2685_v15 = vpop.permute.xlu1 %2684 }
0x293a   :  { %v2687_v18 = vadd.f32 %v2685_v15, %v2677_v31 }
0x293c   :  { %3657 = vtanh.f32 %v2687_v18 }
0x293d   :  { %v2698_v20 = vpop.permute.xlu1 %2697 }
0x293e   :  { %3425 = vmatmul.mubr.msk.bf16.vlgmr.msra.gmra.mrb[76].mxu1 %vm272_vm3, %v2698_v20 }
0x293f   :  { %3440 = vmatprep.mubr.msk.bf16.mxu1 %vm3871_vm0, %v3870_v0 }
0x2946   :  { %v3658_v23 = vpop.eup %3657 }
0x2947   :  { %2690 = vrot.lane.b32.xlu0 %v3658_v23, %s3866_s7 }
0x29b9   :  { %v2691_v24 = vpop.permute.xlu0 %2690 }
0x29ba   :  { %v2693_v26 = vmul.f32 %v3656_v11, %v2691_v24 }
0x29bc   :  { %v2694_v27 = vpack.c.bf16 %v2693_v26, %v2693_v26 }
0x29be   :  { %2743 = vrot.lane.b32.xlu0 %v2694_v27, %s3873_s9 }
0x2a11   :  { %v2736_v25 = vpop.f32.mrb[76].mxu1 }
0x2a12   :  { %v3426_v28 = vpop.f32.mrb[77].mxu1 }
0x2a13   :  { %v2739_v17 = vpop.f32.mrb[78].mxu1 }
0x2a14   :  { %v3427_v33 = vpop.f32.mrb[79].mxu1 }
0x2a30   :  { %v2744_v35 = vpop.permute.xlu0 %2743 }
0x2a31   :  { %3433 = vmatmul.mubr.msk.bf16.vlgmr.msra.gmra.mrb[80].mxu0 %vm272_vm3, %v2744_v35 }
0x2b04   :  { %v2782_v37 = vpop.f32.mrb[80].mxu0 }
0x2b05   :  { %v2783_v38 = vadd.f32 %v2782_v37, %v2736_v25  ;;  %v3434_v34 = vpop.f32.mrb[81].mxu0 }
0x2b06   :  { %v2785_v39 = vpop.f32.mrb[82].mxu0 }
0x2b07   :  { %v2788_v40 = vadd.f32 %v4523_v41, %v2783_v38  ;;  %v3435_v36 = vpop.f32.mrb[83].mxu0  ;;  %v3473_v41 = vld [vmem:[%s4712_s16] sm:$0xff]  }
0x2b08   :  { %3437 = vmatpush3.bf16.msra.mxu1 %v3473_v41 }
0x2b09   :  { %3659 = vtanh.f32 %v2788_v40  ;;  %v2984_v43 = vmul.f32 -1.442695, %v2788_v40  ;;  %3438 = vmatprep.subr.bf16.mxu1 %v3870_v0  ;;  %v2908_v0 = vld [vmem:[%s4713_s17] ss:$0 sm:$0xff] }
0x2b0b   :  { %3661 = vpow2.f32 %v2984_v43 }
0x2b0c   :  { %3439 = vmatpush3.bf16.msra.mxu1 %v3474_v16 }
0x2b13   :  { %v3660_v58 = vpop.eup %3659 }
0x2b14   :  { %2798 = vrot.lane.b32.xlu1 %v3660_v58, %s3866_s7 }
0x2b15   :  { %v3662_v44 = vpop.eup %3661 }
0x2b16   :  { %v2792_v45 = vadd.f32 1.0, %v3662_v44 }
0x2b18   :  { %3663 = vrcp.f32 %v2792_v45 }
0x2b22   :  { %v3664_v46 = vpop.eup %3663 }
0x2b23   :  { %v2796_v48 = vmul.f32 %v3664_v46, %v4647_v56 }
0x2b86   :  { %v2799_v19 = vpop.permute.xlu1 %2798 }
0x2b87   :  { %v2801_v47 = vmul.f32 %v3664_v46, %v2799_v19 }
0x2b89   :  { %2803 = vrot.lane.b32.xlu0 %v2801_v47, %s3873_s9 }
0x2bfb   :  { %v2804_v49 = vpop.permute.xlu0 %2803 }
0x2bfc   :  { %v2806_v50 = vadd.f32 %v2804_v49, %v2796_v48 }
0x2bfe   :  { %3665 = vtanh.f32 %v2806_v50 }
0x2c08   :  { %v3666_v59 = vpop.eup %3665 }
0x2c09   :  { %2809 = vrot.lane.b32.xlu1 %v3666_v59, %s3866_s7 }
0x2c7b   :  { %v2810_v10 = vpop.permute.xlu1 %2809 }
0x2c7c   :  { %v2812_v51 = vmul.f32 %v3664_v46, %v2810_v10 }
0x2c7e   :  { %v2813_v52 = vmax.f32 %v2812_v51, 0.0 }
0x2c80   :  { %v2821_v53 = vrot.slane %v2813_v52, 2 }
0x2c82   :  { %v2827_v54 = vsel %vm2826_vm5, %v4655_v60, %v2821_v53 }
0x2c83   :  { %v2832_v55 = vpack.c.bf16 %v2827_v54, %v2827_v54 }
0x2c85   :  { %2834 = vrot.lane.b32.xlu0 %v2832_v55, %s3873_s9 }
0x2cf7   :  { %v2835_v56 = vpop.permute.xlu0 %2834 }
0x2cf8   :  { %3441 = vmatmul.mubr.msk.bf16.vlgmr.msra.gmra.mrb[80].mxu1 %vm272_vm3, %v2835_v56 }
0x2dcb   :  { %v2885_v57 = vpop.f32.mrb[80].mxu1 }
0x2dcc   :  { %v2886_v3 = vadd.f32 %v2908_v0, %v2885_v57  ;;  %v3442_v5 = vpop.f32.mrb[81].mxu1 }
0x2dcd   :  { %v2888_v29 = vpop.f32.mrb[82].mxu1 }
0x2dce   :  { %2891 = vst.msk [vmem:[%s4714_s18] sm:$0xff] %vm172_vm2, %v2886_v3  ;;  %v3443_v61 = vpop.f32.mrb[83].mxu1 }
0x2dcf   :  { %2896 = vsyncpa [#allocation3], 1 }
0x2dd0   :  { %2897 = vsyncpa [#allocation5], 1 }
0x2dd1   :  { %2898 = vsyncpa [#allocation8], 1 }
0x2dd2   :  { %2899 = vsyncpa [#allocation11], 1 }
0x2dd3   :  { %2900 = vsyncpa [#allocation14], 1 }

</bundles_post_ra>
